<compile_context>
chip_gen: v5e
topology: v5e:2x2
jax: 0.10.0
libtpu: 0.0.40
codegen_flags: <defaults>
</compile_context>

<pallas_src>
import functools

import jax
import jax.numpy as jnp
from jax.experimental import pallas as pl
from jax.experimental.pallas import tpu as pltpu


# ----------------------------------------------------------------------------
# Fused forward kernel: Bt graphs per grid step.
# ----------------------------------------------------------------------------
def _make_fused_kernel(*, alpha: float, h1: int, lat: int, h2: int,
                       out_dim: int, bt: int, n: int):
    f1 = h1 * lat
    f2 = h2 * out_dim

    def _masked_softmax(e, adj):
        # torch-exact: leaky_relu -> multiplicative adjacency mask -> softmax
        e = jnp.where(e > 0, e, alpha * e)                 # leaky_relu (VPU)
        e = adj * e                                        # adj has diag = 1
        m = jnp.max(e, axis=-1, keepdims=True)
        p = jnp.exp(e - m)                                 # EUP
        return p / jnp.sum(p, axis=-1, keepdims=True)      # exact normalization

    def kernel(x_ref, adj_ref, w1_ref, b1_ref, g_ref, bb_ref, w2_ref, b2_ref,
               o_ref, hslab_ref):
        adj = adj_ref[...][None]                           # (1, N, N)
        xf = x_ref[...].reshape(bt * n, -1)                # (Bt*N, in_dim)

        # ---- layer-1: one wide matmul gives hcat | e_src | e_dst ------------
        proj1 = jnp.dot(xf, w1_ref[...], preferred_element_type=jnp.float32)
        hcat3 = proj1[:, :f1].reshape(bt, n, f1)
        esrc1 = proj1[:, f1:f1 + h1].reshape(bt, n, h1)
        edst1 = proj1[:, f1 + h1:].reshape(bt, n, h1)

        # Per-head attention + aggregation, written straight into the scratch
        # slab (no jnp.concatenate, no 8 live head intermediates).  N=16 >= 8
        # sublanes, so the (Bt,N,N) score blocks are already sublane-dense;
        # flattening to (Bt*N, N) would not change vreg packing.
        for k in range(h1):
            e = esrc1[:, :, k][:, :, None] + edst1[:, :, k][:, None, :]  # (Bt,N,N)
            attn = _masked_softmax(e, adj)
            agg = jnp.einsum("bij,bjd->bid", attn,
                             hcat3[:, :, k * lat:(k + 1) * lat],
                             preferred_element_type=jnp.float32)         # (Bt,N,lat)
            hslab_ref[:, k * lat:(k + 1) * lat] = agg.reshape(bt * n, lat)

        # ---- ELU + LayerNorm on the full (Bt*N, f1) slab ---------------------
        h = hslab_ref[...] + b1_ref[...]
        h = jnp.where(h > 0, h, jnp.exp(jnp.minimum(h, 0.0)) - 1.0)       # ELU
        mu = jnp.mean(h, axis=-1, keepdims=True)
        xc = h - mu
        var = jnp.mean(xc * xc, axis=-1, keepdims=True)
        h = xc * jax.lax.rsqrt(var + 1e-5)
        h = h * g_ref[...] + bb_ref[...]

        # ---- layer-2: one wide matmul, 4 heads, head-mean --------------------
        proj2 = jnp.dot(h, w2_ref[...], preferred_element_type=jnp.float32)
        h2cat3 = proj2[:, :f2].reshape(bt, n, f2)
        esrc2 = proj2[:, f2:f2 + h2].reshape(bt, n, h2)
        edst2 = proj2[:, f2 + h2:].reshape(bt, n, h2)

        acc = jnp.zeros((bt, n, out_dim), jnp.float32)
        for m in range(h2):
            e = esrc2[:, :, m][:, :, None] + edst2[:, :, m][:, None, :]
            attn = _masked_softmax(e, adj)
            acc = acc + jnp.einsum("bij,bjd->bid", attn,
                                   h2cat3[:, :, m * out_dim:(m + 1) * out_dim],
                                   preferred_element_type=jnp.float32)
        # head mean; per-head biases averaged at pack time (exact).
        # out_dim=10 < 128 lanes -> masked partial stores; negligible here.
        o_ref[...] = (acc * (1.0 / h2) + b2_ref[...]).astype(o_ref.dtype)

    return kernel


# ----------------------------------------------------------------------------
# Parameter init (matches PyTorch module shapes) + packing for the fused kernel
# ----------------------------------------------------------------------------
def _xavier_uniform(key, shape):
    fan_in, fan_out = shape[-2], shape[-1]
    bound = (6.0 / (fan_in + fan_out)) ** 0.5
    return jax.random.uniform(key, shape, jnp.float32, minval=-bound, maxval=bound)


def init_params(key, in_dim=32, latent_dim=32, out_dim=10, head_gat=8, nhead_out=4):
    k = jax.random.split(key, 4)
    w1 = jnp.stack([_xavier_uniform(kk, (in_dim, latent_dim))
                    for kk in jax.random.split(k[0], head_gat)])           # (H1, in, lat)
    a1 = jnp.stack([_xavier_uniform(kk, (2 * latent_dim, 1))[:, 0]
                    for kk in jax.random.split(k[1], head_gat)])           # (H1, 2*lat)
    b1 = jnp.zeros((head_gat, latent_dim), jnp.float32)
    ln_g = jnp.ones((latent_dim * head_gat,), jnp.float32)
    ln_b = jnp.zeros((latent_dim * head_gat,), jnp.float32)
    w2 = jnp.stack([_xavier_uniform(kk, (latent_dim * head_gat, out_dim))
                    for kk in jax.random.split(k[2], nhead_out)])          # (H2, f1, out)
    a2 = jnp.stack([_xavier_uniform(kk, (2 * out_dim, 1))[:, 0]
                    for kk in jax.random.split(k[3], nhead_out)])          # (H2, 2*out)
    b2 = jnp.zeros((nhead_out, out_dim), jnp.float32)
    return dict(w1=w1, a1=a1, b1=b1, ln_g=ln_g, ln_b=ln_b, w2=w2, a2=a2, b2=b2)


def pack_params(params):
    """Pack per-head parameters into the fused layout (done once, off hot path):
    W?big = [per-head weights concatenated | W @ a_src folded | W @ a_dst folded]."""
    w1, a1, b1 = params["w1"], params["a1"], params["b1"]
    w2, a2, b2 = params["w2"], params["a2"], params["b2"]
    H1, in_dim, lat = w1.shape
    H2, f1, out_dim = w2.shape
    a1_src, a1_dst = a1[:, :lat], a1[:, lat:]
    a2_src, a2_dst = a2[:, :out_dim], a2[:, out_dim:]

    w1_packed = jnp.transpose(w1, (1, 0, 2)).reshape(in_dim, H1 * lat)   # (in, f1)
    w2_packed = jnp.transpose(w2, (1, 0, 2)).reshape(f1, H2 * out_dim)   # (f1, f2)
    # fold attention projections into the input weights (exact):
    w1a_src = jnp.einsum("hil,hl->ih", w1, a1_src)                       # (in, H1)
    w1a_dst = jnp.einsum("hil,hl->ih", w1, a1_dst)                       # (in, H1)
    w2a_src = jnp.einsum("hfo,ho->fh", w2, a2_src)                       # (f1, H2)
    w2a_dst = jnp.einsum("hfo,ho->fh", w2, a2_dst)                       # (f1, H2)

    return dict(
        w1big=jnp.concatenate([w1_packed, w1a_src, w1a_dst], axis=1),    # (in, f1+2*H1)
        w2big=jnp.concatenate([w2_packed, w2a_src, w2a_dst], axis=1),    # (f1, f2+2*H2)
        b1=b1.reshape(1, H1 * lat),
        b2=jnp.mean(b2, axis=0).reshape(1, out_dim),                     # head-mean bias
        ln_g=params["ln_g"].reshape(1, H1 * lat),
        ln_b=params["ln_b"].reshape(1, H1 * lat),
    )


# ----------------------------------------------------------------------------
# MultiHeadGAT forward: fused pallas_call, batch-blocked grid
# ----------------------------------------------------------------------------
def _choose_block_batch(batch, n):
    """Target <=256 rows per grid step (MXU height), but keep >= 2 grid steps
    when batch >= 2 so the 'parallel' axis still shards across v7x's 2 TCs."""
    target = max(1, 256 // max(n, 1))
    if batch >= 2:
        return max(1, min(target, (batch + 1) // 2))
    return 1


@functools.partial(jax.jit, static_argnames=("h1", "h2", "alpha"))
def multi_head_gat(x, adj, packed, *, h1, h2, alpha=0.2):
    B, N, in_dim = x.shape
    f1 = packed["b1"].shape[1]            # H1 * latent
    lat = f1 // h1
    out_dim = packed["b2"].shape[1]
    f2 = h2 * out_dim

    bt = _choose_block_batch(B, N)
    steps = (B + bt - 1) // bt
    b_pad = steps * bt
    if b_pad != B:                        # pad ragged batch with zero graphs
        x = jnp.concatenate([x, jnp.zeros((b_pad - B, N, in_dim), x.dtype)], axis=0)

    # torch: adj.clone(); adj.fill_diagonal_(1)  -- hoisted out of the kernel
    adj_d = jnp.where(jnp.eye(N, dtype=bool), jnp.ones((), adj.dtype), adj)

    kernel = _make_fused_kernel(alpha=alpha, h1=h1, lat=lat, h2=h2,
                                out_dim=out_dim, bt=bt, n=N)

    out = pl.pallas_call(
        kernel,
        out_shape=jax.ShapeDtypeStruct((b_pad, N, out_dim), x.dtype),
        grid_spec=pltpu.PrefetchScalarGridSpec(
            num_scalar_prefetch=0,
            grid=(steps,),
            in_specs=[
                pl.BlockSpec((bt, N, in_dim), lambda g: (g, 0, 0)),     # x block
                pl.BlockSpec((N, N), lambda g: (0, 0)),                 # adj (diag=1)
                pl.BlockSpec((in_dim, f1 + 2 * h1), lambda g: (0, 0)),  # W1big
                pl.BlockSpec((1, f1), lambda g: (0, 0)),                # b1 concat
                pl.BlockSpec((1, f1), lambda g: (0, 0)),                # ln gamma
                pl.BlockSpec((1, f1), lambda g: (0, 0)),                # ln beta
                pl.BlockSpec((f1, f2 + 2 * h2), lambda g: (0, 0)),      # W2big
                pl.BlockSpec((1, out_dim), lambda g: (0, 0)),           # b2 head-mean
            ],
            out_specs=pl.BlockSpec((bt, N, out_dim), lambda g: (g, 0, 0)),
            scratch_shapes=[pltpu.VMEM((bt * N, f1), jnp.float32)],     # layer-1 slab
        ),
        compiler_params=pltpu.CompilerParams(
            dimension_semantics=("parallel",)),
    )(x, adj_d, packed["w1big"], packed["b1"], packed["ln_g"], packed["ln_b"],
      packed["w2big"], packed["b2"])
    return out[:B] if b_pad != B else out


if __name__ == "__main__":
    key = jax.random.PRNGKey(0)
    k_x, k_adj, k_p = jax.random.split(key, 3)

    B, N, IN_DIM, LATENT, OUT_DIM, H1, H2 = 4, 16, 32, 32, 10, 8, 4
    x = jax.random.normal(k_x, (B, N, IN_DIM), jnp.float32)
    adj = jax.random.bernoulli(k_adj, 0.5, (N, N)).astype(jnp.float32)

    params = init_params(k_p, in_dim=IN_DIM, latent_dim=LATENT, out_dim=OUT_DIM,
                         head_gat=H1, nhead_out=H2)
    packed = pack_params(params)

    out = multi_head_gat(x, adj, packed, h1=H1, h2=H2, alpha=0.2)
    jax.block_until_ready(out)
    assert out.shape == (B, N, OUT_DIM) and out.dtype == jnp.float32
    print("KERNEL_OK")
</pallas_src>

<mosaic_0001>
module attributes {stable_mosaic.version = 11 : i64} {
  func.func @kernel(%arg0: i32, %arg1: memref<2x16x32xf32, #tpu.memory_space<vmem>>, %arg2: memref<16x16xf32, #tpu.memory_space<vmem>>, %arg3: memref<32x272xf32, #tpu.memory_space<vmem>>, %arg4: memref<1x256xf32, #tpu.memory_space<vmem>>, %arg5: memref<1x256xf32, #tpu.memory_space<vmem>>, %arg6: memref<1x256xf32, #tpu.memory_space<vmem>>, %arg7: memref<256x48xf32, #tpu.memory_space<vmem>>, %arg8: memref<1x10xf32, #tpu.memory_space<vmem>>, %arg9: memref<2x16x10xf32, #tpu.memory_space<vmem>>, %arg10: memref<32x256xf32, #tpu.memory_space<vmem>>) attributes {dimension_semantics = [#tpu.dimension_semantics<parallel>], iteration_bounds = array<i64: 2>, scalar_prefetch = 0 : i64, scratch_operands = 1 : i64, tpu.core_type = #tpu.core_type<tc>, window_params = [{transform_indices = @transform_0, window_bounds = array<i64: 2, 16, 32>}, {pipeline_mode = #tpu.pipeline_mode<synchronous>, transform_indices = @transform_1, window_bounds = array<i64: 16, 16>}, {pipeline_mode = #tpu.pipeline_mode<synchronous>, transform_indices = @transform_2, window_bounds = array<i64: 32, 272>}, {pipeline_mode = #tpu.pipeline_mode<synchronous>, transform_indices = @transform_3, window_bounds = array<i64: 1, 256>}, {pipeline_mode = #tpu.pipeline_mode<synchronous>, transform_indices = @transform_4, window_bounds = array<i64: 1, 256>}, {pipeline_mode = #tpu.pipeline_mode<synchronous>, transform_indices = @transform_5, window_bounds = array<i64: 1, 256>}, {pipeline_mode = #tpu.pipeline_mode<synchronous>, transform_indices = @transform_6, window_bounds = array<i64: 256, 48>}, {pipeline_mode = #tpu.pipeline_mode<synchronous>, transform_indices = @transform_7, window_bounds = array<i64: 1, 10>}, {transform_indices = @transform_8, window_bounds = array<i64: 2, 16, 10>}]} {
    %c0 = arith.constant 0 : index
    %c0_0 = arith.constant 0 : index
    %0 = vector.load %arg2[%c0, %c0_0] : memref<16x16xf32, #tpu.memory_space<vmem>>, vector<16x16xf32>
    %1 = vector.shape_cast %0 : vector<16x16xf32> to vector<1x16x16xf32>
    %c0_1 = arith.constant 0 : index
    %c0_2 = arith.constant 0 : index
    %c0_3 = arith.constant 0 : index
    %2 = vector.load %arg1[%c0_1, %c0_2, %c0_3] : memref<2x16x32xf32, #tpu.memory_space<vmem>>, vector<2x16x32xf32>
    %3 = vector.shape_cast %2 : vector<2x16x32xf32> to vector<32x32xf32>
    %c0_4 = arith.constant 0 : index
    %c0_5 = arith.constant 0 : index
    %4 = vector.load %arg3[%c0_4, %c0_5] : memref<32x272xf32, #tpu.memory_space<vmem>>, vector<32x272xf32>
    %cst = arith.constant dense<0.000000e+00> : vector<32x272xf32>
    %5 = tpu.matmul %3, %4, %cst {dimension_numbers = #tpu.dot_dimension_numbers<[1], [0], [0], [1], [0, 0, 1, 1], [], []>} : vector<32x32xf32>, vector<32x272xf32>, vector<32x272xf32> -> vector<32x272xf32>
    %6 = vector.extract_strided_slice %5 {offsets = [0, 0], sizes = [32, 256], strides = [1, 1]} : vector<32x272xf32> to vector<32x256xf32>
    %7 = vector.shape_cast %6 : vector<32x256xf32> to vector<2x16x256xf32>
    %8 = vector.extract_strided_slice %5 {offsets = [0, 256], sizes = [32, 8], strides = [1, 1]} : vector<32x272xf32> to vector<32x8xf32>
    %9 = vector.shape_cast %8 : vector<32x8xf32> to vector<2x16x8xf32>
    %10 = vector.extract_strided_slice %5 {offsets = [0, 264], sizes = [32, 8], strides = [1, 1]} : vector<32x272xf32> to vector<32x8xf32>
    %11 = vector.shape_cast %10 : vector<32x8xf32> to vector<2x16x8xf32>
    %12 = vector.extract_strided_slice %9 {offsets = [0, 0, 0], sizes = [2, 16, 1], strides = [1, 1, 1]} : vector<2x16x8xf32> to vector<2x16x1xf32>
    %13 = vector.shape_cast %12 : vector<2x16x1xf32> to vector<2x16xf32>
    %14 = vector.shape_cast %13 : vector<2x16xf32> to vector<2x16x1xf32>
    %15 = vector.extract_strided_slice %11 {offsets = [0, 0, 0], sizes = [2, 16, 1], strides = [1, 1, 1]} : vector<2x16x8xf32> to vector<2x16x1xf32>
    %16 = vector.shape_cast %15 : vector<2x16x1xf32> to vector<2x16xf32>
    %17 = vector.shape_cast %16 : vector<2x16xf32> to vector<2x1x16xf32>
    %18 = vector.broadcast %14 : vector<2x16x1xf32> to vector<2x16x16xf32>
    %19 = vector.broadcast %17 : vector<2x1x16xf32> to vector<2x16x16xf32>
    %20 = arith.addf %18, %19 : vector<2x16x16xf32>
    %cst_6 = arith.constant 0.000000e+00 : f32
    %21 = vector.broadcast %cst_6 : f32 to vector<2x16x16xf32>
    %22 = arith.cmpf ogt, %20, %21 : vector<2x16x16xf32>
    %cst_7 = arith.constant 2.000000e-01 : f32
    %23 = vector.broadcast %cst_7 : f32 to vector<2x16x16xf32>
    %24 = arith.mulf %23, %20 : vector<2x16x16xf32>
    %25 = arith.select %22, %20, %24 : vector<2x16x16xi1>, vector<2x16x16xf32>
    %26 = vector.broadcast %1 : vector<1x16x16xf32> to vector<2x16x16xf32>
    %27 = arith.mulf %26, %25 : vector<2x16x16xf32>
    %cst_8 = arith.constant dense<0xFF800000> : vector<2x16xf32>
    %28 = vector.multi_reduction <maximumf>, %27, %cst_8 [2] : vector<2x16x16xf32> to vector<2x16xf32>
    %29 = vector.shape_cast %28 : vector<2x16xf32> to vector<2x16x1xf32>
    %30 = vector.broadcast %29 : vector<2x16x1xf32> to vector<2x16x16xf32>
    %31 = arith.subf %27, %30 : vector<2x16x16xf32>
    %32 = math.exp %31 : vector<2x16x16xf32>
    %cst_9 = arith.constant dense<0.000000e+00> : vector<2x16xf32>
    %33 = vector.multi_reduction <add>, %32, %cst_9 [2] : vector<2x16x16xf32> to vector<2x16xf32>
    %34 = vector.shape_cast %33 : vector<2x16xf32> to vector<2x16x1xf32>
    %35 = vector.broadcast %34 : vector<2x16x1xf32> to vector<2x16x16xf32>
    %36 = arith.divf %32, %35 : vector<2x16x16xf32>
    %37 = vector.extract_strided_slice %7 {offsets = [0, 0, 0], sizes = [2, 16, 32], strides = [1, 1, 1]} : vector<2x16x256xf32> to vector<2x16x32xf32>
    "tpu.trace_start"() <{level = 10 : i32, message = "bij,bjd->bid"}> : () -> ()
    %cst_10 = arith.constant dense<0.000000e+00> : vector<2x16x32xf32>
    %38 = tpu.matmul %36, %37, %cst_10 {dimension_numbers = #tpu.dot_dimension_numbers<[2], [1], [1], [2], [0, 0, 0, 1, 1, 2], [0], [0]>} : vector<2x16x16xf32>, vector<2x16x32xf32>, vector<2x16x32xf32> -> vector<2x16x32xf32>
    "tpu.trace_stop"() : () -> ()
    %39 = vector.shape_cast %38 : vector<2x16x32xf32> to vector<32x32xf32>
    %c0_11 = arith.constant 0 : index
    %c0_12 = arith.constant 0 : index
    %40 = vector.load %arg10[%c0_11, %c0_12] : memref<32x256xf32, #tpu.memory_space<vmem>>, vector<32x32xf32>
    tpu.vector_store %arg10[%c0_11, %c0_12], %39 {strides = array<i32>} : memref<32x256xf32, #tpu.memory_space<vmem>>, vector<32x32xf32>,
    %41 = vector.extract_strided_slice %9 {offsets = [0, 0, 1], sizes = [2, 16, 1], strides = [1, 1, 1]} : vector<2x16x8xf32> to vector<2x16x1xf32>
    %42 = vector.shape_cast %41 : vector<2x16x1xf32> to vector<2x16xf32>
    %43 = vector.shape_cast %42 : vector<2x16xf32> to vector<2x16x1xf32>
    %44 = vector.extract_strided_slice %11 {offsets = [0, 0, 1], sizes = [2, 16, 1], strides = [1, 1, 1]} : vector<2x16x8xf32> to vector<2x16x1xf32>
    %45 = vector.shape_cast %44 : vector<2x16x1xf32> to vector<2x16xf32>
    %46 = vector.shape_cast %45 : vector<2x16xf32> to vector<2x1x16xf32>
    %47 = vector.broadcast %43 : vector<2x16x1xf32> to vector<2x16x16xf32>
    %48 = vector.broadcast %46 : vector<2x1x16xf32> to vector<2x16x16xf32>
    %49 = arith.addf %47, %48 : vector<2x16x16xf32>
    %cst_13 = arith.constant 0.000000e+00 : f32
    %50 = vector.broadcast %cst_13 : f32 to vector<2x16x16xf32>
    %51 = arith.cmpf ogt, %49, %50 : vector<2x16x16xf32>
    %cst_14 = arith.constant 2.000000e-01 : f32
    %52 = vector.broadcast %cst_14 : f32 to vector<2x16x16xf32>
    %53 = arith.mulf %52, %49 : vector<2x16x16xf32>
    %54 = arith.select %51, %49, %53 : vector<2x16x16xi1>, vector<2x16x16xf32>
    %55 = vector.broadcast %1 : vector<1x16x16xf32> to vector<2x16x16xf32>
    %56 = arith.mulf %55, %54 : vector<2x16x16xf32>
    %cst_15 = arith.constant dense<0xFF800000> : vector<2x16xf32>
    %57 = vector.multi_reduction <maximumf>, %56, %cst_15 [2] : vector<2x16x16xf32> to vector<2x16xf32>
    %58 = vector.shape_cast %57 : vector<2x16xf32> to vector<2x16x1xf32>
    %59 = vector.broadcast %58 : vector<2x16x1xf32> to vector<2x16x16xf32>
    %60 = arith.subf %56, %59 : vector<2x16x16xf32>
    %61 = math.exp %60 : vector<2x16x16xf32>
    %cst_16 = arith.constant dense<0.000000e+00> : vector<2x16xf32>
    %62 = vector.multi_reduction <add>, %61, %cst_16 [2] : vector<2x16x16xf32> to vector<2x16xf32>
    %63 = vector.shape_cast %62 : vector<2x16xf32> to vector<2x16x1xf32>
    %64 = vector.broadcast %63 : vector<2x16x1xf32> to vector<2x16x16xf32>
    %65 = arith.divf %61, %64 : vector<2x16x16xf32>
    %66 = vector.extract_strided_slice %7 {offsets = [0, 0, 32], sizes = [2, 16, 32], strides = [1, 1, 1]} : vector<2x16x256xf32> to vector<2x16x32xf32>
    "tpu.trace_start"() <{level = 10 : i32, message = "bij,bjd->bid"}> : () -> ()
    %cst_17 = arith.constant dense<0.000000e+00> : vector<2x16x32xf32>
    %67 = tpu.matmul %65, %66, %cst_17 {dimension_numbers = #tpu.dot_dimension_numbers<[2], [1], [1], [2], [0, 0, 0, 1, 1, 2], [0], [0]>} : vector<2x16x16xf32>, vector<2x16x32xf32>, vector<2x16x32xf32> -> vector<2x16x32xf32>
    "tpu.trace_stop"() : () -> ()
    %68 = vector.shape_cast %67 : vector<2x16x32xf32> to vector<32x32xf32>
    %c0_18 = arith.constant 0 : index
    %c32 = arith.constant 32 : index
    %69 = vector.load %arg10[%c0_18, %c32] : memref<32x256xf32, #tpu.memory_space<vmem>>, vector<32x32xf32>
    tpu.vector_store %arg10[%c0_18, %c32], %68 {strides = array<i32>} : memref<32x256xf32, #tpu.memory_space<vmem>>, vector<32x32xf32>,
    %70 = vector.extract_strided_slice %9 {offsets = [0, 0, 2], sizes = [2, 16, 1], strides = [1, 1, 1]} : vector<2x16x8xf32> to vector<2x16x1xf32>
    %71 = vector.shape_cast %70 : vector<2x16x1xf32> to vector<2x16xf32>
    %72 = vector.shape_cast %71 : vector<2x16xf32> to vector<2x16x1xf32>
    %73 = vector.extract_strided_slice %11 {offsets = [0, 0, 2], sizes = [2, 16, 1], strides = [1, 1, 1]} : vector<2x16x8xf32> to vector<2x16x1xf32>
    %74 = vector.shape_cast %73 : vector<2x16x1xf32> to vector<2x16xf32>
    %75 = vector.shape_cast %74 : vector<2x16xf32> to vector<2x1x16xf32>
    %76 = vector.broadcast %72 : vector<2x16x1xf32> to vector<2x16x16xf32>
    %77 = vector.broadcast %75 : vector<2x1x16xf32> to vector<2x16x16xf32>
    %78 = arith.addf %76, %77 : vector<2x16x16xf32>
    %cst_19 = arith.constant 0.000000e+00 : f32
    %79 = vector.broadcast %cst_19 : f32 to vector<2x16x16xf32>
    %80 = arith.cmpf ogt, %78, %79 : vector<2x16x16xf32>
    %cst_20 = arith.constant 2.000000e-01 : f32
    %81 = vector.broadcast %cst_20 : f32 to vector<2x16x16xf32>
    %82 = arith.mulf %81, %78 : vector<2x16x16xf32>
    %83 = arith.select %80, %78, %82 : vector<2x16x16xi1>, vector<2x16x16xf32>
    %84 = vector.broadcast %1 : vector<1x16x16xf32> to vector<2x16x16xf32>
    %85 = arith.mulf %84, %83 : vector<2x16x16xf32>
    %cst_21 = arith.constant dense<0xFF800000> : vector<2x16xf32>
    %86 = vector.multi_reduction <maximumf>, %85, %cst_21 [2] : vector<2x16x16xf32> to vector<2x16xf32>
    %87 = vector.shape_cast %86 : vector<2x16xf32> to vector<2x16x1xf32>
    %88 = vector.broadcast %87 : vector<2x16x1xf32> to vector<2x16x16xf32>
    %89 = arith.subf %85, %88 : vector<2x16x16xf32>
    %90 = math.exp %89 : vector<2x16x16xf32>
    %cst_22 = arith.constant dense<0.000000e+00> : vector<2x16xf32>
    %91 = vector.multi_reduction <add>, %90, %cst_22 [2] : vector<2x16x16xf32> to vector<2x16xf32>
    %92 = vector.shape_cast %91 : vector<2x16xf32> to vector<2x16x1xf32>
    %93 = vector.broadcast %92 : vector<2x16x1xf32> to vector<2x16x16xf32>
    %94 = arith.divf %90, %93 : vector<2x16x16xf32>
    %95 = vector.extract_strided_slice %7 {offsets = [0, 0, 64], sizes = [2, 16, 32], strides = [1, 1, 1]} : vector<2x16x256xf32> to vector<2x16x32xf32>
    "tpu.trace_start"() <{level = 10 : i32, message = "bij,bjd->bid"}> : () -> ()
    %cst_23 = arith.constant dense<0.000000e+00> : vector<2x16x32xf32>
    %96 = tpu.matmul %94, %95, %cst_23 {dimension_numbers = #tpu.dot_dimension_numbers<[2], [1], [1], [2], [0, 0, 0, 1, 1, 2], [0], [0]>} : vector<2x16x16xf32>, vector<2x16x32xf32>, vector<2x16x32xf32> -> vector<2x16x32xf32>
    "tpu.trace_stop"() : () -> ()
    %97 = vector.shape_cast %96 : vector<2x16x32xf32> to vector<32x32xf32>
    %c0_24 = arith.constant 0 : index
    %c64 = arith.constant 64 : index
    %98 = vector.load %arg10[%c0_24, %c64] : memref<32x256xf32, #tpu.memory_space<vmem>>, vector<32x32xf32>
    tpu.vector_store %arg10[%c0_24, %c64], %97 {strides = array<i32>} : memref<32x256xf32, #tpu.memory_space<vmem>>, vector<32x32xf32>,
    %99 = vector.extract_strided_slice %9 {offsets = [0, 0, 3], sizes = [2, 16, 1], strides = [1, 1, 1]} : vector<2x16x8xf32> to vector<2x16x1xf32>
    %100 = vector.shape_cast %99 : vector<2x16x1xf32> to vector<2x16xf32>
    %101 = vector.shape_cast %100 : vector<2x16xf32> to vector<2x16x1xf32>
    %102 = vector.extract_strided_slice %11 {offsets = [0, 0, 3], sizes = [2, 16, 1], strides = [1, 1, 1]} : vector<2x16x8xf32> to vector<2x16x1xf32>
    %103 = vector.shape_cast %102 : vector<2x16x1xf32> to vector<2x16xf32>
    %104 = vector.shape_cast %103 : vector<2x16xf32> to vector<2x1x16xf32>
    %105 = vector.broadcast %101 : vector<2x16x1xf32> to vector<2x16x16xf32>
    %106 = vector.broadcast %104 : vector<2x1x16xf32> to vector<2x16x16xf32>
    %107 = arith.addf %105, %106 : vector<2x16x16xf32>
    %cst_25 = arith.constant 0.000000e+00 : f32
    %108 = vector.broadcast %cst_25 : f32 to vector<2x16x16xf32>
    %109 = arith.cmpf ogt, %107, %108 : vector<2x16x16xf32>
    %cst_26 = arith.constant 2.000000e-01 : f32
    %110 = vector.broadcast %cst_26 : f32 to vector<2x16x16xf32>
    %111 = arith.mulf %110, %107 : vector<2x16x16xf32>
    %112 = arith.select %109, %107, %111 : vector<2x16x16xi1>, vector<2x16x16xf32>
    %113 = vector.broadcast %1 : vector<1x16x16xf32> to vector<2x16x16xf32>
    %114 = arith.mulf %113, %112 : vector<2x16x16xf32>
    %cst_27 = arith.constant dense<0xFF800000> : vector<2x16xf32>
    %115 = vector.multi_reduction <maximumf>, %114, %cst_27 [2] : vector<2x16x16xf32> to vector<2x16xf32>
    %116 = vector.shape_cast %115 : vector<2x16xf32> to vector<2x16x1xf32>
    %117 = vector.broadcast %116 : vector<2x16x1xf32> to vector<2x16x16xf32>
    %118 = arith.subf %114, %117 : vector<2x16x16xf32>
    %119 = math.exp %118 : vector<2x16x16xf32>
    %cst_28 = arith.constant dense<0.000000e+00> : vector<2x16xf32>
    %120 = vector.multi_reduction <add>, %119, %cst_28 [2] : vector<2x16x16xf32> to vector<2x16xf32>
    %121 = vector.shape_cast %120 : vector<2x16xf32> to vector<2x16x1xf32>
    %122 = vector.broadcast %121 : vector<2x16x1xf32> to vector<2x16x16xf32>
    %123 = arith.divf %119, %122 : vector<2x16x16xf32>
    %124 = vector.extract_strided_slice %7 {offsets = [0, 0, 96], sizes = [2, 16, 32], strides = [1, 1, 1]} : vector<2x16x256xf32> to vector<2x16x32xf32>
    "tpu.trace_start"() <{level = 10 : i32, message = "bij,bjd->bid"}> : () -> ()
    %cst_29 = arith.constant dense<0.000000e+00> : vector<2x16x32xf32>
    %125 = tpu.matmul %123, %124, %cst_29 {dimension_numbers = #tpu.dot_dimension_numbers<[2], [1], [1], [2], [0, 0, 0, 1, 1, 2], [0], [0]>} : vector<2x16x16xf32>, vector<2x16x32xf32>, vector<2x16x32xf32> -> vector<2x16x32xf32>
    "tpu.trace_stop"() : () -> ()
    %126 = vector.shape_cast %125 : vector<2x16x32xf32> to vector<32x32xf32>
    %c0_30 = arith.constant 0 : index
    %c96 = arith.constant 96 : index
    %127 = vector.load %arg10[%c0_30, %c96] : memref<32x256xf32, #tpu.memory_space<vmem>>, vector<32x32xf32>
    tpu.vector_store %arg10[%c0_30, %c96], %126 {strides = array<i32>} : memref<32x256xf32, #tpu.memory_space<vmem>>, vector<32x32xf32>,
    %128 = vector.extract_strided_slice %9 {offsets = [0, 0, 4], sizes = [2, 16, 1], strides = [1, 1, 1]} : vector<2x16x8xf32> to vector<2x16x1xf32>
    %129 = vector.shape_cast %128 : vector<2x16x1xf32> to vector<2x16xf32>
    %130 = vector.shape_cast %129 : vector<2x16xf32> to vector<2x16x1xf32>
    %131 = vector.extract_strided_slice %11 {offsets = [0, 0, 4], sizes = [2, 16, 1], strides = [1, 1, 1]} : vector<2x16x8xf32> to vector<2x16x1xf32>
    %132 = vector.shape_cast %131 : vector<2x16x1xf32> to vector<2x16xf32>
    %133 = vector.shape_cast %132 : vector<2x16xf32> to vector<2x1x16xf32>
    %134 = vector.broadcast %130 : vector<2x16x1xf32> to vector<2x16x16xf32>
    %135 = vector.broadcast %133 : vector<2x1x16xf32> to vector<2x16x16xf32>
    %136 = arith.addf %134, %135 : vector<2x16x16xf32>
    %cst_31 = arith.constant 0.000000e+00 : f32
    %137 = vector.broadcast %cst_31 : f32 to vector<2x16x16xf32>
    %138 = arith.cmpf ogt, %136, %137 : vector<2x16x16xf32>
    %cst_32 = arith.constant 2.000000e-01 : f32
    %139 = vector.broadcast %cst_32 : f32 to vector<2x16x16xf32>
    %140 = arith.mulf %139, %136 : vector<2x16x16xf32>
    %141 = arith.select %138, %136, %140 : vector<2x16x16xi1>, vector<2x16x16xf32>
    %142 = vector.broadcast %1 : vector<1x16x16xf32> to vector<2x16x16xf32>
    %143 = arith.mulf %142, %141 : vector<2x16x16xf32>
    %cst_33 = arith.constant dense<0xFF800000> : vector<2x16xf32>
    %144 = vector.multi_reduction <maximumf>, %143, %cst_33 [2] : vector<2x16x16xf32> to vector<2x16xf32>
    %145 = vector.shape_cast %144 : vector<2x16xf32> to vector<2x16x1xf32>
    %146 = vector.broadcast %145 : vector<2x16x1xf32> to vector<2x16x16xf32>
    %147 = arith.subf %143, %146 : vector<2x16x16xf32>
    %148 = math.exp %147 : vector<2x16x16xf32>
    %cst_34 = arith.constant dense<0.000000e+00> : vector<2x16xf32>
    %149 = vector.multi_reduction <add>, %148, %cst_34 [2] : vector<2x16x16xf32> to vector<2x16xf32>
    %150 = vector.shape_cast %149 : vector<2x16xf32> to vector<2x16x1xf32>
    %151 = vector.broadcast %150 : vector<2x16x1xf32> to vector<2x16x16xf32>
    %152 = arith.divf %148, %151 : vector<2x16x16xf32>
    %153 = vector.extract_strided_slice %7 {offsets = [0, 0, 128], sizes = [2, 16, 32], strides = [1, 1, 1]} : vector<2x16x256xf32> to vector<2x16x32xf32>
    "tpu.trace_start"() <{level = 10 : i32, message = "bij,bjd->bid"}> : () -> ()
    %cst_35 = arith.constant dense<0.000000e+00> : vector<2x16x32xf32>
    %154 = tpu.matmul %152, %153, %cst_35 {dimension_numbers = #tpu.dot_dimension_numbers<[2], [1], [1], [2], [0, 0, 0, 1, 1, 2], [0], [0]>} : vector<2x16x16xf32>, vector<2x16x32xf32>, vector<2x16x32xf32> -> vector<2x16x32xf32>
    "tpu.trace_stop"() : () -> ()
    %155 = vector.shape_cast %154 : vector<2x16x32xf32> to vector<32x32xf32>
    %c0_36 = arith.constant 0 : index
    %c128 = arith.constant 128 : index
    %156 = vector.load %arg10[%c0_36, %c128] : memref<32x256xf32, #tpu.memory_space<vmem>>, vector<32x32xf32>
    tpu.vector_store %arg10[%c0_36, %c128], %155 {strides = array<i32>} : memref<32x256xf32, #tpu.memory_space<vmem>>, vector<32x32xf32>,
    %157 = vector.extract_strided_slice %9 {offsets = [0, 0, 5], sizes = [2, 16, 1], strides = [1, 1, 1]} : vector<2x16x8xf32> to vector<2x16x1xf32>
    %158 = vector.shape_cast %157 : vector<2x16x1xf32> to vector<2x16xf32>
    %159 = vector.shape_cast %158 : vector<2x16xf32> to vector<2x16x1xf32>
    %160 = vector.extract_strided_slice %11 {offsets = [0, 0, 5], sizes = [2, 16, 1], strides = [1, 1, 1]} : vector<2x16x8xf32> to vector<2x16x1xf32>
    %161 = vector.shape_cast %160 : vector<2x16x1xf32> to vector<2x16xf32>
    %162 = vector.shape_cast %161 : vector<2x16xf32> to vector<2x1x16xf32>
    %163 = vector.broadcast %159 : vector<2x16x1xf32> to vector<2x16x16xf32>
    %164 = vector.broadcast %162 : vector<2x1x16xf32> to vector<2x16x16xf32>
    %165 = arith.addf %163, %164 : vector<2x16x16xf32>
    %cst_37 = arith.constant 0.000000e+00 : f32
    %166 = vector.broadcast %cst_37 : f32 to vector<2x16x16xf32>
    %167 = arith.cmpf ogt, %165, %166 : vector<2x16x16xf32>
    %cst_38 = arith.constant 2.000000e-01 : f32
    %168 = vector.broadcast %cst_38 : f32 to vector<2x16x16xf32>
    %169 = arith.mulf %168, %165 : vector<2x16x16xf32>
    %170 = arith.select %167, %165, %169 : vector<2x16x16xi1>, vector<2x16x16xf32>
    %171 = vector.broadcast %1 : vector<1x16x16xf32> to vector<2x16x16xf32>
    %172 = arith.mulf %171, %170 : vector<2x16x16xf32>
    %cst_39 = arith.constant dense<0xFF800000> : vector<2x16xf32>
    %173 = vector.multi_reduction <maximumf>, %172, %cst_39 [2] : vector<2x16x16xf32> to vector<2x16xf32>
    %174 = vector.shape_cast %173 : vector<2x16xf32> to vector<2x16x1xf32>
    %175 = vector.broadcast %174 : vector<2x16x1xf32> to vector<2x16x16xf32>
    %176 = arith.subf %172, %175 : vector<2x16x16xf32>
    %177 = math.exp %176 : vector<2x16x16xf32>
    %cst_40 = arith.constant dense<0.000000e+00> : vector<2x16xf32>
    %178 = vector.multi_reduction <add>, %177, %cst_40 [2] : vector<2x16x16xf32> to vector<2x16xf32>
    %179 = vector.shape_cast %178 : vector<2x16xf32> to vector<2x16x1xf32>
    %180 = vector.broadcast %179 : vector<2x16x1xf32> to vector<2x16x16xf32>
    %181 = arith.divf %177, %180 : vector<2x16x16xf32>
    %182 = vector.extract_strided_slice %7 {offsets = [0, 0, 160], sizes = [2, 16, 32], strides = [1, 1, 1]} : vector<2x16x256xf32> to vector<2x16x32xf32>
    "tpu.trace_start"() <{level = 10 : i32, message = "bij,bjd->bid"}> : () -> ()
    %cst_41 = arith.constant dense<0.000000e+00> : vector<2x16x32xf32>
    %183 = tpu.matmul %181, %182, %cst_41 {dimension_numbers = #tpu.dot_dimension_numbers<[2], [1], [1], [2], [0, 0, 0, 1, 1, 2], [0], [0]>} : vector<2x16x16xf32>, vector<2x16x32xf32>, vector<2x16x32xf32> -> vector<2x16x32xf32>
    "tpu.trace_stop"() : () -> ()
    %184 = vector.shape_cast %183 : vector<2x16x32xf32> to vector<32x32xf32>
    %c0_42 = arith.constant 0 : index
    %c160 = arith.constant 160 : index
    %185 = vector.load %arg10[%c0_42, %c160] : memref<32x256xf32, #tpu.memory_space<vmem>>, vector<32x32xf32>
    tpu.vector_store %arg10[%c0_42, %c160], %184 {strides = array<i32>} : memref<32x256xf32, #tpu.memory_space<vmem>>, vector<32x32xf32>,
    %186 = vector.extract_strided_slice %9 {offsets = [0, 0, 6], sizes = [2, 16, 1], strides = [1, 1, 1]} : vector<2x16x8xf32> to vector<2x16x1xf32>
    %187 = vector.shape_cast %186 : vector<2x16x1xf32> to vector<2x16xf32>
    %188 = vector.shape_cast %187 : vector<2x16xf32> to vector<2x16x1xf32>
    %189 = vector.extract_strided_slice %11 {offsets = [0, 0, 6], sizes = [2, 16, 1], strides = [1, 1, 1]} : vector<2x16x8xf32> to vector<2x16x1xf32>
    %190 = vector.shape_cast %189 : vector<2x16x1xf32> to vector<2x16xf32>
    %191 = vector.shape_cast %190 : vector<2x16xf32> to vector<2x1x16xf32>
    %192 = vector.broadcast %188 : vector<2x16x1xf32> to vector<2x16x16xf32>
    %193 = vector.broadcast %191 : vector<2x1x16xf32> to vector<2x16x16xf32>
    %194 = arith.addf %192, %193 : vector<2x16x16xf32>
    %cst_43 = arith.constant 0.000000e+00 : f32
    %195 = vector.broadcast %cst_43 : f32 to vector<2x16x16xf32>
    %196 = arith.cmpf ogt, %194, %195 : vector<2x16x16xf32>
    %cst_44 = arith.constant 2.000000e-01 : f32
    %197 = vector.broadcast %cst_44 : f32 to vector<2x16x16xf32>
    %198 = arith.mulf %197, %194 : vector<2x16x16xf32>
    %199 = arith.select %196, %194, %198 : vector<2x16x16xi1>, vector<2x16x16xf32>
    %200 = vector.broadcast %1 : vector<1x16x16xf32> to vector<2x16x16xf32>
    %201 = arith.mulf %200, %199 : vector<2x16x16xf32>
    %cst_45 = arith.constant dense<0xFF800000> : vector<2x16xf32>
    %202 = vector.multi_reduction <maximumf>, %201, %cst_45 [2] : vector<2x16x16xf32> to vector<2x16xf32>
    %203 = vector.shape_cast %202 : vector<2x16xf32> to vector<2x16x1xf32>
    %204 = vector.broadcast %203 : vector<2x16x1xf32> to vector<2x16x16xf32>
    %205 = arith.subf %201, %204 : vector<2x16x16xf32>
    %206 = math.exp %205 : vector<2x16x16xf32>
    %cst_46 = arith.constant dense<0.000000e+00> : vector<2x16xf32>
    %207 = vector.multi_reduction <add>, %206, %cst_46 [2] : vector<2x16x16xf32> to vector<2x16xf32>
    %208 = vector.shape_cast %207 : vector<2x16xf32> to vector<2x16x1xf32>
    %209 = vector.broadcast %208 : vector<2x16x1xf32> to vector<2x16x16xf32>
    %210 = arith.divf %206, %209 : vector<2x16x16xf32>
    %211 = vector.extract_strided_slice %7 {offsets = [0, 0, 192], sizes = [2, 16, 32], strides = [1, 1, 1]} : vector<2x16x256xf32> to vector<2x16x32xf32>
    "tpu.trace_start"() <{level = 10 : i32, message = "bij,bjd->bid"}> : () -> ()
    %cst_47 = arith.constant dense<0.000000e+00> : vector<2x16x32xf32>
    %212 = tpu.matmul %210, %211, %cst_47 {dimension_numbers = #tpu.dot_dimension_numbers<[2], [1], [1], [2], [0, 0, 0, 1, 1, 2], [0], [0]>} : vector<2x16x16xf32>, vector<2x16x32xf32>, vector<2x16x32xf32> -> vector<2x16x32xf32>
    "tpu.trace_stop"() : () -> ()
    %213 = vector.shape_cast %212 : vector<2x16x32xf32> to vector<32x32xf32>
    %c0_48 = arith.constant 0 : index
    %c192 = arith.constant 192 : index
    %214 = vector.load %arg10[%c0_48, %c192] : memref<32x256xf32, #tpu.memory_space<vmem>>, vector<32x32xf32>
    tpu.vector_store %arg10[%c0_48, %c192], %213 {strides = array<i32>} : memref<32x256xf32, #tpu.memory_space<vmem>>, vector<32x32xf32>,
    %215 = vector.extract_strided_slice %9 {offsets = [0, 0, 7], sizes = [2, 16, 1], strides = [1, 1, 1]} : vector<2x16x8xf32> to vector<2x16x1xf32>
    %216 = vector.shape_cast %215 : vector<2x16x1xf32> to vector<2x16xf32>
    %217 = vector.shape_cast %216 : vector<2x16xf32> to vector<2x16x1xf32>
    %218 = vector.extract_strided_slice %11 {offsets = [0, 0, 7], sizes = [2, 16, 1], strides = [1, 1, 1]} : vector<2x16x8xf32> to vector<2x16x1xf32>
    %219 = vector.shape_cast %218 : vector<2x16x1xf32> to vector<2x16xf32>
    %220 = vector.shape_cast %219 : vector<2x16xf32> to vector<2x1x16xf32>
    %221 = vector.broadcast %217 : vector<2x16x1xf32> to vector<2x16x16xf32>
    %222 = vector.broadcast %220 : vector<2x1x16xf32> to vector<2x16x16xf32>
    %223 = arith.addf %221, %222 : vector<2x16x16xf32>
    %cst_49 = arith.constant 0.000000e+00 : f32
    %224 = vector.broadcast %cst_49 : f32 to vector<2x16x16xf32>
    %225 = arith.cmpf ogt, %223, %224 : vector<2x16x16xf32>
    %cst_50 = arith.constant 2.000000e-01 : f32
    %226 = vector.broadcast %cst_50 : f32 to vector<2x16x16xf32>
    %227 = arith.mulf %226, %223 : vector<2x16x16xf32>
    %228 = arith.select %225, %223, %227 : vector<2x16x16xi1>, vector<2x16x16xf32>
    %229 = vector.broadcast %1 : vector<1x16x16xf32> to vector<2x16x16xf32>
    %230 = arith.mulf %229, %228 : vector<2x16x16xf32>
    %cst_51 = arith.constant dense<0xFF800000> : vector<2x16xf32>
    %231 = vector.multi_reduction <maximumf>, %230, %cst_51 [2] : vector<2x16x16xf32> to vector<2x16xf32>
    %232 = vector.shape_cast %231 : vector<2x16xf32> to vector<2x16x1xf32>
    %233 = vector.broadcast %232 : vector<2x16x1xf32> to vector<2x16x16xf32>
    %234 = arith.subf %230, %233 : vector<2x16x16xf32>
    %235 = math.exp %234 : vector<2x16x16xf32>
    %cst_52 = arith.constant dense<0.000000e+00> : vector<2x16xf32>
    %236 = vector.multi_reduction <add>, %235, %cst_52 [2] : vector<2x16x16xf32> to vector<2x16xf32>
    %237 = vector.shape_cast %236 : vector<2x16xf32> to vector<2x16x1xf32>
    %238 = vector.broadcast %237 : vector<2x16x1xf32> to vector<2x16x16xf32>
    %239 = arith.divf %235, %238 : vector<2x16x16xf32>
    %240 = vector.extract_strided_slice %7 {offsets = [0, 0, 224], sizes = [2, 16, 32], strides = [1, 1, 1]} : vector<2x16x256xf32> to vector<2x16x32xf32>
    "tpu.trace_start"() <{level = 10 : i32, message = "bij,bjd->bid"}> : () -> ()
    %cst_53 = arith.constant dense<0.000000e+00> : vector<2x16x32xf32>
    %241 = tpu.matmul %239, %240, %cst_53 {dimension_numbers = #tpu.dot_dimension_numbers<[2], [1], [1], [2], [0, 0, 0, 1, 1, 2], [0], [0]>} : vector<2x16x16xf32>, vector<2x16x32xf32>, vector<2x16x32xf32> -> vector<2x16x32xf32>
    "tpu.trace_stop"() : () -> ()
    %242 = vector.shape_cast %241 : vector<2x16x32xf32> to vector<32x32xf32>
    %c0_54 = arith.constant 0 : index
    %c224 = arith.constant 224 : index
    %243 = vector.load %arg10[%c0_54, %c224] : memref<32x256xf32, #tpu.memory_space<vmem>>, vector<32x32xf32>
    tpu.vector_store %arg10[%c0_54, %c224], %242 {strides = array<i32>} : memref<32x256xf32, #tpu.memory_space<vmem>>, vector<32x32xf32>,
    %c0_55 = arith.constant 0 : index
    %c0_56 = arith.constant 0 : index
    %244 = vector.load %arg10[%c0_55, %c0_56] : memref<32x256xf32, #tpu.memory_space<vmem>>, vector<32x256xf32>
    %c0_57 = arith.constant 0 : index
    %c0_58 = arith.constant 0 : index
    %245 = vector.load %arg4[%c0_57, %c0_58] : memref<1x256xf32, #tpu.memory_space<vmem>>, vector<1x256xf32>
    %246 = vector.broadcast %245 : vector<1x256xf32> to vector<32x256xf32>
    %247 = arith.addf %244, %246 : vector<32x256xf32>
    %cst_59 = arith.constant 0.000000e+00 : f32
    %248 = vector.broadcast %cst_59 : f32 to vector<32x256xf32>
    %249 = arith.cmpf ogt, %247, %248 : vector<32x256xf32>
    %cst_60 = arith.constant 0.000000e+00 : f32
    %250 = vector.broadcast %cst_60 : f32 to vector<32x256xf32>
    %251 = arith.minimumf %247, %250 : vector<32x256xf32>
    %252 = math.exp %251 : vector<32x256xf32>
    %cst_61 = arith.constant 1.000000e+00 : f32
    %253 = vector.broadcast %cst_61 : f32 to vector<32x256xf32>
    %254 = arith.subf %252, %253 : vector<32x256xf32>
    %255 = arith.select %249, %247, %254 : vector<32x256xi1>, vector<32x256xf32>
    %cst_62 = arith.constant dense<0.000000e+00> : vector<32xf32>
    %256 = vector.multi_reduction <add>, %255, %cst_62 [1] : vector<32x256xf32> to vector<32xf32>
    %257 = vector.shape_cast %256 : vector<32xf32> to vector<32x1xf32>
    %cst_63 = arith.constant 2.560000e+02 : f32
    %258 = vector.broadcast %cst_63 : f32 to vector<32x1xf32>
    %259 = arith.divf %257, %258 : vector<32x1xf32>
    %260 = vector.broadcast %259 : vector<32x1xf32> to vector<32x256xf32>
    %261 = arith.subf %255, %260 : vector<32x256xf32>
    %262 = arith.mulf %261, %261 : vector<32x256xf32>
    %cst_64 = arith.constant dense<0.000000e+00> : vector<32xf32>
    %263 = vector.multi_reduction <add>, %262, %cst_64 [1] : vector<32x256xf32> to vector<32xf32>
    %264 = vector.shape_cast %263 : vector<32xf32> to vector<32x1xf32>
    %cst_65 = arith.constant 2.560000e+02 : f32
    %265 = vector.broadcast %cst_65 : f32 to vector<32x1xf32>
    %266 = arith.divf %264, %265 : vector<32x1xf32>
    %cst_66 = arith.constant 9.99999974E-6 : f32
    %267 = vector.broadcast %cst_66 : f32 to vector<32x1xf32>
    %268 = arith.addf %266, %267 : vector<32x1xf32>
    %269 = math.rsqrt %268 : vector<32x1xf32>
    %270 = vector.broadcast %269 : vector<32x1xf32> to vector<32x256xf32>
    %271 = arith.mulf %261, %270 : vector<32x256xf32>
    %c0_67 = arith.constant 0 : index
    %c0_68 = arith.constant 0 : index
    %272 = vector.load %arg5[%c0_67, %c0_68] : memref<1x256xf32, #tpu.memory_space<vmem>>, vector<1x256xf32>
    %273 = vector.broadcast %272 : vector<1x256xf32> to vector<32x256xf32>
    %274 = arith.mulf %271, %273 : vector<32x256xf32>
    %c0_69 = arith.constant 0 : index
    %c0_70 = arith.constant 0 : index
    %275 = vector.load %arg6[%c0_69, %c0_70] : memref<1x256xf32, #tpu.memory_space<vmem>>, vector<1x256xf32>
    %276 = vector.broadcast %275 : vector<1x256xf32> to vector<32x256xf32>
    %277 = arith.addf %274, %276 : vector<32x256xf32>
    %c0_71 = arith.constant 0 : index
    %c0_72 = arith.constant 0 : index
    %278 = vector.load %arg7[%c0_71, %c0_72] : memref<256x48xf32, #tpu.memory_space<vmem>>, vector<256x48xf32>
    %cst_73 = arith.constant dense<0.000000e+00> : vector<32x48xf32>
    %279 = tpu.matmul %277, %278, %cst_73 {dimension_numbers = #tpu.dot_dimension_numbers<[1], [0], [0], [1], [0, 0, 1, 1], [], []>} : vector<32x256xf32>, vector<256x48xf32>, vector<32x48xf32> -> vector<32x48xf32>
    %280 = vector.extract_strided_slice %279 {offsets = [0, 0], sizes = [32, 40], strides = [1, 1]} : vector<32x48xf32> to vector<32x40xf32>
    %281 = vector.shape_cast %280 : vector<32x40xf32> to vector<2x16x40xf32>
    %282 = vector.extract_strided_slice %279 {offsets = [0, 40], sizes = [32, 4], strides = [1, 1]} : vector<32x48xf32> to vector<32x4xf32>
    %283 = vector.shape_cast %282 : vector<32x4xf32> to vector<2x16x4xf32>
    %284 = vector.extract_strided_slice %279 {offsets = [0, 44], sizes = [32, 4], strides = [1, 1]} : vector<32x48xf32> to vector<32x4xf32>
    %285 = vector.shape_cast %284 : vector<32x4xf32> to vector<2x16x4xf32>
    %cst_74 = arith.constant 0.000000e+00 : f32
    %286 = vector.broadcast %cst_74 : f32 to vector<2x16x10xf32>
    %287 = vector.extract_strided_slice %283 {offsets = [0, 0, 0], sizes = [2, 16, 1], strides = [1, 1, 1]} : vector<2x16x4xf32> to vector<2x16x1xf32>
    %288 = vector.shape_cast %287 : vector<2x16x1xf32> to vector<2x16xf32>
    %289 = vector.shape_cast %288 : vector<2x16xf32> to vector<2x16x1xf32>
    %290 = vector.extract_strided_slice %285 {offsets = [0, 0, 0], sizes = [2, 16, 1], strides = [1, 1, 1]} : vector<2x16x4xf32> to vector<2x16x1xf32>
    %291 = vector.shape_cast %290 : vector<2x16x1xf32> to vector<2x16xf32>
    %292 = vector.shape_cast %291 : vector<2x16xf32> to vector<2x1x16xf32>
    %293 = vector.broadcast %289 : vector<2x16x1xf32> to vector<2x16x16xf32>
    %294 = vector.broadcast %292 : vector<2x1x16xf32> to vector<2x16x16xf32>
    %295 = arith.addf %293, %294 : vector<2x16x16xf32>
    %cst_75 = arith.constant 0.000000e+00 : f32
    %296 = vector.broadcast %cst_75 : f32 to vector<2x16x16xf32>
    %297 = arith.cmpf ogt, %295, %296 : vector<2x16x16xf32>
    %cst_76 = arith.constant 2.000000e-01 : f32
    %298 = vector.broadcast %cst_76 : f32 to vector<2x16x16xf32>
    %299 = arith.mulf %298, %295 : vector<2x16x16xf32>
    %300 = arith.select %297, %295, %299 : vector<2x16x16xi1>, vector<2x16x16xf32>
    %301 = vector.broadcast %1 : vector<1x16x16xf32> to vector<2x16x16xf32>
    %302 = arith.mulf %301, %300 : vector<2x16x16xf32>
    %cst_77 = arith.constant dense<0xFF800000> : vector<2x16xf32>
    %303 = vector.multi_reduction <maximumf>, %302, %cst_77 [2] : vector<2x16x16xf32> to vector<2x16xf32>
    %304 = vector.shape_cast %303 : vector<2x16xf32> to vector<2x16x1xf32>
    %305 = vector.broadcast %304 : vector<2x16x1xf32> to vector<2x16x16xf32>
    %306 = arith.subf %302, %305 : vector<2x16x16xf32>
    %307 = math.exp %306 : vector<2x16x16xf32>
    %cst_78 = arith.constant dense<0.000000e+00> : vector<2x16xf32>
    %308 = vector.multi_reduction <add>, %307, %cst_78 [2] : vector<2x16x16xf32> to vector<2x16xf32>
    %309 = vector.shape_cast %308 : vector<2x16xf32> to vector<2x16x1xf32>
    %310 = vector.broadcast %309 : vector<2x16x1xf32> to vector<2x16x16xf32>
    %311 = arith.divf %307, %310 : vector<2x16x16xf32>
    %312 = vector.extract_strided_slice %281 {offsets = [0, 0, 0], sizes = [2, 16, 10], strides = [1, 1, 1]} : vector<2x16x40xf32> to vector<2x16x10xf32>
    "tpu.trace_start"() <{level = 10 : i32, message = "bij,bjd->bid"}> : () -> ()
    %cst_79 = arith.constant dense<0.000000e+00> : vector<2x16x10xf32>
    %313 = tpu.matmul %311, %312, %cst_79 {dimension_numbers = #tpu.dot_dimension_numbers<[2], [1], [1], [2], [0, 0, 0, 1, 1, 2], [0], [0]>} : vector<2x16x16xf32>, vector<2x16x10xf32>, vector<2x16x10xf32> -> vector<2x16x10xf32>
    "tpu.trace_stop"() : () -> ()
    %314 = arith.addf %286, %313 : vector<2x16x10xf32>
    %315 = vector.extract_strided_slice %283 {offsets = [0, 0, 1], sizes = [2, 16, 1], strides = [1, 1, 1]} : vector<2x16x4xf32> to vector<2x16x1xf32>
    %316 = vector.shape_cast %315 : vector<2x16x1xf32> to vector<2x16xf32>
    %317 = vector.shape_cast %316 : vector<2x16xf32> to vector<2x16x1xf32>
    %318 = vector.extract_strided_slice %285 {offsets = [0, 0, 1], sizes = [2, 16, 1], strides = [1, 1, 1]} : vector<2x16x4xf32> to vector<2x16x1xf32>
    %319 = vector.shape_cast %318 : vector<2x16x1xf32> to vector<2x16xf32>
    %320 = vector.shape_cast %319 : vector<2x16xf32> to vector<2x1x16xf32>
    %321 = vector.broadcast %317 : vector<2x16x1xf32> to vector<2x16x16xf32>
    %322 = vector.broadcast %320 : vector<2x1x16xf32> to vector<2x16x16xf32>
    %323 = arith.addf %321, %322 : vector<2x16x16xf32>
    %cst_80 = arith.constant 0.000000e+00 : f32
    %324 = vector.broadcast %cst_80 : f32 to vector<2x16x16xf32>
    %325 = arith.cmpf ogt, %323, %324 : vector<2x16x16xf32>
    %cst_81 = arith.constant 2.000000e-01 : f32
    %326 = vector.broadcast %cst_81 : f32 to vector<2x16x16xf32>
    %327 = arith.mulf %326, %323 : vector<2x16x16xf32>
    %328 = arith.select %325, %323, %327 : vector<2x16x16xi1>, vector<2x16x16xf32>
    %329 = vector.broadcast %1 : vector<1x16x16xf32> to vector<2x16x16xf32>
    %330 = arith.mulf %329, %328 : vector<2x16x16xf32>
    %cst_82 = arith.constant dense<0xFF800000> : vector<2x16xf32>
    %331 = vector.multi_reduction <maximumf>, %330, %cst_82 [2] : vector<2x16x16xf32> to vector<2x16xf32>
    %332 = vector.shape_cast %331 : vector<2x16xf32> to vector<2x16x1xf32>
    %333 = vector.broadcast %332 : vector<2x16x1xf32> to vector<2x16x16xf32>
    %334 = arith.subf %330, %333 : vector<2x16x16xf32>
    %335 = math.exp %334 : vector<2x16x16xf32>
    %cst_83 = arith.constant dense<0.000000e+00> : vector<2x16xf32>
    %336 = vector.multi_reduction <add>, %335, %cst_83 [2] : vector<2x16x16xf32> to vector<2x16xf32>
    %337 = vector.shape_cast %336 : vector<2x16xf32> to vector<2x16x1xf32>
    %338 = vector.broadcast %337 : vector<2x16x1xf32> to vector<2x16x16xf32>
    %339 = arith.divf %335, %338 : vector<2x16x16xf32>
    %340 = vector.extract_strided_slice %281 {offsets = [0, 0, 10], sizes = [2, 16, 10], strides = [1, 1, 1]} : vector<2x16x40xf32> to vector<2x16x10xf32>
    "tpu.trace_start"() <{level = 10 : i32, message = "bij,bjd->bid"}> : () -> ()
    %cst_84 = arith.constant dense<0.000000e+00> : vector<2x16x10xf32>
    %341 = tpu.matmul %339, %340, %cst_84 {dimension_numbers = #tpu.dot_dimension_numbers<[2], [1], [1], [2], [0, 0, 0, 1, 1, 2], [0], [0]>} : vector<2x16x16xf32>, vector<2x16x10xf32>, vector<2x16x10xf32> -> vector<2x16x10xf32>
    "tpu.trace_stop"() : () -> ()
    %342 = arith.addf %314, %341 : vector<2x16x10xf32>
    %343 = vector.extract_strided_slice %283 {offsets = [0, 0, 2], sizes = [2, 16, 1], strides = [1, 1, 1]} : vector<2x16x4xf32> to vector<2x16x1xf32>
    %344 = vector.shape_cast %343 : vector<2x16x1xf32> to vector<2x16xf32>
    %345 = vector.shape_cast %344 : vector<2x16xf32> to vector<2x16x1xf32>
    %346 = vector.extract_strided_slice %285 {offsets = [0, 0, 2], sizes = [2, 16, 1], strides = [1, 1, 1]} : vector<2x16x4xf32> to vector<2x16x1xf32>
    %347 = vector.shape_cast %346 : vector<2x16x1xf32> to vector<2x16xf32>
    %348 = vector.shape_cast %347 : vector<2x16xf32> to vector<2x1x16xf32>
    %349 = vector.broadcast %345 : vector<2x16x1xf32> to vector<2x16x16xf32>
    %350 = vector.broadcast %348 : vector<2x1x16xf32> to vector<2x16x16xf32>
    %351 = arith.addf %349, %350 : vector<2x16x16xf32>
    %cst_85 = arith.constant 0.000000e+00 : f32
    %352 = vector.broadcast %cst_85 : f32 to vector<2x16x16xf32>
    %353 = arith.cmpf ogt, %351, %352 : vector<2x16x16xf32>
    %cst_86 = arith.constant 2.000000e-01 : f32
    %354 = vector.broadcast %cst_86 : f32 to vector<2x16x16xf32>
    %355 = arith.mulf %354, %351 : vector<2x16x16xf32>
    %356 = arith.select %353, %351, %355 : vector<2x16x16xi1>, vector<2x16x16xf32>
    %357 = vector.broadcast %1 : vector<1x16x16xf32> to vector<2x16x16xf32>
    %358 = arith.mulf %357, %356 : vector<2x16x16xf32>
    %cst_87 = arith.constant dense<0xFF800000> : vector<2x16xf32>
    %359 = vector.multi_reduction <maximumf>, %358, %cst_87 [2] : vector<2x16x16xf32> to vector<2x16xf32>
    %360 = vector.shape_cast %359 : vector<2x16xf32> to vector<2x16x1xf32>
    %361 = vector.broadcast %360 : vector<2x16x1xf32> to vector<2x16x16xf32>
    %362 = arith.subf %358, %361 : vector<2x16x16xf32>
    %363 = math.exp %362 : vector<2x16x16xf32>
    %cst_88 = arith.constant dense<0.000000e+00> : vector<2x16xf32>
    %364 = vector.multi_reduction <add>, %363, %cst_88 [2] : vector<2x16x16xf32> to vector<2x16xf32>
    %365 = vector.shape_cast %364 : vector<2x16xf32> to vector<2x16x1xf32>
    %366 = vector.broadcast %365 : vector<2x16x1xf32> to vector<2x16x16xf32>
    %367 = arith.divf %363, %366 : vector<2x16x16xf32>
    %368 = vector.extract_strided_slice %281 {offsets = [0, 0, 20], sizes = [2, 16, 10], strides = [1, 1, 1]} : vector<2x16x40xf32> to vector<2x16x10xf32>
    "tpu.trace_start"() <{level = 10 : i32, message = "bij,bjd->bid"}> : () -> ()
    %cst_89 = arith.constant dense<0.000000e+00> : vector<2x16x10xf32>
    %369 = tpu.matmul %367, %368, %cst_89 {dimension_numbers = #tpu.dot_dimension_numbers<[2], [1], [1], [2], [0, 0, 0, 1, 1, 2], [0], [0]>} : vector<2x16x16xf32>, vector<2x16x10xf32>, vector<2x16x10xf32> -> vector<2x16x10xf32>
    "tpu.trace_stop"() : () -> ()
    %370 = arith.addf %342, %369 : vector<2x16x10xf32>
    %371 = vector.extract_strided_slice %283 {offsets = [0, 0, 3], sizes = [2, 16, 1], strides = [1, 1, 1]} : vector<2x16x4xf32> to vector<2x16x1xf32>
    %372 = vector.shape_cast %371 : vector<2x16x1xf32> to vector<2x16xf32>
    %373 = vector.shape_cast %372 : vector<2x16xf32> to vector<2x16x1xf32>
    %374 = vector.extract_strided_slice %285 {offsets = [0, 0, 3], sizes = [2, 16, 1], strides = [1, 1, 1]} : vector<2x16x4xf32> to vector<2x16x1xf32>
    %375 = vector.shape_cast %374 : vector<2x16x1xf32> to vector<2x16xf32>
    %376 = vector.shape_cast %375 : vector<2x16xf32> to vector<2x1x16xf32>
    %377 = vector.broadcast %373 : vector<2x16x1xf32> to vector<2x16x16xf32>
    %378 = vector.broadcast %376 : vector<2x1x16xf32> to vector<2x16x16xf32>
    %379 = arith.addf %377, %378 : vector<2x16x16xf32>
    %cst_90 = arith.constant 0.000000e+00 : f32
    %380 = vector.broadcast %cst_90 : f32 to vector<2x16x16xf32>
    %381 = arith.cmpf ogt, %379, %380 : vector<2x16x16xf32>
    %cst_91 = arith.constant 2.000000e-01 : f32
    %382 = vector.broadcast %cst_91 : f32 to vector<2x16x16xf32>
    %383 = arith.mulf %382, %379 : vector<2x16x16xf32>
    %384 = arith.select %381, %379, %383 : vector<2x16x16xi1>, vector<2x16x16xf32>
    %385 = vector.broadcast %1 : vector<1x16x16xf32> to vector<2x16x16xf32>
    %386 = arith.mulf %385, %384 : vector<2x16x16xf32>
    %cst_92 = arith.constant dense<0xFF800000> : vector<2x16xf32>
    %387 = vector.multi_reduction <maximumf>, %386, %cst_92 [2] : vector<2x16x16xf32> to vector<2x16xf32>
    %388 = vector.shape_cast %387 : vector<2x16xf32> to vector<2x16x1xf32>
    %389 = vector.broadcast %388 : vector<2x16x1xf32> to vector<2x16x16xf32>
    %390 = arith.subf %386, %389 : vector<2x16x16xf32>
    %391 = math.exp %390 : vector<2x16x16xf32>
    %cst_93 = arith.constant dense<0.000000e+00> : vector<2x16xf32>
    %392 = vector.multi_reduction <add>, %391, %cst_93 [2] : vector<2x16x16xf32> to vector<2x16xf32>
    %393 = vector.shape_cast %392 : vector<2x16xf32> to vector<2x16x1xf32>
    %394 = vector.broadcast %393 : vector<2x16x1xf32> to vector<2x16x16xf32>
    %395 = arith.divf %391, %394 : vector<2x16x16xf32>
    %396 = vector.extract_strided_slice %281 {offsets = [0, 0, 30], sizes = [2, 16, 10], strides = [1, 1, 1]} : vector<2x16x40xf32> to vector<2x16x10xf32>
    "tpu.trace_start"() <{level = 10 : i32, message = "bij,bjd->bid"}> : () -> ()
    %cst_94 = arith.constant dense<0.000000e+00> : vector<2x16x10xf32>
    %397 = tpu.matmul %395, %396, %cst_94 {dimension_numbers = #tpu.dot_dimension_numbers<[2], [1], [1], [2], [0, 0, 0, 1, 1, 2], [0], [0]>} : vector<2x16x16xf32>, vector<2x16x10xf32>, vector<2x16x10xf32> -> vector<2x16x10xf32>
    "tpu.trace_stop"() : () -> ()
    %398 = arith.addf %370, %397 : vector<2x16x10xf32>
    %cst_95 = arith.constant 2.500000e-01 : f32
    %399 = vector.broadcast %cst_95 : f32 to vector<2x16x10xf32>
    %400 = arith.mulf %398, %399 : vector<2x16x10xf32>
    %c0_96 = arith.constant 0 : index
    %c0_97 = arith.constant 0 : index
    %401 = vector.load %arg8[%c0_96, %c0_97] : memref<1x10xf32, #tpu.memory_space<vmem>>, vector<1x10xf32>
    %402 = vector.shape_cast %401 : vector<1x10xf32> to vector<1x1x10xf32>
    %403 = vector.broadcast %402 : vector<1x1x10xf32> to vector<2x16x10xf32>
    %404 = arith.addf %400, %403 : vector<2x16x10xf32>
    %c0_98 = arith.constant 0 : index
    %c0_99 = arith.constant 0 : index
    %c0_100 = arith.constant 0 : index
    %405 = vector.load %arg9[%c0_98, %c0_99, %c0_100] : memref<2x16x10xf32, #tpu.memory_space<vmem>>, vector<2x16x10xf32>
    tpu.vector_store %arg9[%c0_98, %c0_99, %c0_100], %404 {strides = array<i32>} : memref<2x16x10xf32, #tpu.memory_space<vmem>>, vector<2x16x10xf32>,
    return
  }
  func.func @transform_0(%arg0: i32) -> (i32, i32, i32) {
    %c0_i32 = arith.constant 0 : i32
    %c0_i32_0 = arith.constant 0 : i32
    %c0_i32_1 = arith.constant 0 : i32
    return %arg0, %c0_i32, %c0_i32_0 : i32, i32, i32
  }
  func.func @transform_1(%arg0: i32) -> (i32, i32) {
    %c0_i32 = arith.constant 0 : i32
    %c0_i32_0 = arith.constant 0 : i32
    %c0_i32_1 = arith.constant 0 : i32
    return %c0_i32, %c0_i32_0 : i32, i32
  }
  func.func @transform_2(%arg0: i32) -> (i32, i32) {
    %c0_i32 = arith.constant 0 : i32
    %c0_i32_0 = arith.constant 0 : i32
    %c0_i32_1 = arith.constant 0 : i32
    return %c0_i32, %c0_i32_0 : i32, i32
  }
  func.func @transform_3(%arg0: i32) -> (i32, i32) {
    %c0_i32 = arith.constant 0 : i32
    %c0_i32_0 = arith.constant 0 : i32
    %c0_i32_1 = arith.constant 0 : i32
    return %c0_i32, %c0_i32_0 : i32, i32
  }
  func.func @transform_4(%arg0: i32) -> (i32, i32) {
    %c0_i32 = arith.constant 0 : i32
    %c0_i32_0 = arith.constant 0 : i32
    %c0_i32_1 = arith.constant 0 : i32
    return %c0_i32, %c0_i32_0 : i32, i32
  }
  func.func @transform_5(%arg0: i32) -> (i32, i32) {
    %c0_i32 = arith.constant 0 : i32
    %c0_i32_0 = arith.constant 0 : i32
    %c0_i32_1 = arith.constant 0 : i32
    return %c0_i32, %c0_i32_0 : i32, i32
  }
  func.func @transform_6(%arg0: i32) -> (i32, i32) {
    %c0_i32 = arith.constant 0 : i32
    %c0_i32_0 = arith.constant 0 : i32
    %c0_i32_1 = arith.constant 0 : i32
    return %c0_i32, %c0_i32_0 : i32, i32
  }
  func.func @transform_7(%arg0: i32) -> (i32, i32) {
    %c0_i32 = arith.constant 0 : i32
    %c0_i32_0 = arith.constant 0 : i32
    %c0_i32_1 = arith.constant 0 : i32
    return %c0_i32, %c0_i32_0 : i32, i32
  }
  func.func @transform_8(%arg0: i32) -> (i32, i32, i32) {
    %c0_i32 = arith.constant 0 : i32
    %c0_i32_0 = arith.constant 0 : i32
    %c0_i32_1 = arith.constant 0 : i32
    return %arg0, %c0_i32, %c0_i32_0 : i32, i32, i32
  }
}

</mosaic_0001>

<bundles_post_ra>
// kernel: multi_head_gat.1
= control target key start
LH: loop header
LB: loop body
LE: loop exit
PB: predicated region body
PF: predicated region fallthrough
CT: control target
= control target key end

     0   :  { %s4356_s27 = smov 0   ;;  %s6264_s0 = inlined_call_operand.vmem [shape: f32[4,16,32], index: 0, kind: input, shape index: {}]   ;;  %s6265_s1 = inlined_call_operand.vmem [shape: f32[16,16], index: 1, kind: input, shape index: {}]   ;;  %s6266_s2 = inlined_call_operand.vmem [shape: f32[32,272], index: 2, kind: input, shape index: {}]   ;;  %s6267_s3 = inlined_call_operand.vmem [shape: f32[1,256], index: 3, kind: input, shape index: {}]   ;;  %s6268_s4 = inlined_call_operand.vmem [shape: f32[1,256], index: 4, kind: input, shape index: {}]   ;;  %s6269_s5 = inlined_call_operand.vmem [shape: f32[1,256], index: 5, kind: input, shape index: {}]   ;;  %s6270_s6 = inlined_call_operand.vmem [shape: f32[256,48], index: 6, kind: input, shape index: {}]   ;;  %s6271_s7 = inlined_call_operand.vmem [shape: f32[1,10], index: 7, kind: input, shape index: {}]   ;;  %s6272_s8 = inlined_call_operand.vmem [shape: f32[4,16,10], index: 8, kind: output, shape index: {}]  }
   0x1 LB: > { %s3740_s28 = sadd.s32 4294967295, %s4278_s27   ;;  %p3744_p0 = scmp.ge.s32.totalorder %s4278_s27, 1  ;;  %s4278_s27 = sphi %s4356_s27, %s18_s27  }
   0x2   : > { %p264_p1 = scmp.lt.s32.totalorder %s4278_s27, 3 }
   0x4   : > { %p265_p2 = pnand %p3744_p0, %p264_p1 }
   0x6   : > { %268 = sbr.rel (%p265_p2) target bundleno = 2386 (0x952), region = 52 }
   0xb   : > { %v331_v0 = vld [vmem:[%s6266_s2 + $0x58] sm:$0xff]  ;;  %v328_v1 = vld [vmem:[%s6266_s2 + $0x40] sm:$0xff]  ;;  %s3745_s11 = sshll.u32 %s3740_s28, 1  ;;  %v329_v2 = vld [vmem:[%s6266_s2 + $0x48] sm:$0xff]  ;;  %v4280_v5 = vmov 1   ;;  %v4281_v7 = vmov 8   ;;  %v464_v40 = vlaneseq }
   0xc   : > { %415 = vmatpush.msra.mxu2 %v331_v0  ;;  %p301_p3 = scmp.lt.s32.totalorder %s3745_s11, 3  ;;  %v326_v3 = vld [vmem:[%s6266_s2 + $0x30] sm:$0xff]  ;;  %v325_v4 = vld [vmem:[%s6266_s2 + $0x28] sm:$0xff]  ;;  %357 = vmatpush.msra.mxu0 %v329_v2  ;;  %v323_v6 = vld [vmem:[%s6266_s2 + $0x18] sm:$0xff]  ;;  %v4282_v9 = vmov 0   ;;  %vm332_vm0 = vcmask 261120  }
   0xd   : > { %3864 = vset.pattern.permute.xlu1 %v4280_v5  ;;  %3863 = vset.pattern.permute.xlu2 %v4281_v7  ;;  %v322_v8 = vld [vmem:[%s6266_s2 + $0x10] sm:$0xff]  ;;  %v320_v10 = vld [vmem:[%s6266_s2] sm:$0xff]  ;;  %v4283_v20 = vmov 2   ;;  %v4284_v21 = vmov 9   ;;  %v4285_v22 = vmov 13   ;;  %v4286_v23 = vmov 10  }
   0xe   : > { %416 = vmatpush.msra.mxu2 %v328_v1  ;;  %s6320_s11 = smov (!%p301_p3, %s3745_s11), 3  ;;  %358 = vmatpush.msra.mxu0 %v326_v3  ;;  %v4287_v24 = vmov 5   ;;  %v4288_v25 = vmov 11   ;;  %v4289_v28 = vmov 12   ;;  %s4290_s29 = smov 96   ;;  %v4291_v30 = vmov 3  }
   0xf   : > { %3862 = vset.pattern.permute.xlu0 %v4282_v9  ;;  %s3821_s22 = sshll.u32 %s6320_s11, 4  ;;  %v4491_v43 = vand.u32 127, %v464_v40  ;;  %vm469_vm1 = vcmask 130112   ;;  %v4506_v54 = vld [vmem:[%s6265_s1] sm:$0xff]  ;;  %vm514_vm3 = vcmask 130048   ;;  %v4516_v61 = vld [vmem:[%s6265_s1 + $0x8] sm:$0xff] }
  0x10   : > { %417 = vmatpush.msra.mxu2 %v325_v4  ;;  %s4399_s28 = scalar_lea.vmem %s6264_s0, %s3821_s22  ;;  %359 = vmatpush.msra.mxu0 %v323_v6  ;;  %s4297_s26 = smov 32  }
  0x11   : > { %v316_v11 = vld [vmem:[%s4399_s28] sm:$0xff]  ;;  %v317_v12 = vld [vmem:[%s4399_s28 + $0x8] sm:$0xff]  ;;  %v318_v13 = vld [vmem:[%s4399_s28 + $0x10] sm:$0xff]  ;;  %6277 = vst [vmem:[#allocation3_spill] sm:$0xff] %v4491_v43  ;;  %v4496_v45 = vadd.s32 4294967288, %v4491_v43  ;;  %s4308_s21 = smov 118   ;;  %s312_s13 = scalar_lea.vmem %s6272_s8, %s3821_s22 }
  0x12   : > { %418 = vmatpush.msra.mxu2 %v322_v8  ;;  %360 = vmatpush.msra.mxu0 %v320_v10  ;;  %v319_v14 = vld [vmem:[%s4399_s28 + $0x18] sm:$0xff]  ;;  %s4310_s30 = smov 98  }
  0x13   : > { %3759 = vmatmul.msk.f32.vlgmr.msra.gmra.mxu2 %vm332_vm0, %v316_v11  ;;  %3751 = vmatmul.msk.f32.vlgmr.msra.gmra.mxu0 %vm332_vm0, %v316_v11  ;;  %6278 = vst [vmem:[#allocation4_spill] sm:$0xff] %v4496_v45 }
  0x1b   : > { %3760 = vmatmul.msk.f32.gmra.mxu2 %vm332_vm0, %v317_v12  ;;  %3752 = vmatmul.msk.f32.gmra.mxu0 %vm332_vm0, %v317_v12 }
  0x23   : > { %3761 = vmatmul.msk.f32.gmra.mxu2 %vm332_vm0, %v318_v13  ;;  %3753 = vmatmul.msk.f32.gmra.mxu0 %vm332_vm0, %v318_v13 }
  0x2b   : > { %3762 = vmatmul.msk.f32.gmra.mxu2 %vm332_vm0, %v319_v14  ;;  %3754 = vmatmul.msk.f32.gmra.mxu0 %vm332_vm0, %v319_v14 }
  0x90   : > { %v362_v15 = vpop.f32.mrf.mxu0 }
  0x96   : > { %v4413_v16 = vpop.f32.mrf.mxu2 }
  0x97   : > { %674 = vperm.xlu1 %3864, %v4413_v16   ;;  %453 = vperm.xlu2 %3863, %v4413_v16  }
  0x98   : > { %434 = vperm.xlu0 %3862, %v4413_v16   ;;  %v365_v17 = vpop.f32.mrf.mxu0 }
  0x99   : > { %631 = vmatpush.msra.mxu3 %v365_v17  ;;  %v4418_v18 = vpack.i.bf16 %v362_v15, %v365_v17  ;;  %v3872_v27 = vpack.i.bf16 %v365_v17, %v362_v15 }
  0x9b   : > { %632 = vmatpush.msra.mxu3 %v362_v15 }
  0x9e   : > { %v4420_v19 = vpop.f32.mrf.mxu2 }
  0x9f   : > { %3866 = vset.pattern.permute.xlu1 %v4283_v20  ;;  %3865 = vset.pattern.permute.xlu2 %v4284_v21 }
  0xa0   : > { %933 = vperm.xlu1 %3866, %v4413_v16   ;;  %690 = vperm.xlu2 %3865, %v4413_v16   ;;  %v4452_v29 = vpop.f32.mrf.mxu0 }
  0xa1   : > { %439 = vperm.xlu0 %3862, %v4420_v19  }
  0xa6   : > { %v4433_v26 = vpop.f32.mrf.mxu2 }
  0xa8   : > { %3869 = vset.pattern.permute.xlu1 %v4285_v22  ;;  %3867 = vset.pattern.permute.xlu2 %v4286_v23  ;;  %v4457_v31 = vpop.f32.mrf.mxu0 }
  0xa9   : > { %1685 = vperm.xlu1 %3869, %v4413_v16   ;;  %949 = vperm.xlu2 %3867, %v4413_v16   ;;  %v3891_v34 = vpack.i.bf16 %v4457_v31, %v4452_v29 }
  0xaa   : > { %3880 = vset.pattern.permute.xlu0 %v4283_v20  ;;  %660 = vmatpush.msrb.mxu3 %v4457_v31 }
  0xab   : > { %937 = vperm.xlu0 %3880, %v4420_v19  }
  0xac   : > { %661 = vmatpush.msrb.mxu3 %v4452_v29 }
  0xae   : > { %v4465_v32 = vpop.f32.mrf.mxu2 }
  0xb1   : > { %3870 = vset.pattern.permute.xlu1 %v4287_v24  ;;  %3868 = vset.pattern.permute.xlu2 %v4288_v25 }
  0xb2   : > { %1669 = vperm.xlu1 %3870, %v4413_v16   ;;  %1204 = vperm.xlu2 %3868, %v4413_v16  }
  0xb3   : > { %3886 = vset.pattern.permute.xlu0 %v4281_v7 }
  0xb4   : > { %459 = vperm.xlu0 %3886, %v4433_v26  }
  0xba   : > { %3871 = vset.pattern.permute.xlu2 %v4289_v28  ;;  %3873 = vrot.lane.b32.xlu1 %v3872_v27, %s4290_s29 }
  0xbb   : > { %1459 = vperm.xlu2 %3871, %v4413_v16   ;;  %3879 = vset.pattern.permute.xlu1 %v4284_v21 }
  0xbc   : > { %3887 = vset.pattern.permute.xlu0 %v4280_v5 }
  0xbd   : > { %682 = vperm.xlu0 %3887, %v4433_v26  }
  0xc2   : > { %693 = vperm.xlu1 %3879, %v4420_v19  }
  0xc3   : > { %3877 = vset.pattern.permute.xlu2 %v4281_v7 }
  0xc4   : > { %456 = vperm.xlu2 %3877, %v4420_v19  }
  0xc5   : > { %3890 = vset.pattern.permute.xlu0 %v4286_v23 }
  0xc6   : > { %955 = vperm.xlu0 %3890, %v4433_v26  }
  0xca   : > { %3881 = vset.pattern.permute.xlu1 %v4286_v23 }
  0xcb   : > { %952 = vperm.xlu1 %3881, %v4420_v19  }
  0xcc   : > { %3878 = vset.pattern.permute.xlu2 %v4280_v5 }
  0xcd   : > { %678 = vperm.xlu2 %3878, %v4420_v19  }
  0xce   : > { %3902 = vset.pattern.permute.xlu0 %v4288_v25 }
  0xd3   : > { %3882 = vset.pattern.permute.xlu1 %v4288_v25 }
  0xd4   : > { %1207 = vperm.xlu1 %3882, %v4420_v19  }
  0xd5   : > { %3883 = vset.pattern.permute.xlu2 %v4291_v30 }
  0xd6   : > { %1192 = vperm.xlu2 %3883, %v4420_v19  }
  0xdc   : > { %3885 = vset.pattern.permute.xlu1 %v4282_v9 }
  0xdd   : > { %444 = vperm.xlu1 %3885, %v4433_v26  }
  0xde   : > { %3884 = vset.pattern.permute.xlu2 %v4285_v22 }
  0xdf   : > { %1688 = vperm.xlu2 %3884, %v4420_v19  }
  0xe5   : > { %449 = vperm.xlu1 %3885, %v4465_v32  }
  0xe7   : > { %3888 = vset.pattern.permute.xlu2 %v4284_v21 }
  0xe8   : > { %696 = vperm.xlu2 %3888, %v4433_v26  }
  0xed   : > { %3896 = vset.pattern.permute.xlu1 %v4281_v7 }
  0xee   : > { %462 = vperm.xlu1 %3896, %v4465_v32  }
  0xf0   : > { %3889 = vset.pattern.permute.xlu2 %v4283_v20 }
  0xf1   : > { %v454_v33 = vpop.permute.xlu2 %453  ;;  %941 = vperm.xlu2 %3889, %v4433_v26  }
  0xf2   : > { %v466_v47 = vperm.slane %v454_v33, %v4491_v43 }
  0xf6   : > { %3897 = vset.pattern.permute.xlu1 %v4280_v5 }
  0xf7   : > { %686 = vperm.xlu1 %3897, %v4465_v32  }
  0xf9   : > { %3892 = vrot.lane.b32.xlu2 %v3891_v34, %s4290_s29 }
  0xfa   : > { %v691_v35 = vpop.permute.xlu2 %690  ;;  %3900 = vset.pattern.permute.xlu2 %v4286_v23 }
  0xfb   : > { %v701_v4 = vperm.slane %v691_v35, %v4491_v43 }
  0xff   : > { %3898 = vset.pattern.permute.xlu1 %v4284_v21 }
 0x100   : > { %699 = vperm.xlu1 %3898, %v4465_v32  }
 0x101   : > { %958 = vperm.xlu2 %3900, %v4465_v32  }
 0x103   : > { %v4482_v36 = vpop.permute.xlu2 %949 }
 0x104   : > { %v960_v17 = vperm.slane %v4482_v36, %v4491_v43 }
 0x108   : > { %3899 = vset.pattern.permute.xlu1 %v4283_v20 }
 0x109   : > { %v675_v37 = vpop.permute.xlu1 %674  ;;  %945 = vperm.xlu1 %3899, %v4465_v32   ;;  %3903 = vset.pattern.permute.xlu2 %v4288_v25 }
 0x10a   : > { %v435_v42 = vpop.permute.xlu0 %434 }
 0x10c   : > { %v4486_v38 = vpop.permute.xlu2 %1204 }
 0x111   : > { %3901 = vset.pattern.permute.xlu1 %v4289_v28 }
 0x112   : > { %v934_v39 = vpop.permute.xlu1 %933 }
 0x113   : > { %v440_v49 = vpop.permute.xlu0 %439 }
 0x115   : > { %v4489_v41 = vpop.permute.xlu2 %1459 }
 0x11b   : > { %v4493_v44 = vpop.permute.xlu1 %1685 }
 0x11d   : > { %v938_v25 = vpop.permute.xlu0 %937 }
 0x11e   : > { %v457_v46 = vpop.permute.xlu2 %456 }
 0x11f   : > { %v468_v48 = vperm.slane %v457_v46, %v4496_v45 }
 0x121   : > { %v470_v50 = vsel %vm469_vm1, %v468_v48, %v466_v47 }
 0x122   : > { %v494_v51 = vadd.f32 %v470_v50, %v435_v42  ;;  %v495_v52 = vadd.f32 %v470_v50, %v440_v49 }
 0x124   : > { %v4501_v53 = vpop.permute.xlu1 %1669  ;;  %vm498_vm2 = vcmp.gt.f32.partialorder %v494_v51, 0.0  ;;  %v502_v55 = vmul.f32 0.2, %v494_v51  ;;  %v503_v57 = vmul.f32 0.2, %v495_v52  ;;  %vm499_vm4 = vcmp.gt.f32.partialorder %v495_v52, 0.0 }
 0x126   : > { %v506_v56 = vsel %vm498_vm2, %v494_v51, %v502_v55  ;;  %v507_v62 = vsel %vm499_vm4, %v495_v52, %v503_v57  ;;  %v460_v50 = vpop.permute.xlu0 %459 }
 0x127   : > { %v679_v58 = vpop.permute.xlu2 %678  ;;  %v4509_v59 = vmul.f32 %v506_v56, %v4506_v54  ;;  %v4521_v0 = vmul.f32 %v507_v62, %v4516_v61 }
 0x129   : > { %v515_v60 = vsel %vm514_vm3, %v4509_v59, -inf  ;;  %v518_v2 = vsel %vm514_vm3, %v4521_v0, -inf }
 0x12a   : > { %516 = vmax.xlane.f32.xlu2 %v515_v60 }
 0x12c   : > { %v4518_v63 = vpop.permute.xlu1 %3873 }
 0x12f   : > { %v683_v56 = vpop.permute.xlu0 %682 }
 0x130   : > { %v4523_v1 = vpop.permute.xlu2 %1192 }
 0x133   : > { %519 = vmax.xlane.f32.xlu1 %v518_v2 }
 0x134   : > { %v694_v3 = vpop.permute.xlu1 %693 }
 0x135   : > { %v702_v5 = vperm.slane %v694_v3, %v4496_v45 }
 0x137   : > { %v703_v6 = vsel %vm469_vm1, %v702_v5, %v701_v4 }
 0x138   : > { %v721_v7 = vadd.f32 %v703_v6, %v675_v37  ;;  %v722_v8 = vadd.f32 %v703_v6, %v679_v58  ;;  %v956_v3 = vpop.permute.xlu0 %955 }
 0x139   : > { %v4530_v9 = vpop.permute.xlu2 %1688  ;;  %v963_v5 = vperm.slane %v956_v3, %v4491_v43 }
 0x13a   : > { %vm726_vm5 = vcmp.gt.f32.partialorder %v722_v8, 0.0  ;;  %v730_v10 = vmul.f32 0.2, %v722_v8  ;;  %vm725_vm6 = vcmp.gt.f32.partialorder %v721_v7, 0.0  ;;  %v729_v11 = vmul.f32 0.2, %v721_v7 }
 0x13c   : > { %v734_v12 = vsel %vm726_vm5, %v722_v8, %v730_v10  ;;  %v733_v15 = vsel %vm725_vm6, %v721_v7, %v729_v11  ;;  %v471_v7 = vperm.slane %v460_v50, %v4491_v43 }
 0x13d   : > { %v953_v13 = vpop.permute.xlu1 %952  ;;  %v4533_v14 = vmul.f32 %v734_v12, %v4516_v61  ;;  %v4539_v21 = vmul.f32 %v733_v15, %v4506_v54 }
 0x13e   : > { %v961_v20 = vperm.slane %v953_v13, %v4496_v45 }
 0x13f   : > { %v744_v23 = vsel %vm514_vm3, %v4533_v14, -inf  ;;  %v741_v33 = vsel %vm514_vm3, %v4539_v21, -inf }
 0x140   : > { %v962_v27 = vsel %vm469_vm1, %v961_v20, %v960_v17  ;;  %745 = vmax.xlane.f32.xlu0 %v744_v23  ;;  %742 = vmax.xlane.f32.xlu2 %v741_v33 }
 0x141   : > { %v980_v34 = vadd.f32 %v962_v27, %v934_v39  ;;  %v981_v35 = vadd.f32 %v962_v27, %v938_v25 }
 0x142   : > { %v697_v37 = vpop.permute.xlu2 %696 }
 0x143   : > { %vm984_vm7 = vcmp.gt.f32.partialorder %v980_v34, 0.0  ;;  %v988_v36 = vmul.f32 0.2, %v980_v34  ;;  %vm985_vm8 = vcmp.gt.f32.partialorder %v981_v35, 0.0  ;;  %v989_v40 = vmul.f32 0.2, %v981_v35 }
 0x145   : > { %v992_v42 = vsel %vm984_vm7, %v980_v34, %v988_v36  ;;  %v993_v48 = vsel %vm985_vm8, %v981_v35, %v989_v40 }
 0x146   : > { %v4546_v46 = vpop.permute.xlu1 %1207  ;;  %v4549_v47 = vmul.f32 %v992_v42, %v4506_v54  ;;  %v4552_v49 = vmul.f32 %v993_v48, %v4516_v61 }
 0x148   : > { %v1000_v39 = vsel %vm514_vm3, %v4549_v47, -inf  ;;  %v1003_v51 = vsel %vm514_vm3, %v4552_v49, -inf }
 0x149   : > { %1001 = vmax.xlane.f32.xlu1 %v1000_v39  ;;  %1004 = vmax.xlane.f32.xlu2 %v1003_v51  ;;  %v704_v39 = vperm.slane %v697_v37, %v4491_v43 }
 0x14b   : > { %v942_v52 = vpop.permute.xlu2 %941 }
 0x14f   : > { %v445_v55 = vpop.permute.xlu1 %444 }
 0x153   : > { %v3893_v57 = vpop.permute.xlu2 %3892 }
 0x154   : > { %v3895_v58 = vunpack.i.h.bf16 %v3893_v57  ;;  %v3894_v60 = vunpack.i.l.bf16 %v3893_v57 }
 0x156   : > { %902 = vmatpush.msrb.mxu0 %v3895_v58 }
 0x157   : > { %v450_v62 = vpop.permute.xlu1 %449 }
 0x158   : > { %903 = vmatpush.msrb.mxu0 %v3894_v60 }
 0x15b   : > { %v959_v2 = vpop.permute.xlu2 %958 }
 0x15c   : > { %v964_v4 = vperm.slane %v959_v2, %v4496_v45 }
 0x15e   : > { %v965_v8 = vsel %vm469_vm1, %v964_v4, %v963_v5 }
 0x15f   : > { %v982_v12 = vadd.f32 %v965_v8, %v942_v52 }
 0x160   : > { %v463_v6 = vpop.permute.xlu1 %462 }
 0x161   : > { %v472_v10 = vperm.slane %v463_v6, %v4496_v45  ;;  %v990_v27 = vmul.f32 0.2, %v982_v12  ;;  %vm986_vm11 = vcmp.gt.f32.partialorder %v982_v12, 0.0 }
 0x163   : > { %v473_v11 = vsel %vm469_vm1, %v472_v10, %v471_v7  ;;  %v994_v42 = vsel %vm986_vm11, %v982_v12, %v990_v27 }
 0x164   : > { %v496_v13 = vadd.f32 %v473_v11, %v445_v55  ;;  %v497_v15 = vadd.f32 %v473_v11, %v450_v62  ;;  %v4575_v48 = vmul.f32 %v994_v42, %v4506_v54 }
 0x166   : > { %vm500_vm9 = vcmp.gt.f32.partialorder %v496_v13, 0.0  ;;  %v504_v17 = vmul.f32 0.2, %v496_v13  ;;  %vm501_vm10 = vcmp.gt.f32.partialorder %v497_v15, 0.0  ;;  %v505_v20 = vmul.f32 0.2, %v497_v15 }
 0x167   : > { %v1006_v52 = vsel %vm514_vm3, %v4575_v48, -inf }
 0x168   : > { %v508_v23 = vsel %vm500_vm9, %v496_v13, %v504_v17  ;;  %v509_v25 = vsel %vm501_vm10, %v497_v15, %v505_v20  ;;  %v4293_v15 = vmov 15   ;;  %v4296_v17 = vmov 6  }
 0x169   : > { %v687_v33 = vpop.permute.xlu1 %686  ;;  %v4565_v34 = vmul.f32 %v508_v23, %v4506_v54  ;;  %v4568_v35 = vmul.f32 %v509_v25, %v4516_v61 }
 0x16b   : > { %v521_v36 = vsel %vm514_vm3, %v4565_v34, -inf  ;;  %v524_v40 = vsel %vm514_vm3, %v4568_v35, -inf }
 0x16c   : > { %522 = vmax.xlane.f32.xlu0 %v521_v36  ;;  %525 = vmax.xlane.f32.xlu2 %v524_v40 }
 0x172   : > { %v700_v50 = vpop.permute.xlu1 %699 }
 0x173   : > { %v705_v51 = vperm.slane %v700_v50, %v4496_v45 }
 0x174   : > { %1007 = vmax.xlane.f32.xlu0 %v1006_v52 }
 0x175   : > { %v706_v55 = vsel %vm469_vm1, %v705_v51, %v704_v39  ;;  %v1216_v39 = vperm.slane %v4546_v46, %v4496_v45 }
 0x176   : > { %v723_v57 = vadd.f32 %v706_v55, %v683_v56  ;;  %v724_v58 = vadd.f32 %v706_v55, %v687_v33 }
 0x178   : > { %vm727_vm12 = vcmp.gt.f32.partialorder %v723_v57, 0.0  ;;  %v731_v60 = vmul.f32 0.2, %v723_v57  ;;  %vm728_vm13 = vcmp.gt.f32.partialorder %v724_v58, 0.0  ;;  %v732_v62 = vmul.f32 0.2, %v724_v58 }
 0x17a   : > { %v735_v2 = vsel %vm727_vm12, %v723_v57, %v731_v60  ;;  %v736_v3 = vsel %vm728_vm13, %v724_v58, %v732_v62 }
 0x17b   : > { %v946_v4 = vpop.permute.xlu1 %945  ;;  %v4583_v5 = vmul.f32 %v735_v2, %v4506_v54  ;;  %v4586_v37 = vmul.f32 %v736_v3, %v4516_v61 }
 0x17c   : > { %v983_v6 = vadd.f32 %v965_v8, %v946_v4  ;;  %v4292_v8 = vmov 4  }
 0x17d   : > { %v747_v7 = vsel %vm514_vm3, %v4583_v5, -inf  ;;  %v750_v56 = vsel %vm514_vm3, %v4586_v37, -inf }
 0x17e   : > { %v991_v10 = vmul.f32 0.2, %v983_v6  ;;  %748 = vmax.xlane.f32.xlu1 %v747_v7  ;;  %751 = vmax.xlane.f32.xlu2 %v750_v56  ;;  %vm987_vm14 = vcmp.gt.f32.partialorder %v983_v6, 0.0 }
 0x180   : > { %v995_v11 = vsel %vm987_vm14, %v983_v6, %v991_v10 }
 0x181   : > { %v4593_v12 = vmul.f32 %v995_v11, %v4516_v61 }
 0x183   : > { %v1009_v13 = vsel %vm514_vm3, %v4593_v12, -inf }
 0x186   : > { %1010 = vmax.xlane.f32.xlu1 %v1009_v13 }
 0x188   : > { %1210 = vperm.xlu0 %3902, %v4433_v26  }
 0x190   : > { %3907 = vset.pattern.permute.xlu0 %v4289_v28 }
 0x191   : > { %1465 = vperm.xlu0 %3907, %v4433_v26  }
 0x196   : > { %1213 = vperm.xlu2 %3903, %v4465_v32  }
 0x199   : > { %3908 = vset.pattern.permute.xlu0 %v4291_v30 }
 0x19a   : > { %1188 = vperm.xlu0 %3908, %v4413_v16  }
 0x19d   : > { %v517_v27 = vpop.xlane.xlu2 %516 }
 0x19e   : > { %3905 = vset.pattern.permute.xlu2 %v4291_v30  ;;  %v4294_v30 = vmov 7   ;;  %v527_v50 = vsub.f32 %v4509_v59, %v517_v27 }
 0x19f   : > { %1196 = vperm.xlu2 %3905, %v4433_v26   ;;  %1462 = vperm.xlu1 %3901, %v4420_v19  }
 0x1a0   : > { %v531_v52 = vmul.f32 1.442695, %v527_v50 }
 0x1a2   : > { %1200 = vperm.xlu0 %3908, %v4465_v32   ;;  %4046 = vpow2.f32 %v531_v52 }
 0x1a6   : > { %v520_v23 = vpop.xlane.xlu1 %519 }
 0x1a7   : > { %3909 = vset.pattern.permute.xlu2 %v4289_v28  ;;  %3904 = vset.pattern.permute.xlu1 %v4292_v8  ;;  %v4295_v28 = vmov 14   ;;  %v528_v3 = vsub.f32 %v4521_v0, %v520_v23 }
 0x1a8   : > { %1468 = vperm.xlu2 %3909, %v4465_v32   ;;  %1443 = vperm.xlu1 %3904, %v4413_v16   ;;  %v4666_v56 = vpop.eup %4046 }
 0x1a9   : > { %v539_v0 = vsel %vm514_vm3, %v4666_v56, 0.0 }
 0x1aa   : > { %3917 = vset.pattern.permute.xlu0 %v4285_v22 }
 0x1ab   : > { %1691 = vperm.xlu0 %3917, %v4433_v26  }
 0x1b0   : > { %3911 = vset.pattern.permute.xlu2 %v4293_v15  ;;  %3906 = vset.pattern.permute.xlu1 %v4287_v24 }
 0x1b1   : > { %2197 = vperm.xlu2 %3911, %v4413_v16   ;;  %1673 = vperm.xlu1 %3906, %v4420_v19  }
 0x1b3   : > { %3922 = vset.pattern.permute.xlu0 %v4294_v30  ;;  %v743_v33 = vpop.xlane.xlu2 %742 }
 0x1b4   : > { %2185 = vperm.xlu0 %3922, %v4420_v19   ;;  %v753_v55 = vsub.f32 %v4539_v21, %v743_v33 }
 0x1b6   : > { %v757_v2 = vmul.f32 1.442695, %v753_v55 }
 0x1b8   : > { %4048 = vpow2.f32 %v757_v2 }
 0x1b9   : > { %3913 = vset.pattern.permute.xlu2 %v4292_v8  ;;  %3910 = vset.pattern.permute.xlu1 %v4292_v8 }
 0x1ba   : > { %1451 = vperm.xlu2 %3913, %v4433_v26   ;;  %1447 = vperm.xlu1 %3910, %v4420_v19  }
 0x1bc   : > { %v1005_v42 = vpop.xlane.xlu2 %1004 }
 0x1c2   : > { %3915 = vset.pattern.permute.xlu2 %v4295_v28  ;;  %3912 = vset.pattern.permute.xlu1 %v4293_v15 }
 0x1c3   : > { %1943 = vperm.xlu2 %3915, %v4413_v16   ;;  %2200 = vperm.xlu1 %3912, %v4420_v19  }
 0x1cb   : > { %3918 = vset.pattern.permute.xlu2 %v4285_v22  ;;  %3914 = vset.pattern.permute.xlu1 %v4294_v30  ;;  %v746_v22 = vpop.xlane.xlu0 %745 }
 0x1cc   : > { %1694 = vperm.xlu2 %3918, %v4465_v32   ;;  %2181 = vperm.xlu1 %3914, %v4413_v16  }
 0x1d4   : > { %3920 = vset.pattern.permute.xlu2 %v4287_v24  ;;  %3916 = vset.pattern.permute.xlu1 %v4295_v28 }
 0x1d5   : > { %1677 = vperm.xlu2 %3920, %v4433_v26   ;;  %1946 = vperm.xlu1 %3916, %v4420_v19  }
 0x1dd   : > { %3923 = vset.pattern.permute.xlu2 %v4295_v28  ;;  %3919 = vset.pattern.permute.xlu1 %v4296_v17 }
 0x1de   : > { %1949 = vperm.xlu2 %3923, %v4433_v26   ;;  %1927 = vperm.xlu1 %3919, %v4413_v16   ;;  %v1002_v16 = vpop.xlane.xlu1 %1001 }
 0x1df   : > { %v4634_v20 = vpop.xlane.xlu0 %522  ;;  %v526_v60 = vpop.xlane.xlu2 %525  ;;  %v1012_v59 = vsub.f32 %v4549_v47, %v1002_v16  ;;  %v533_v47 = vmul.f32 1.442695, %v528_v3 }
 0x1e0   : > { %v530_v7 = vsub.f32 %v4568_v35, %v526_v60 }
 0x1e1   : > { %v1016_v6 = vmul.f32 1.442695, %v1012_v59 }
 0x1e2   : > { %v537_v13 = vmul.f32 1.442695, %v530_v7 }
 0x1e3   : > { %4050 = vpow2.f32 %v1016_v6 }
 0x1e4   : > { %4052 = vpow2.f32 %v533_v47 }
 0x1e5   : > { %4054 = vpow2.f32 %v537_v13 }
 0x1e6   : > { %3925 = vset.pattern.permute.xlu2 %v4296_v17  ;;  %3921 = vset.pattern.permute.xlu1 %v4292_v8  ;;  %v4672_v8 = vpop.eup %4048 }
 0x1e7   : > { %1931 = vperm.xlu2 %3925, %v4420_v19   ;;  %1455 = vperm.xlu1 %3921, %v4465_v32   ;;  %v4638_v25 = vpop.xlane.xlu0 %1007  ;;  %v765_v27 = vsel %vm514_vm3, %v4672_v8, 0.0 }
 0x1e8   : > { %v1014_v52 = vsub.f32 %v4575_v48, %v4638_v25  ;;  %v1470_v48 = vperm.slane %v4489_v41, %v4491_v43 }
 0x1e9   : > { %v4676_v23 = vpop.eup %4050 }
 0x1ea   : > { %v4680_v33 = vpop.eup %4052  ;;  %v1020_v59 = vmul.f32 1.442695, %v1014_v52 }
 0x1ef   : > { %1935 = vperm.xlu2 %3925, %v4433_v26   ;;  %3924 = vset.pattern.permute.xlu1 %v4295_v28 }
 0x1f0   : > { %1952 = vperm.xlu1 %3924, %v4465_v32  }
 0x1f1   : > { %v4644_v36 = vpop.xlane.xlu1 %748  ;;  %v752_v11 = vpop.xlane.xlu2 %751 }
 0x1f2   : > { %v756_v28 = vsub.f32 %v4586_v37, %v752_v11  ;;  %v1013_v37 = vsub.f32 %v4552_v49, %v1005_v42 }
 0x1f4   : > { %v763_v50 = vmul.f32 1.442695, %v756_v28  ;;  %v1018_v60 = vmul.f32 1.442695, %v1013_v37 }
 0x1f7   : > { %3928 = vset.pattern.permute.xlu2 %v4293_v15 }
 0x1f8   : > { %3926 = vset.pattern.permute.xlu1 %v4287_v24  ;;  %v1215_v24 = vperm.slane %v4486_v38, %v4491_v43 }
 0x1f9   : > { %1681 = vperm.xlu1 %3926, %v4465_v32   ;;  %v4651_v51 = vpop.xlane.xlu1 %1010 }
 0x1fa   : > { %v4642_v19 = vpop.permute.xlu0 %1210  ;;  %v4657_v57 = vsel %vm469_vm1, %v1216_v39, %v1215_v24  ;;  %v1214_v39 = vpop.permute.xlu2 %1213  ;;  %v1024_v24 = vsel %vm514_vm3, %v4676_v23, 0.0 }
 0x1fb   : > { %v1219_v41 = vperm.slane %v1214_v39, %v4496_v45  ;;  %v1218_v7 = vperm.slane %v4642_v19, %v4491_v43  ;;  %v1697_v19 = vperm.slane %v4530_v9, %v4496_v45  ;;  %v1696_v39 = vperm.slane %v4493_v44, %v4491_v43 }
 0x201   : > { %3927 = vset.pattern.permute.xlu1 %v4293_v15  ;;  %v754_v15 = vsub.f32 %v4533_v14, %v746_v22  ;;  %v4684_v14 = vpop.eup %4054  ;;  %v542_v22 = vsel %vm514_vm3, %v4680_v33, 0.0 }
 0x202   : > { %v1197_v42 = vpop.permute.xlu2 %1196 }
 0x203   : > { %v4646_v40 = vpop.permute.xlu0 %1465  ;;  %v759_v16 = vmul.f32 1.442695, %v754_v15 }
 0x205   : > { %4056 = vpow2.f32 %v759_v16 }
 0x206   : > { %4058 = vpow2.f32 %v763_v50 }
 0x207   : > { %4060 = vpow2.f32 %v1018_v60 }
 0x208   : > { %4062 = vpow2.f32 %v1020_v59 }
 0x20a   : > { %v1469_v13 = vpop.permute.xlu2 %1468 }
 0x20c   : > { %v1189_v58 = vpop.permute.xlu0 %1188 }
 0x20d   : > { %v1235_v62 = vadd.f32 %v4657_v57, %v1189_v58  ;;  %v548_v58 = vsel %vm514_vm3, %v4684_v14, 0.0 }
 0x20f   : > { %v1243_v46 = vmul.f32 0.2, %v1235_v62  ;;  %vm1239_vm15 = vcmp.gt.f32.partialorder %v1235_v62, 0.0 }
 0x211   : > { %v1463_v4 = vpop.permute.xlu1 %1462  ;;  %v1247_v38 = vsel %vm1239_vm15, %v1235_v62, %v1243_v46  ;;  %v4693_v62 = vpop.eup %4056 }
 0x212   : > { %v4663_v21 = vmul.f32 %v1247_v38, %v4506_v54  ;;  %v1471_v2 = vperm.slane %v1463_v4, %v4496_v45  ;;  %v4696_v49 = vpop.eup %4058  ;;  %v768_v25 = vsel %vm514_vm3, %v4693_v62, 0.0 }
 0x213   : > { %v774_v4 = vsel %vm514_vm3, %v4696_v49, 0.0  ;;  %v4710_v6 = vpop.eup %4060 }
 0x214   : > { %v1255_v10 = vsel %vm514_vm3, %v4663_v21, -inf  ;;  %v4703_v46 = vsel %vm469_vm1, %v1471_v2, %v1470_v48  ;;  %v1027_v11 = vsel %vm514_vm3, %v4710_v6, 0.0  ;;  %v1201_v2 = vpop.permute.xlu0 %1200 }
 0x215   : > { %1256 = vmax.xlane.f32.xlu0 %v1255_v10  ;;  %v4715_v10 = vpop.eup %4062 }
 0x216   : > { %v1030_v15 = vsel %vm514_vm3, %v4715_v10, 0.0 }
 0x218   : > { %540 = vadd.xlane.f32.xlu2 %v539_v0  ;;  %v1220_v0 = vsel %vm469_vm1, %v1219_v41, %v1218_v7 }
 0x21a   : > { %v1444_v35 = vpop.permute.xlu1 %1443 }
 0x21b   : > { %v1490_v38 = vadd.f32 %v4703_v46, %v1444_v35  ;;  %v1237_v35 = vadd.f32 %v1220_v0, %v1197_v42  ;;  %v1238_v42 = vadd.f32 %v1220_v0, %v1201_v2 }
 0x21d   : > { %766 = vadd.xlane.f32.xlu0 %v765_v27  ;;  %v1498_v47 = vmul.f32 0.2, %v1490_v38  ;;  %vm1494_vm2 = vcmp.gt.f32.partialorder %v1490_v38, 0.0  ;;  %v1245_v50 = vmul.f32 0.2, %v1237_v35  ;;  %vm1241_vm4 = vcmp.gt.f32.partialorder %v1237_v35, 0.0 }
 0x21e   : > { %v1246_v41 = vmul.f32 0.2, %v1238_v42  ;;  %vm1242_vm6 = vcmp.gt.f32.partialorder %v1238_v42, 0.0 }
 0x21f   : > { %v1502_v27 = vsel %vm1494_vm2, %v1490_v38, %v1498_v47  ;;  %v1249_v9 = vsel %vm1241_vm4, %v1237_v35, %v1245_v50  ;;  %v529_v35 = vsub.f32 %v4565_v34, %v4634_v20  ;;  %v755_v20 = vsub.f32 %v4583_v5, %v4644_v36 }
 0x220   : > { %1025 = vadd.xlane.f32.xlu2 %v1024_v24  ;;  %v4726_v16 = vmul.f32 %v1502_v27, %v4506_v54  ;;  %v4731_v24 = vsel %vm469_vm1, %v1697_v19, %v1696_v39  ;;  %v4737_v60 = vmul.f32 %v1249_v9, %v4506_v54 }
 0x221   : > { %v535_v39 = vmul.f32 1.442695, %v529_v35 }
 0x222   : > { %v1510_v37 = vsel %vm514_vm3, %v4726_v16, -inf  ;;  %v1261_v44 = vsel %vm514_vm3, %v4737_v60, -inf }
 0x223   : > { %543 = vadd.xlane.f32.xlu1 %v542_v22  ;;  %v1674_v55 = vpop.permute.xlu1 %1673  ;;  %v2198_v22 = vpop.permute.xlu2 %2197  ;;  %4064 = vpow2.f32 %v535_v39 }
 0x224   : > { %v1717_v52 = vadd.f32 %v4731_v24, %v1674_v55  ;;  %v2208_v7 = vperm.slane %v2198_v22, %v4491_v43  ;;  %v1474_v22 = vperm.slane %v1469_v13, %v4496_v45 }
 0x225   : > { %549 = vadd.xlane.f32.xlu0 %v548_v58 }
 0x226   : > { %v1725_v59 = vmul.f32 0.2, %v1717_v52  ;;  %vm1721_vm5 = vcmp.gt.f32.partialorder %v1717_v52, 0.0 }
 0x228   : > { %v1729_v48 = vsel %vm1721_vm5, %v1717_v52, %v1725_v59  ;;  %v1473_v52 = vperm.slane %v4646_v40, %v4491_v43 }
 0x229   : > { %v4747_v38 = vmul.f32 %v1729_v48, %v4516_v61  ;;  %v4781_v48 = vpop.eup %4064 }
 0x22a   : > { %v545_v36 = vsel %vm514_vm3, %v4781_v48, 0.0 }
 0x22b   : > { %769 = vadd.xlane.f32.xlu1 %v768_v25  ;;  %v4741_v25 = vpop.permute.xlu2 %1451 }
 0x22c   : > { %v4705_v3 = vpop.permute.xlu1 %1447 }
 0x22d   : > { %775 = vadd.xlane.f32.xlu0 %v774_v4 }
 0x233   : > { %1028 = vadd.xlane.f32.xlu1 %v1027_v11  ;;  %v1739_v11 = vsel %vm514_vm3, %v4747_v38, -inf  ;;  %v4764_v19 = vpop.permute.xlu2 %1943 }
 0x235   : > { %v2201_v28 = vpop.permute.xlu1 %2200  ;;  %1031 = vadd.xlane.f32.xlu0 %v1030_v15  ;;  %v1250_v15 = vsel %vm1242_vm6, %v1238_v42, %v1246_v41 }
 0x236   : > { %v2209_v55 = vperm.slane %v2201_v28, %v4496_v45  ;;  %v4762_v27 = vmul.f32 %v1250_v15, %v4516_v61  ;;  %v1692_v15 = vpop.permute.xlu0 %1691 }
 0x238   : > { %2206 = vperm.xlu2 %3928, %v4465_v32   ;;  %v4751_v47 = vsel %vm469_vm1, %v2209_v55, %v2208_v7  ;;  %v1236_v55 = vadd.f32 %v4657_v57, %v4523_v1  ;;  %v1699_v57 = vperm.slane %v1692_v15, %v4491_v43 }
 0x23a   : > { %vm1240_vm9 = vcmp.gt.f32.partialorder %v1236_v55, 0.0 }
 0x23b   : > { %v1695_v13 = vpop.permute.xlu2 %1694 }
 0x23c   : > { %v1700_v35 = vperm.slane %v1695_v13, %v4496_v45 }
 0x23d   : > { %1511 = vmax.xlane.f32.xlu0 %v1510_v37  ;;  %v1264_v37 = vsel %vm514_vm3, %v4762_v27, -inf }
 0x23e   : > { %v2182_v58 = vpop.permute.xlu1 %2181 }
 0x23f   : > { %v2228_v0 = vadd.f32 %v4751_v47, %v2182_v58  ;;  %v1475_v58 = vsel %vm469_vm1, %v1474_v22, %v1473_v52 }
 0x241   : > { %v2236_v50 = vmul.f32 0.2, %v2228_v0  ;;  %vm2232_vm7 = vcmp.gt.f32.partialorder %v2228_v0, 0.0 }
 0x243   : > { %v2240_v34 = vsel %vm2232_vm7, %v2228_v0, %v2236_v50  ;;  %v1244_v0 = vmul.f32 0.2, %v1236_v55  ;;  %v1491_v50 = vadd.f32 %v4703_v46, %v4705_v3  ;;  %v1492_v46 = vadd.f32 %v1475_v58, %v4741_v25 }
 0x244   : > { %v4776_v9 = vmul.f32 %v2240_v34, %v4506_v54 }
 0x245   : > { %1262 = vmax.xlane.f32.xlu0 %v1261_v44  ;;  %v761_v44 = vmul.f32 1.442695, %v755_v20  ;;  %v1248_v39 = vsel %vm1240_vm9, %v1236_v55, %v1244_v0  ;;  %v1499_v20 = vmul.f32 0.2, %v1491_v50  ;;  %vm1495_vm11 = vcmp.gt.f32.partialorder %v1491_v50, 0.0 }
 0x246   : > { %vm1496_vm12 = vcmp.gt.f32.partialorder %v1492_v46, 0.0 }
 0x247   : > { %v4743_v4 = vpop.permute.xlu1 %1946  ;;  %4066 = vpow2.f32 %v761_v44  ;;  %v1503_v44 = vsel %vm1495_vm11, %v1491_v50, %v1499_v20 }
 0x24c   : > { %2203 = vperm.xlu1 %3927, %v4433_v26  }
 0x24d   : > { %1740 = vmax.xlane.f32.xlu0 %v1739_v11  ;;  %v1678_v11 = vpop.permute.xlu2 %1677 }
 0x250   : > { %v4759_v28 = vpop.permute.xlu1 %1927 }
 0x254   : > { %3929 = vset.pattern.permute.xlu1 %v4294_v30 }
 0x255   : > { %2189 = vperm.xlu1 %3929, %v4433_v26   ;;  %1265 = vmax.xlane.f32.xlu0 %v1264_v37  ;;  %v2248_v26 = vsel %vm514_vm3, %v4776_v9, -inf  ;;  %v1701_v37 = vsel %vm469_vm1, %v1700_v35, %v1699_v57  ;;  %v2186_v35 = vpop.permute.xlu0 %2185 }
 0x256   : > { %v2229_v57 = vadd.f32 %v4751_v47, %v2186_v35 }
 0x258   : > { %vm2233_vm15 = vcmp.gt.f32.partialorder %v2229_v57, 0.0 }
 0x259   : > { %v1456_v59 = vpop.permute.xlu1 %1455 }
 0x25a   : > { %v1493_v2 = vadd.f32 %v1475_v58, %v1456_v59 }
 0x25c   : > { %v1501_v42 = vmul.f32 0.2, %v1493_v2  ;;  %vm1497_vm8 = vcmp.gt.f32.partialorder %v1493_v2, 0.0 }
 0x25d   : > { %3930 = vset.pattern.permute.xlu1 %v4296_v17  ;;  %2249 = vmax.xlane.f32.xlu0 %v2248_v26  ;;  %v4794_v17 = vpop.eup %4066  ;;  %v4819_v26 = vmul.f32 %v1503_v44, %v4516_v61 }
 0x25e   : > { %1939 = vperm.xlu1 %3930, %v4465_v32   ;;  %v1505_v5 = vsel %vm1497_vm8, %v1493_v2, %v1501_v42  ;;  %v771_v1 = vsel %vm514_vm3, %v4794_v17, 0.0  ;;  %v1955_v42 = vperm.slane %v4743_v4, %v4496_v45 }
 0x25f   : > { %v4788_v40 = vmul.f32 %v1505_v5, %v4516_v61  ;;  %v1500_v5 = vmul.f32 0.2, %v1492_v46  ;;  %v1513_v58 = vsel %vm514_vm3, %v4819_v26, -inf }
 0x261   : > { %546 = vadd.xlane.f32.xlu2 %v545_v36  ;;  %v1519_v7 = vsel %vm514_vm3, %v4788_v40, -inf  ;;  %v1954_v36 = vperm.slane %v4764_v19, %v4491_v43  ;;  %v1504_v0 = vsel %vm1496_vm12, %v1492_v46, %v1500_v5 }
 0x262   : > { %v1953_v41 = vpop.permute.xlu1 %1952  ;;  %v4828_v4 = vmul.f32 %v1504_v0, %v4506_v54 }
 0x263   : > { %v1956_v25 = vsel %vm469_vm1, %v1955_v42, %v1954_v36 }
 0x264   : > { %v1516_v19 = vsel %vm514_vm3, %v4828_v4, -inf }
 0x265   : > { %1520 = vmax.xlane.f32.xlu0 %v1519_v7  ;;  %v1974_v7 = vadd.f32 %v1956_v25, %v4759_v28  ;;  %v1958_v28 = vperm.slane %v1953_v41, %v4496_v45 }
 0x266   : > { %3931 = vset.pattern.permute.xlu1 %v4294_v30  ;;  %v4806_v30 = vmul.f32 %v1248_v39, %v4516_v61 }
 0x267   : > { %2193 = vperm.xlu1 %3931, %v4465_v32   ;;  %v1950_v32 = vpop.permute.xlu2 %1949  ;;  %v1982_v15 = vmul.f32 0.2, %v1974_v7  ;;  %vm1978_vm13 = vcmp.gt.f32.partialorder %v1974_v7, 0.0 }
 0x268   : > { %v1258_v59 = vsel %vm514_vm3, %v4806_v30, -inf }
 0x269   : > { %772 = vadd.xlane.f32.xlu2 %v771_v1  ;;  %v1716_v1 = vadd.f32 %v4731_v24, %v4501_v53  ;;  %v1986_v50 = vsel %vm1978_vm13, %v1974_v7, %v1982_v15  ;;  %v1718_v24 = vadd.f32 %v1701_v37, %v1678_v11 }
 0x26b   : > { %v1682_v22 = vpop.permute.xlu1 %1681  ;;  %v1724_v20 = vmul.f32 0.2, %v1716_v1  ;;  %vm1720_vm14 = vcmp.gt.f32.partialorder %v1716_v1, 0.0  ;;  %vm1722_vm2 = vcmp.gt.f32.partialorder %v1718_v24, 0.0 }
 0x26c   : > { %v1719_v34 = vadd.f32 %v1701_v37, %v1682_v22  ;;  %v1957_v22 = vperm.slane %v1950_v32, %v4491_v43 }
 0x26d   : > { %v1728_v41 = vsel %vm1720_vm14, %v1716_v1, %v1724_v20 }
 0x26e   : > { %v1727_v52 = vmul.f32 0.2, %v1719_v34  ;;  %vm1723_vm10 = vcmp.gt.f32.partialorder %v1719_v34, 0.0  ;;  %v4847_v46 = vmul.f32 %v1728_v41, %v4506_v54 }
 0x26f   : > { %v1932_v55 = vpop.permute.xlu2 %1931 }
 0x270   : > { %v1731_v2 = vsel %vm1723_vm10, %v1719_v34, %v1727_v52  ;;  %v4838_v34 = vmul.f32 %v1986_v50, %v4506_v54  ;;  %v2237_v52 = vmul.f32 0.2, %v2229_v57  ;;  %v1736_v11 = vsel %vm514_vm3, %v4847_v46, -inf }
 0x271   : > { %1259 = vmax.xlane.f32.xlu2 %v1258_v59  ;;  %v4812_v3 = vmul.f32 %v1731_v2, %v4516_v61  ;;  %v4841_v59 = vsel %vm469_vm1, %v1958_v28, %v1957_v22  ;;  %v1975_v5 = vadd.f32 %v1956_v25, %v1932_v55 }
 0x272   : > { %v1994_v53 = vsel %vm514_vm3, %v4838_v34, -inf  ;;  %v2241_v2 = vsel %vm2233_vm15, %v2229_v57, %v2237_v52 }
 0x273   : > { %v1745_v13 = vsel %vm514_vm3, %v4812_v3, -inf  ;;  %v4850_v44 = vmul.f32 %v2241_v2, %v4516_v61  ;;  %v1983_v57 = vmul.f32 0.2, %v1975_v5  ;;  %vm1979_vm5 = vcmp.gt.f32.partialorder %v1975_v5, 0.0 }
 0x274   : > { %1746 = vmax.xlane.f32.xlu0 %v1745_v13  ;;  %v1726_v13 = vmul.f32 0.2, %v1718_v24 }
 0x275   : > { %v2251_v37 = vsel %vm514_vm3, %v4850_v44, -inf  ;;  %v1987_v52 = vsel %vm1979_vm5, %v1975_v5, %v1983_v57 }
 0x276   : > { %v1730_v36 = vsel %vm1722_vm2, %v1718_v24, %v1726_v13  ;;  %v4868_v41 = vmul.f32 %v1987_v52, %v4516_v61  ;;  %v4264_v52 = vld [vmem:[%s4399_s28] sm:$0xff] }
 0x277   : > { %v1936_v39 = vpop.permute.xlu2 %1935  ;;  %v4857_v35 = vmul.f32 %v1730_v36, %v4506_v54 }
 0x278   : > { %v1976_v47 = vadd.f32 %v4841_v59, %v1936_v39  ;;  %v1997_v5 = vsel %vm514_vm3, %v4868_v41, -inf }
 0x279   : > { %1514 = vmax.xlane.f32.xlu2 %v1513_v58  ;;  %v1742_v22 = vsel %vm514_vm3, %v4857_v35, -inf }
 0x27a   : > { %v1984_v42 = vmul.f32 0.2, %v1976_v47  ;;  %vm1980_vm4 = vcmp.gt.f32.partialorder %v1976_v47, 0.0 }
 0x27c   : > { %v1988_v58 = vsel %vm1980_vm4, %v1976_v47, %v1984_v42  ;;  %v3876_v42 = vunpack.i.h.bf16 %v4518_v63 }
 0x281   : > { %1517 = vmax.xlane.f32.xlu2 %v1516_v19  ;;  %v4860_v19 = vmul.f32 %v1988_v58, %v4506_v54 }
 0x283   : > { %v2000_v20 = vsel %vm514_vm3, %v4860_v19, -inf }
 0x288   : > { %v1257_v0 = vpop.xlane.xlu0 %1256 }
 0x289   : > { %1995 = vmax.xlane.f32.xlu2 %v1994_v53  ;;  %v1267_v50 = vsub.f32 %v4663_v21, %v1257_v0 }
 0x28b   : > { %v541_v32 = vpop.xlane.xlu2 %540  ;;  %v1271_v53 = vmul.f32 1.442695, %v1267_v50 }
 0x28c   : > { %4068 = vrcp.f32 %v541_v32  ;;  %v562_v39 = vand.u32 2147483648, %v541_v32  ;;  %v560_v55 = vand.u32 2147483647, %v541_v32  ;;  %vm556_vm7 = vweird.f32 %v541_v32 }
 0x28e   : > { %v563_v21 = vor.u32 1.1754944e-38, %v562_v39  ;;  %vm561_vm9 = vcmp.eq.f32.partialorder %v560_v55, 8.507059e+37 }
 0x290   : > { %v4882_v50 = vpop.xlane.xlu0 %766 }
 0x291   : > { %1737 = vmax.xlane.f32.xlu1 %v1736_v11  ;;  %2252 = vmax.xlane.f32.xlu2 %v2251_v37 }
 0x292   : > { %v4069_v7 = vpop.eup %4068 }
 0x293   : > { %v552_v15 = vmul.f32 %v4069_v7, %v541_v32  ;;  %vm557_vm6 = vweird.f32 %v4069_v7  ;;  %v3875_v32 = vunpack.i.l.bf16 %v4518_v63 }
 0x294   : > { %vm558_vm8 = vmor %vm556_vm7, %vm557_vm6 }
 0x295   : > { %v553_v1 = vsub.f32 1.0, %v552_v15 }
 0x296   : > { %v544_v28 = vpop.xlane.xlu1 %543 }
 0x297   : > { %4070 = vrcp.f32 %v544_v28  ;;  %v554_v25 = vmul.f32 %v4069_v7, %v553_v1  ;;  %v577_v36 = vand.u32 2147483648, %v544_v28  ;;  %v575_v58 = vand.u32 2147483647, %v544_v28 }
 0x298   : > { %4072 = vpow2.f32 %v1271_v53  ;;  %vm571_vm11 = vweird.f32 %v544_v28 }
 0x299   : > { %1743 = vmax.xlane.f32.xlu1 %v1742_v22  ;;  %2001 = vmax.xlane.f32.xlu2 %v2000_v20  ;;  %v555_v54 = vadd.f32 %v4069_v7, %v554_v25  ;;  %v578_v0 = vor.u32 1.1754944e-38, %v577_v36  ;;  %vm576_vm13 = vcmp.eq.f32.partialorder %v575_v58, 8.507059e+37  ;;  %v4889_v25 = vpop.xlane.xlu0 %549  ;;  %v324_v22 = vld [vmem:[%s6266_s2 + $0x20] sm:$0xff]  ;;  %v4899_v20 = vpop.xlane.xlu2 %1025  ;;  %v4266_v36 = vld [vmem:[%s4399_s28 + $0x10] sm:$0xff] }
 0x29a   : > { %v4267_v58 = vld [vmem:[%s6265_s1] sm:$0xff]  ;;  %4074 = vrcp.f32 %v4889_v25  ;;  %vm601_vm5 = vweird.f32 %v4889_v25 }
 0x29b   : > { %v559_v24 = vsel %vm558_vm8, %v4069_v7, %v555_v54  ;;  %v321_v54 = vld [vmem:[%s6266_s2 + $0x8] sm:$0xff]  ;;  %4076 = vrcp.f32 %v4882_v50 }
 0x29c   : > { %v564_v47 = vsel %vm561_vm9, %v563_v21, %v559_v24 }
 0x29d   : > { %v4071_v2 = vpop.eup %4070  ;;  %v565_v13 = vmul.f32 %v4666_v56, %v564_v47 }
 0x29e   : > { %v567_v11 = vmul.f32 %v4071_v2, %v544_v28  ;;  %vm572_vm10 = vweird.f32 %v4071_v2  ;;  %v4876_v7 = vpop.eup %4072  ;;  %v4884_v39 = vpop.xlane.xlu1 %769  ;;  %v330_v28 = vld [vmem:[%s6266_s2 + $0x50] sm:$0xff] }
 0x29f   : > { %3763 = vmatmul.msk.f32.vlgmr.msra.gmra.mxu3 %vm514_vm3, %v565_v13  ;;  %vm573_vm12 = vmor %vm571_vm11, %vm572_vm10  ;;  %v1279_v1 = vsel %vm514_vm3, %v4876_v7, 0.0  ;;  %386 = vmatpush.msra.mxu1 %v330_v28  ;;  %v4268_v28 = vld [vmem:[%s4399_s28 + $0x18] sm:$0xff] }
 0x2a0   : > { %v568_v37 = vsub.f32 1.0, %v567_v11  ;;  %865 = vmatpush.msra.mxu3 %v3876_v42 }
 0x2a1   : > { %1998 = vmax.xlane.f32.xlu1 %v1997_v5  ;;  %v4906_v53 = vpop.xlane.xlu0 %775  ;;  %v2207_v24 = vpop.permute.xlu2 %2206 }
 0x2a2   : > { %866 = vmatpush.msra.mxu3 %v3875_v32  ;;  %v569_v61 = vmul.f32 %v4071_v2, %v568_v37  ;;  %v2212_v13 = vperm.slane %v2207_v24, %v4496_v45 }
 0x2a4   : > { %v570_v56 = vadd.f32 %v4071_v2, %v569_v61 }
 0x2a6   : > { %v574_v15 = vsel %vm573_vm12, %v4071_v2, %v570_v56  ;;  %v4894_v55 = vpop.xlane.xlu1 %1028  ;;  %v4265_v2 = vld [vmem:[%s4399_s28 + $0x8] sm:$0xff]  ;;  %vm782_vm12 = vweird.f32 %v4882_v50  ;;  %s4298_s28 = smov 64  }
 0x2a7   : > { %v579_v63 = vsel %vm576_vm13, %v578_v0, %v574_v15 }
 0x2a8   : > { %v580_v57 = vmul.f32 %v4680_v33, %v579_v63  ;;  %v327_v33 = vld [vmem:[%s6266_s2 + $0x38] sm:$0xff] }
 0x2a9   : > { %1280 = vadd.xlane.f32.xlu1 %v1279_v1  ;;  %387 = vmatpush.msra.mxu1 %v327_v33  ;;  %v4913_v37 = vpop.xlane.xlu0 %1031  ;;  %v4928_v33 = vpop.eup %4074 }
 0x2aa   : > { %3764 = vmatmul.msk.f32.gmra.mxu3 %vm514_vm3, %v580_v57  ;;  %vm602_vm7 = vweird.f32 %v4928_v33 }
 0x2ab   : > { %388 = vmatpush.msra.mxu1 %v324_v22  ;;  %vm4980_vm10 = vmor %vm601_vm5, %vm602_vm7  ;;  %vm827_vm7 = vweird.f32 %v4906_v53 }
 0x2ad   : > { %389 = vmatpush.msra.mxu1 %v321_v54 }
 0x2ae   : > { %3755 = vmatmul.msk.f32.vlgmr.msra.gmra.mxu1 %vm332_vm0, %v4264_v52  ;;  %v4269_v52 = vld [vmem:[%s6265_s1 + $0x8] sm:$0xff] }
 0x2b1   : > { %v1512_v1 = vpop.xlane.xlu0 %1511 }
 0x2b2   : > { %v1522_v24 = vsub.f32 %v4726_v16, %v1512_v1 }
 0x2b6   : > { %3756 = vmatmul.msk.f32.gmra.mxu1 %vm332_vm0, %v4265_v2 }
 0x2b9   : > { %v1263_v16 = vpop.xlane.xlu0 %1262 }
 0x2be   : > { %v2204_v21 = vpop.permute.xlu1 %2203  ;;  %3757 = vmatmul.msk.f32.gmra.mxu1 %vm332_vm0, %v4266_v36 }
 0x2bf   : > { %v2211_v47 = vperm.slane %v2204_v21, %v4491_v43 }
 0x2c1   : > { %v2213_v11 = vsel %vm469_vm1, %v2212_v13, %v2211_v47 }
 0x2c6   : > { %3758 = vmatmul.msk.f32.gmra.mxu1 %vm332_vm0, %v4268_v28 }
 0x2c7   : > { %v2190_v42 = vpop.permute.xlu1 %2189 }
 0x2c8   : > { %v2230_v32 = vadd.f32 %v2213_v11, %v2190_v42  ;;  %v4942_v42 = vpop.eup %4076 }
 0x2c9   : > { %vm783_vm13 = vweird.f32 %v4942_v42 }
 0x2ca   : > { %vm2234_vm14 = vcmp.gt.f32.partialorder %v2230_v32, 0.0  ;;  %v2238_v5 = vmul.f32 0.2, %v2230_v32 }
 0x2cc   : > { %v2242_v61 = vsel %vm2234_vm14, %v2230_v32, %v2238_v5  ;;  %v1526_v5 = vmul.f32 1.442695, %v1522_v24 }
 0x2cd   : > { %v4920_v56 = vmul.f32 %v4267_v58, %v2242_v61 }
 0x2cf   : > { %v2254_v0 = vsel %vm514_vm3, %v4920_v56, -inf }
 0x2d0   : > { %v1940_v15 = vpop.permute.xlu1 %1939  ;;  %2255 = vmax.xlane.f32.xlu0 %v2254_v0 }
 0x2d1   : > { %v1977_v63 = vadd.f32 %v4841_v59, %v1940_v15  ;;  %v597_v59 = vmul.f32 %v4928_v33, %v4889_v25 }
 0x2d3   : > { %vm1981_vm15 = vcmp.gt.f32.partialorder %v1977_v63, 0.0  ;;  %v1985_v57 = vmul.f32 0.2, %v1977_v63  ;;  %v598_v32 = vsub.f32 1.0, %v597_v59  ;;  %v1269_v59 = vsub.f32 %v4737_v60, %v1263_v16 }
 0x2d4   : > { %v547_v22 = vpop.xlane.xlu2 %546 }
 0x2d5   : > { %v1989_v54 = vsel %vm1981_vm15, %v1977_v63, %v1985_v57  ;;  %4078 = vrcp.f32 %v547_v22  ;;  %v778_v63 = vmul.f32 %v4942_v42, %v4882_v50  ;;  %v599_v28 = vmul.f32 %v4928_v33, %v598_v32 }
 0x2d6   : > { %v4934_v21 = vmul.f32 %v4269_v52, %v1989_v54  ;;  %4080 = vrcp.f32 %v4906_v53  ;;  %v592_v24 = vand.u32 2147483648, %v547_v22  ;;  %v590_v45 = vand.u32 2147483647, %v547_v22 }
 0x2d7   : > { %4082 = vrcp.f32 %v4884_v39  ;;  %vm586_vm6 = vweird.f32 %v547_v22  ;;  %v600_v60 = vadd.f32 %v4928_v33, %v599_v28 }
 0x2d8   : > { %v2003_v47 = vsel %vm514_vm3, %v4934_v21, -inf  ;;  %vm591_vm9 = vcmp.eq.f32.partialorder %v590_v45, 8.507059e+37 }
 0x2d9   : > { %v2194_v2 = vpop.permute.xlu1 %2193  ;;  %2004 = vmax.xlane.f32.xlu2 %v2003_v47 }
 0x2da   : > { %v2231_v13 = vadd.f32 %v2213_v11, %v2194_v2 }
 0x2db   : > { %v4079_v36 = vpop.eup %4078 }
 0x2dc   : > { %vm2235_vm2 = vcmp.gt.f32.partialorder %v2231_v13, 0.0  ;;  %v2239_v61 = vmul.f32 0.2, %v2231_v13  ;;  %v4944_v58 = vpop.xlane.xlu2 %772  ;;  %v4946_v0 = vpop.eup %4080  ;;  %v582_v15 = vmul.f32 %v4079_v36, %v547_v22  ;;  %vm587_vm4 = vweird.f32 %v4079_v36 }
 0x2dd   : > { %4084 = vrcp.f32 %v4944_v58  ;;  %v823_v54 = vmul.f32 %v4946_v0, %v4906_v53  ;;  %vm588_vm8 = vmor %vm586_vm6, %vm587_vm4  ;;  %vm812_vm14 = vweird.f32 %v4944_v58  ;;  %vm828_vm5 = vweird.f32 %v4946_v0 }
 0x2de   : > { %v2243_v11 = vsel %vm2235_vm2, %v2231_v13, %v2239_v61  ;;  %4086 = vpow2.f32 %v1526_v5  ;;  %v583_v1 = vsub.f32 1.0, %v582_v15  ;;  %v1015_v13 = vsub.f32 %v4593_v12, %v4651_v51  ;;  %vm5014_vm6 = vmor %vm782_vm12, %vm783_vm13 }
 0x2df   : > { %v4952_v57 = vmul.f32 %v4269_v52, %v2243_v11  ;;  %v779_v5 = vsub.f32 1.0, %v778_v63  ;;  %v4963_v52 = vpop.eup %4082  ;;  %v824_v16 = vsub.f32 1.0, %v823_v54  ;;  %v1275_v15 = vmul.f32 1.442695, %v1269_v59 }
 0x2e0   : > { %v584_v47 = vmul.f32 %v4079_v36, %v583_v1  ;;  %v593_v11 = vor.u32 1.1754944e-38, %v592_v24  ;;  %v605_v12 = vand.u32 2147483647, %v4889_v25  ;;  %v793_v54 = vmul.f32 %v4963_v52, %v4884_v39 }
 0x2e1   : > { %v2257_v2 = vsel %vm514_vm3, %v4952_v57, -inf  ;;  %v780_v28 = vmul.f32 %v4942_v42, %v779_v5  ;;  %4088 = vpow2.f32 %v1275_v15  ;;  %v818_v5 = vand.u32 2147483648, %v4944_v58 }
 0x2e2   : > { %2258 = vmax.xlane.f32.xlu0 %v2257_v2  ;;  %v585_v32 = vadd.f32 %v4079_v36, %v584_v47  ;;  %v607_v2 = vand.u32 2147483648, %v4889_v25  ;;  %v816_v25 = vand.u32 2147483647, %v4944_v58  ;;  %vm606_vm15 = vcmp.eq.f32.partialorder %v605_v12, 8.507059e+37 }
 0x2e3   : > { %v4085_v61 = vpop.eup %4084  ;;  %v819_v15 = vor.u32 1.1754944e-38, %v818_v5  ;;  %v788_v12 = vand.u32 2147483648, %v4882_v50  ;;  %vm797_vm12 = vweird.f32 %v4884_v39 }
 0x2e4   : > { %v1260_v1 = vpop.xlane.xlu2 %1259  ;;  %v4969_v51 = vpop.eup %4086  ;;  %v808_v63 = vmul.f32 %v4085_v61, %v4944_v58  ;;  %v589_v47 = vsel %vm588_vm8, %v4079_v36, %v585_v32  ;;  %v604_v36 = vsel %vm4980_vm10, %v4928_v33, %v600_v60  ;;  %vm813_vm11 = vweird.f32 %v4085_v61  ;;  %vm5027_vm8 = vmor %vm827_vm7, %vm828_vm5 }
 0x2e5   : > { %v1268_v22 = vsub.f32 %v4806_v30, %v1260_v1  ;;  %v594_v59 = vsel %vm591_vm9, %v593_v11, %v589_v47  ;;  %v1534_v32 = vsel %vm514_vm3, %v4969_v51, 0.0  ;;  %v825_v11 = vmul.f32 %v4946_v0, %v824_v16  ;;  %vm814_vm2 = vmor %vm812_vm14, %vm813_vm11  ;;  %v1741_v47 = vpop.xlane.xlu0 %1740 }
 0x2e6   : > { %v809_v43 = vsub.f32 1.0, %v808_v63  ;;  %v595_v45 = vmul.f32 %v4781_v48, %v594_v59  ;;  %v1022_v48 = vmul.f32 1.442695, %v1015_v13  ;;  %v608_v33 = vor.u32 1.1754944e-38, %v607_v2 }
 0x2e7   : > { %v1273_v30 = vmul.f32 1.442695, %v1268_v22  ;;  %v781_v16 = vadd.f32 %v4942_v42, %v780_v28  ;;  %vm817_vm4 = vcmp.eq.f32.partialorder %v816_v25, 8.507059e+37  ;;  %v826_v59 = vadd.f32 %v4946_v0, %v825_v11  ;;  %v5003_v24 = vpop.eup %4088 }
 0x2e8   : > { %v810_v1 = vmul.f32 %v4085_v61, %v809_v43  ;;  %3765 = vmatmul.msk.f32.vlgmr.msrb.gmra.mxu3 %vm514_vm3, %v595_v45  ;;  %v794_v43 = vsub.f32 1.0, %v793_v54  ;;  %v609_v22 = vsel %vm606_vm15, %v608_v33, %v604_v36  ;;  %v786_v58 = vand.u32 2147483647, %v4882_v50 }
 0x2e9   : > { %4090 = vpow2.f32 %v1273_v30  ;;  %v833_v54 = vand.u32 2147483648, %v4906_v53  ;;  %v610_v30 = vmul.f32 %v4684_v14, %v609_v22  ;;  %v831_v36 = vand.u32 2147483647, %v4906_v53 }
 0x2ea   : > { %1535 = vadd.xlane.f32.xlu0 %v1534_v32  ;;  %v811_v60 = vadd.f32 %v4085_v61, %v810_v1  ;;  %4092 = vpow2.f32 %v1022_v48  ;;  %v1749_v5 = vsub.f32 %v4747_v38, %v1741_v47  ;;  %v785_v14 = vsel %vm5014_vm6, %v4942_v42, %v781_v16 }
 0x2eb   : > { %v1285_v38 = vsel %vm514_vm3, %v5003_v24, 0.0  ;;  %v795_v53 = vmul.f32 %v4963_v52, %v794_v43  ;;  %v789_v11 = vor.u32 1.1754944e-38, %v788_v12  ;;  %v834_v1 = vor.u32 1.1754944e-38, %v833_v54 }
 0x2ec   : > { %v4999_v63 = vpop.xlane.xlu2 %1514  ;;  %v815_v13 = vsel %vm814_vm2, %v4085_v61, %v811_v60  ;;  %vm787_vm9 = vcmp.eq.f32.partialorder %v786_v58, 8.507059e+37  ;;  %vm832_vm10 = vcmp.eq.f32.partialorder %v831_v36, 8.507059e+37  ;;  %v1754_v42 = vmul.f32 1.442695, %v1749_v5 }
 0x2ed   : > { %v820_v28 = vsel %vm817_vm4, %v819_v15, %v815_v13  ;;  %v790_v25 = vsel %vm787_vm9, %v789_v11, %v785_v14  ;;  %v796_v60 = vadd.f32 %v4963_v52, %v795_v53  ;;  %vm798_vm11 = vweird.f32 %v4963_v52 }
 0x2ee   : > { %v821_v45 = vmul.f32 %v4794_v17, %v820_v28  ;;  %v830_v17 = vsel %vm5027_vm8, %v4946_v0, %v826_v59  ;;  %v803_v0 = vand.u32 2147483648, %v4884_v39  ;;  %v791_v43 = vmul.f32 %v4672_v8, %v790_v25  ;;  %vm799_vm13 = vmor %vm797_vm12, %vm798_vm11 }
 0x2ef   : > { %v5008_v2 = vpop.eup %4090  ;;  %v835_v48 = vsel %vm832_vm10, %v834_v1, %v830_v17  ;;  %v801_v22 = vand.u32 2147483647, %v4884_v39  ;;  %4094 = vpow2.f32 %v1754_v42  ;;  %v800_v59 = vsel %vm799_vm13, %v4963_v52, %v796_v60 }
 0x2f0   : > { %v1282_v32 = vsel %vm514_vm3, %v5008_v2, 0.0  ;;  %3766 = vmatmul.msk.f32.gmra.mxu3 %vm514_vm3, %v610_v30  ;;  %3769 = vmatmul.msk.f32.vlgmr.msrb.gmra.mxu0 %vm514_vm3, %v821_v45  ;;  %v5044_v16 = vpop.eup %4092  ;;  %v836_v15 = vmul.f32 %v4696_v49, %v835_v48  ;;  %v804_v8 = vor.u32 1.1754944e-38, %v803_v0  ;;  %v1523_v5 = vsub.f32 %v4819_v26, %v4999_v63 }
 0x2f1   : > { %1283 = vadd.xlane.f32.xlu1 %v1282_v32  ;;  %v1033_v13 = vsel %vm514_vm3, %v5044_v16, 0.0  ;;  %vm802_vm14 = vcmp.eq.f32.partialorder %v801_v22, 8.507059e+37  ;;  %v1266_v32 = vpop.xlane.xlu0 %1265  ;;  %vm1041_vm10 = vweird.f32 %v4899_v20 }
 0x2f2   : > { %1286 = vadd.xlane.f32.xlu0 %v1285_v38  ;;  %v805_v58 = vsel %vm802_vm14, %v804_v8, %v800_v59  ;;  %v1528_v50 = vmul.f32 1.442695, %v1523_v5  ;;  %v1270_v60 = vsub.f32 %v4762_v27, %v1266_v32 }
 0x2f3   : > { %v806_v39 = vmul.f32 %v4693_v62, %v805_v58 }
 0x2f4   : > { %v1518_v33 = vpop.xlane.xlu2 %1517  ;;  %v1277_v22 = vmul.f32 1.442695, %v1270_v60 }
 0x2f5   : > { %v1524_v47 = vsub.f32 %v4828_v4, %v1518_v33  ;;  %v5057_v12 = vpop.eup %4094 }
 0x2f6   : > { %v1763_v4 = vsel %vm514_vm3, %v5057_v12, 0.0 }
 0x2f7   : > { %v1530_v49 = vmul.f32 1.442695, %v1524_v47 }
 0x2f8   : > { %3767 = vmatmul.msk.f32.vlgmr.msra.gmra.mxu3 %vm514_vm3, %v791_v43  ;;  %3770 = vmatmul.msk.f32.gmra.mxu0 %vm514_vm3, %v836_v15 }
 0x2f9   : > { %4096 = vpow2.f32 %v1530_v49  ;;  %v2250_v11 = vpop.xlane.xlu0 %2249 }
 0x2fa   : > { %1034 = vadd.xlane.f32.xlu0 %v1033_v13 }
 0x2fc   : > { %v1996_v14 = vpop.xlane.xlu2 %1995 }
 0x2ff   : > { %v5064_v52 = vpop.eup %4096 }
 0x300   : > { %3768 = vmatmul.msk.f32.gmra.mxu3 %vm514_vm3, %v806_v39  ;;  %v1540_v30 = vsel %vm514_vm3, %v5064_v52, 0.0 }
 0x301   : > { %v5095_v25 = vpop.xlane.xlu0 %1520 }
 0x302   : > { %1764 = vadd.xlane.f32.xlu0 %v1763_v4 }
 0x304   : > { %v1738_v28 = vpop.xlane.xlu1 %1737  ;;  %v2253_v48 = vpop.xlane.xlu2 %2252 }
 0x305   : > { %v1748_v54 = vsub.f32 %v4847_v46, %v1738_v28  ;;  %v5076_v46 = vpack.i.bf16 %v4452_v29, %v4457_v31  ;;  %v2006_v29 = vsub.f32 %v4838_v34, %v1996_v14 }
 0x307   : > { %v1752_v61 = vmul.f32 1.442695, %v1748_v54  ;;  %v2010_v38 = vmul.f32 1.442695, %v2006_v29 }
 0x309   : > { %4098 = vpow2.f32 %v1752_v61  ;;  %v1747_v43 = vpop.xlane.xlu0 %1746 }
 0x30a   : > { %1541 = vadd.xlane.f32.xlu0 %v1540_v30  ;;  %3933 = vrot.lane.b32.xlu1 %v4418_v18, %s4297_s26  ;;  %4100 = vpow2.f32 %v1528_v50  ;;  %v1751_v13 = vsub.f32 %v4812_v3, %v1747_v43 }
 0x30b   : > { %4102 = vpow2.f32 %v2010_v38 }
 0x30c   : > { %v1744_v17 = vpop.xlane.xlu1 %1743  ;;  %v1758_v27 = vmul.f32 1.442695, %v1751_v13 }
 0x30d   : > { %v1750_v26 = vsub.f32 %v4857_v35, %v1744_v17  ;;  %v2261_v35 = vsub.f32 %v4850_v44, %v2253_v48  ;;  %v2002_v44 = vpop.xlane.xlu2 %2001 }
 0x30e   : > { %v2008_v39 = vsub.f32 %v4860_v19, %v2002_v44 }
 0x30f   : > { %v5070_v62 = vpop.eup %4098  ;;  %v1756_v1 = vmul.f32 1.442695, %v1750_v26 }
 0x310   : > { %v1760_v45 = vsel %vm514_vm3, %v5070_v62, 0.0  ;;  %v5087_v53 = vpop.eup %4100  ;;  %v2014_v28 = vmul.f32 1.442695, %v2008_v39 }
 0x311   : > { %1761 = vadd.xlane.f32.xlu2 %v1760_v45  ;;  %v1537_v63 = vsel %vm514_vm3, %v5087_v53, 0.0  ;;  %v5093_v42 = vpop.eup %4102  ;;  %4104 = vpow2.f32 %v1756_v1 }
 0x312   : > { %v2018_v33 = vsel %vm514_vm3, %v5093_v42, 0.0 }
 0x314   : > { %v1999_v61 = vpop.xlane.xlu1 %1998 }
 0x317   : > { %v5101_v0 = vpop.eup %4104 }
 0x318   : > { %v1766_v47 = vsel %vm514_vm3, %v5101_v0, 0.0 }
 0x31c   : > { %v1281_v32 = vpop.xlane.xlu1 %1280 }
 0x31d   : > { %vm1296_vm2 = vweird.f32 %v1281_v32  ;;  %v1300_v13 = vand.u32 2147483647, %v1281_v32 }
 0x31e   : > { %3943 = vrot.lane.b32.xlu0 %v5076_v46, %s4298_s28 }
 0x31f   : > { %vm1301_vm5 = vcmp.eq.f32.partialorder %v1300_v13, 8.507059e+37 }
 0x322   : > { %v634_v36 = vpop.f32.mrf.mxu3 }
 0x323   : > { %669 = vst.msk [vmem:[#allocation2] sm:$0xff] %vm332_vm0, %v634_v36 }
 0x329   : > { %3938 = vrot.lane.b32.xlu2 %v4418_v18, %s4298_s28  ;;  %v2260_v18 = vsub.f32 %v4776_v9, %v2250_v11  ;;  %v2266_v9 = vmul.f32 1.442695, %v2261_v35  ;;  %v2007_v35 = vsub.f32 %v4868_v41, %v1999_v61 }
 0x32b   : > { %v2264_v34 = vmul.f32 1.442695, %v2260_v18  ;;  %v5127_v19 = vpop.f32.mrf.mxu1 }
 0x32d   : > { %v637_v31 = vpop.f32.mrf.mxu3  ;;  %4106 = vpow2.f32 %v2264_v34 }
 0x32e   : > { %670 = vst.msk [vmem:[#allocation2 + $0x10] sm:$0xff] %vm332_vm0, %v637_v31  ;;  %4108 = vpow2.f32 %v2266_v9 }
 0x32f   : > { %4110 = vpow2.f32 %v1277_v22  ;;  %v1302_v22 = vand.u32 2147483648, %v1281_v32 }
 0x330   : > { %4112 = vpow2.f32 %v1758_v27 }
 0x331   : > { %4114 = vpow2.f32 %v2014_v28 }
 0x332   : > { %4116 = vrcp.f32 %v1281_v32 }
 0x333   : > { %v5103_v15 = vpop.eup %4106  ;;  %v5137_v14 = vpop.f32.mrf.mxu1 }
 0x334   : > { %1538 = vadd.xlane.f32.xlu1 %v1537_v63  ;;  %v2272_v59 = vsel %vm514_vm3, %v5103_v15, 0.0  ;;  %v5110_v8 = vpop.eup %4108  ;;  %v5145_v17 = vpack.i.bf16 %v5127_v19, %v5137_v14 }
 0x335   : > { %v5114_v58 = vpop.eup %4110  ;;  %v2275_v3 = vsel %vm514_vm3, %v5110_v8, 0.0 }
 0x336   : > { %v1288_v4 = vsel %vm514_vm3, %v5114_v58, 0.0  ;;  %v5121_v54 = vpop.eup %4112 }
 0x337   : > { %v1769_v45 = vsel %vm514_vm3, %v5121_v54, 0.0  ;;  %v5129_v36 = vpop.eup %4114 }
 0x338   : > { %v2024_v50 = vsel %vm514_vm3, %v5129_v36, 0.0  ;;  %v4117_v38 = vpop.eup %4116 }
 0x339   : > { %vm1297_vm15 = vweird.f32 %v4117_v38 }
 0x33a   : > { %vm1298_vm4 = vmor %vm1296_vm2, %vm1297_vm15  ;;  %vm1071_vm15 = vweird.f32 %v4913_v37 }
 0x33c   : > { %2019 = vadd.xlane.f32.xlu1 %v2018_v33 }
 0x343   : > { %v5112_v49 = vpop.xlane.xlu0 %2255 }
 0x344   : > { %1767 = vadd.xlane.f32.xlu1 %v1766_v47  ;;  %v2012_v47 = vmul.f32 1.442695, %v2007_v35 }
 0x348   : > { %2273 = vadd.xlane.f32.xlu0 %v2272_v59 }
 0x34c   : > { %v5173_v28 = vpop.xlane.xlu2 %2004 }
 0x350   : > { %2276 = vadd.xlane.f32.xlu0 %v2275_v3 }
 0x352   : > { %1289 = vadd.xlane.f32.xlu2 %v1288_v4  ;;  %v1303_v4 = vor.u32 1.1754944e-38, %v1302_v22 }
 0x355   : > { %v5123_v30 = vpop.xlane.xlu0 %2258 }
 0x358   : > { %1770 = vadd.xlane.f32.xlu0 %v1769_v45 }
 0x35d   : > { %v5131_v5 = vpop.xlane.xlu0 %1535  ;;  %3953 = vrot.lane.b32.xlu1 %v5076_v46, %s4297_s26  ;;  %v1292_v46 = vmul.f32 %v4117_v38, %v1281_v32 }
 0x35f   : > { %v1293_v26 = vsub.f32 1.0, %v1292_v46 }
 0x360   : > { %2025 = vadd.xlane.f32.xlu0 %v2024_v50 }
 0x361   : > { %v1294_v34 = vmul.f32 %v4117_v38, %v1293_v26 }
 0x363   : > { %v1295_v9 = vadd.f32 %v4117_v38, %v1294_v34 }
 0x364   : > { %v5141_v31 = vpop.xlane.xlu1 %1283 }
 0x365   : > { %v5139_v29 = vpop.xlane.xlu0 %1286  ;;  %4118 = vrcp.f32 %v5141_v31  ;;  %v1299_v44 = vsel %vm1298_vm4, %v4117_v38, %v1295_v9  ;;  %v1317_v34 = vand.u32 2147483648, %v5141_v31  ;;  %vm1311_vm7 = vweird.f32 %v5141_v31 }
 0x366   : > { %4120 = vrcp.f32 %v4899_v20  ;;  %v1304_v50 = vsel %vm1301_vm5, %v1303_v4, %v1299_v44  ;;  %vm1056_vm5 = vweird.f32 %v4894_v55 }
 0x367   : > { %4122 = vrcp.f32 %v4913_v37  ;;  %v1305_v35 = vmul.f32 %v4876_v7, %v1304_v50 }
 0x368   : > { %4124 = vrcp.f32 %v4894_v55 }
 0x369   : > { %4126 = vpow2.f32 %v2012_v47 }
 0x36a   : > { %3948 = vrot.lane.b32.xlu2 %v5145_v17, %s4290_s29 }
 0x36b   : > { %v663_v11 = vpop.f32.mrf.mxu3  ;;  %v5154_v18 = vpop.eup %4118 }
 0x36c   : > { %671 = vst.msk [vmem:[#allocation2 + $0x20] sm:$0xff] %vm332_vm0, %v663_v11  ;;  %v5156_v1 = vpop.eup %4120  ;;  %v1307_v48 = vmul.f32 %v5154_v18, %v5141_v31  ;;  %vm1312_vm6 = vweird.f32 %v5154_v18 }
 0x36d   : > { %v5152_v63 = vpop.xlane.xlu0 %1034  ;;  %v1037_v60 = vmul.f32 %v5156_v1, %v4899_v20  ;;  %v5170_v27 = vpop.eup %4122  ;;  %vm5193_vm8 = vmor %vm1311_vm7, %vm1312_vm6  ;;  %vm1042_vm9 = vweird.f32 %v5156_v1 }
 0x36e   : > { %v1308_v43 = vsub.f32 1.0, %v1307_v48  ;;  %v905_v3 = vpop.f32.mrf.mxu0  ;;  %v5176_v61 = vpop.eup %4124  ;;  %v1067_v32 = vmul.f32 %v5170_v27, %v4913_v37  ;;  %4128 = vrcp.f32 %v5152_v63  ;;  %vm5218_vm12 = vmor %vm1041_vm10, %vm1042_vm9  ;;  %vm1072_vm13 = vweird.f32 %v5170_v27 }
 0x36f   : > { %v1038_v41 = vsub.f32 1.0, %v1037_v60  ;;  %v1052_v26 = vmul.f32 %v5176_v61, %v4894_v55  ;;  %4130 = vrcp.f32 %v5131_v5  ;;  %v1315_v60 = vand.u32 2147483647, %v5141_v31  ;;  %v5197_v22 = vpop.eup %4126  ;;  %vm5242_vm2 = vmor %vm1071_vm15, %vm1072_vm13 }
 0x370   : > { %v1309_v39 = vmul.f32 %v5154_v18, %v1308_v43  ;;  %v1068_v9 = vsub.f32 1.0, %v1067_v32  ;;  %vm1057_vm4 = vweird.f32 %v5176_v61  ;;  %vm1551_vm13 = vweird.f32 %v5131_v5 }
 0x371   : > { %v1039_v46 = vmul.f32 %v5156_v1, %v1038_v41  ;;  %v1053_v44 = vsub.f32 1.0, %v1052_v26  ;;  %vm1316_vm11 = vcmp.eq.f32.partialorder %v1315_v60, 8.507059e+37  ;;  %vm5262_vm7 = vmor %vm1056_vm5, %vm1057_vm4 }
 0x372   : > { %v1310_v11 = vadd.f32 %v5154_v18, %v1309_v39  ;;  %v1069_v4 = vmul.f32 %v5170_v27, %v1068_v9 }
 0x373   : > { %v666_v33 = vpop.f32.mrf.mxu3  ;;  %v1040_v41 = vadd.f32 %v5156_v1, %v1039_v46  ;;  %v1045_v46 = vand.u32 2147483647, %v4899_v20 }
 0x374   : > { %3958 = vrot.lane.b32.xlu0 %v5145_v17, %s4297_s26  ;;  %672 = vst.msk [vmem:[#allocation2 + $0x30] sm:$0xff] %vm332_vm0, %v666_v33  ;;  %v1525_v33 = vsub.f32 %v4788_v40, %v5095_v25  ;;  %v1314_v40 = vsel %vm5193_vm8, %v5154_v18, %v1310_v11  ;;  %v5205_v7 = vpop.eup %4128  ;;  %v1318_v25 = vor.u32 1.1754944e-38, %v1317_v34  ;;  %v1047_v18 = vand.u32 2147483648, %v4899_v20 }
 0x375   : > { %v5168_v59 = vpop.xlane.xlu0 %1764  ;;  %v1082_v50 = vmul.f32 %v5205_v7, %v5152_v63  ;;  %v1044_v11 = vsel %vm5218_vm12, %v5156_v1, %v1040_v41  ;;  %v1070_v20 = vadd.f32 %v5170_v27, %v1069_v4  ;;  %vm1046_vm14 = vcmp.eq.f32.partialorder %v1045_v46, 8.507059e+37  ;;  %v5246_v41 = vpop.f32.mrf.mxu1 }
 0x376   : > { %v1532_v39 = vmul.f32 1.442695, %v1525_v33  ;;  %v1048_v33 = vor.u32 1.1754944e-38, %v1047_v18  ;;  %vm1087_vm9 = vweird.f32 %v5205_v7 }
 0x377   : > { %v1083_v60 = vsub.f32 1.0, %v1082_v50  ;;  %v1074_v18 = vsel %vm5242_vm2, %v5170_v27, %v1070_v20 }
 0x378   : > { %v1049_v43 = vsel %vm1046_vm14, %v1048_v33, %v1044_v11 }
 0x379   : > { %v1050_v11 = vmul.f32 %v4676_v23, %v1049_v43 }
 0x37b   : > { %v868_v47 = vpop.f32.mrf.mxu3 }
 0x37c   : > { %919 = vrot.lane.b32.xlu0 %v905_v3, %s4297_s26  ;;  %v3934_v45 = vpop.permute.xlu1 %3933  ;;  %v5213_v3 = vpop.eup %4130 }
 0x37d   : > { %v3935_v38 = vunpack.i.l.bf16 %v3934_v45  ;;  %v3936_v48 = vunpack.i.h.bf16 %v3934_v45  ;;  %v5199_v13 = vpop.xlane.xlu0 %1541  ;;  %v1319_v45 = vsel %vm1316_vm11, %v1318_v25, %v1314_v40  ;;  %v1547_v26 = vmul.f32 %v5213_v3, %v5131_v5 }
 0x37e   : > { %4132 = vrcp.f32 %v5199_v13  ;;  %v1320_v34 = vmul.f32 %v5008_v2, %v1319_v45  ;;  %v1075_v2 = vand.u32 2147483647, %v4913_v37  ;;  %v1084_v45 = vmul.f32 %v5205_v7, %v1083_v60 }
 0x37f   : > { %1377 = vmatpush.msrb.mxu3 %v3935_v38  ;;  %v2021_v38 = vsel %vm514_vm3, %v5197_v22, 0.0  ;;  %4134 = vpow2.f32 %v1532_v39  ;;  %v1548_v40 = vsub.f32 1.0, %v1547_v26  ;;  %v1092_v60 = vand.u32 2147483648, %v5152_v63 }
 0x380   : > { %vm1076_vm6 = vcmp.eq.f32.partialorder %v1075_v2, 8.507059e+37  ;;  %v1085_v20 = vadd.f32 %v5205_v7, %v1084_v45  ;;  %vm1552_vm10 = vweird.f32 %v5213_v3  ;;  %vm1086_vm11 = vweird.f32 %v5152_v63 }
 0x381   : > { %1378 = vmatpush.msrb.mxu3 %v3936_v48  ;;  %v1054_v48 = vmul.f32 %v5176_v61, %v1053_v44  ;;  %v1549_v26 = vmul.f32 %v5213_v3, %v1548_v40  ;;  %vm5284_vm12 = vmor %vm1086_vm11, %vm1087_vm9  ;;  %vm1581_vm5 = vweird.f32 %v5199_v13  ;;  %v2263_v40 = vsub.f32 %v4952_v57, %v5123_v30 }
 0x382   : > { %3775 = vmatmul.msk.f32.vlgmr.msrb.gmra.mxu3 %vm514_vm3, %v1305_v35  ;;  %v1077_v35 = vand.u32 2147483648, %v4913_v37  ;;  %v1062_v37 = vand.u32 2147483648, %v4894_v55  ;;  %vm1553_vm14 = vmor %vm1551_vm13, %vm1552_vm10  ;;  %v2009_v57 = vsub.f32 %v4934_v21, %v5173_v28  ;;  %v1330_v21 = vand.u32 2147483647, %v5139_v29 }
 0x383   : > { %v1055_v44 = vadd.f32 %v5176_v61, %v1054_v48  ;;  %v1550_v2 = vadd.f32 %v5213_v3, %v1549_v26 }
 0x384   : > { %v5208_v31 = vpop.xlane.xlu2 %1761  ;;  %915 = vrot.lane.b32.xlu0 %v868_v47, %s4297_s26  ;;  %v5238_v1 = vpop.eup %4132  ;;  %v1078_v39 = vor.u32 1.1754944e-38, %v1077_v35  ;;  %v1063_v23 = vor.u32 1.1754944e-38, %v1062_v37  ;;  %v1557_v47 = vand.u32 2147483648, %v5131_v5 }
 0x385   : > { %v5255_v4 = vpop.eup %4134  ;;  %v1577_v32 = vmul.f32 %v5238_v1, %v5199_v13  ;;  %v1059_v33 = vsel %vm5262_vm7, %v5176_v61, %v1055_v44  ;;  %v400_v44 = vpop.f32.mrf.mxu1  ;;  %vm1582_vm4 = vweird.f32 %v5238_v1  ;;  %v1781_v28 = vand.u32 2147483647, %v5208_v31 }
 0x386   : > { %v1079_v48 = vsel %vm1076_vm6, %v1078_v39, %v1074_v18  ;;  %v1554_v18 = vsel %vm1553_vm14, %v5213_v3, %v1550_v2  ;;  %v1558_v37 = vor.u32 1.1754944e-38, %v1557_v47  ;;  %v1585_v3 = vand.u32 2147483647, %v5199_v13  ;;  %vm1583_vm6 = vmor %vm1581_vm5, %vm1582_vm4 }
 0x387   : > { %2022 = vadd.xlane.f32.xlu1 %v2021_v38  ;;  %v1060_v38 = vand.u32 2147483647, %v4894_v55  ;;  %v1543_v55 = vsel %vm514_vm3, %v5255_v4, 0.0  ;;  %v1578_v35 = vsub.f32 1.0, %v1577_v32  ;;  %v1080_v61 = vmul.f32 %v4715_v10, %v1079_v48 }
 0x388   : > { %v1555_v10 = vand.u32 2147483647, %v5131_v5  ;;  %vm1586_vm7 = vcmp.eq.f32.partialorder %v1585_v3, 8.507059e+37  ;;  %vm1326_vm14 = vweird.f32 %v5139_v29  ;;  %vm1331_vm5 = vcmp.eq.f32.partialorder %v1330_v21, 8.507059e+37 }
 0x389   : > { %vm1061_vm8 = vcmp.eq.f32.partialorder %v1060_v38, 8.507059e+37  ;;  %v5308_v38 = vpack.i.bf16 %v5246_v41, %v400_v44 }
 0x38a   : > { %3776 = vmatmul.msk.f32.gmra.mxu3 %vm514_vm3, %v1320_v34  ;;  %v1064_v43 = vsel %vm1061_vm8, %v1063_v23, %v1059_v33  ;;  %vm1556_vm2 = vcmp.eq.f32.partialorder %v1555_v10, 8.507059e+37 }
 0x38b   : > { %v1065_v39 = vmul.f32 %v4710_v6, %v1064_v43  ;;  %v1559_v32 = vsel %vm1556_vm2, %v1558_v37, %v1554_v18  ;;  %v1587_v6 = vand.u32 2147483648, %v5199_v13  ;;  %v871_v13 = vpop.f32.mrf.mxu3  ;;  %vm1777_vm2 = vweird.f32 %v5208_v31 }
 0x38c   : > { %v3939_v9 = vpop.permute.xlu2 %3938 }
 0x38d   : > { %v3940_v25 = vunpack.i.l.bf16 %v3939_v9  ;;  %v3941_v50 = vunpack.i.h.bf16 %v3939_v9  ;;  %v1588_v27 = vor.u32 1.1754944e-38, %v1587_v6  ;;  %v1783_v6 = vand.u32 2147483648, %v5208_v31 }
 0x38f   : > { %1122 = vmatpush.msrb.mxu1 %v3940_v25  ;;  %v1579_v25 = vmul.f32 %v5238_v1, %v1578_v35 }
 0x390   : > { %v3944_v46 = vpop.permute.xlu0 %3943 }
 0x391   : > { %1123 = vmatpush.msrb.mxu1 %v3941_v50  ;;  %v3945_v34 = vunpack.i.l.bf16 %v3944_v46  ;;  %v3946_v9 = vunpack.i.h.bf16 %v3944_v46  ;;  %v1580_v45 = vadd.f32 %v5238_v1, %v1579_v25 }
 0x392   : > { %3771 = vmatmul.msk.f32.vlgmr.msrb.gmra.mxu1 %vm514_vm3, %v1050_v11 }
 0x393   : > { %1626 = vmatpush.msra.mxu1 %v5137_v14  ;;  %1544 = vadd.xlane.f32.xlu2 %v1543_v55  ;;  %v1090_v14 = vand.u32 2147483647, %v5152_v63  ;;  %v1093_v63 = vor.u32 1.1754944e-38, %v1092_v60  ;;  %v1584_v46 = vsel %vm1583_vm6, %v5238_v1, %v1580_v45  ;;  %vm1782_vm6 = vcmp.eq.f32.partialorder %v1781_v28, 8.507059e+37 }
 0x394   : > { %1157 = vmatpush.msrb.mxu2 %v3945_v34 }
 0x395   : > { %1627 = vmatpush.msra.mxu1 %v5127_v19  ;;  %v1089_v19 = vsel %vm5284_vm12, %v5205_v7, %v1085_v20  ;;  %vm1091_vm15 = vcmp.eq.f32.partialorder %v1090_v14, 8.507059e+37  ;;  %v2262_v7 = vsub.f32 %v4920_v56, %v5112_v49  ;;  %v1560_v56 = vmul.f32 %v4969_v51, %v1559_v32 }
 0x396   : > { %1158 = vmatpush.msrb.mxu2 %v3946_v9  ;;  %v1094_v5 = vsel %vm1091_vm15, %v1093_v63, %v1089_v19  ;;  %v1589_v49 = vsel %vm1586_vm7, %v1588_v27, %v1584_v46  ;;  %v1332_v32 = vand.u32 2147483648, %v5139_v29  ;;  %v2016_v46 = vmul.f32 1.442695, %v2009_v57 }
 0x397   : > { %3773 = vmatmul.msk.f32.vlgmr.msrb.gmra.mxu2 %vm514_vm3, %v1080_v61  ;;  %v1095_v50 = vmul.f32 %v5044_v16, %v1094_v5  ;;  %v2268_v11 = vmul.f32 1.442695, %v2262_v7  ;;  %v1590_v16 = vmul.f32 %v5064_v52, %v1589_v49  ;;  %v908_v52 = vpop.f32.mrf.mxu0 }
 0x398   : > { %1655 = vmatpush.msra.mxu2 %v400_v44 }
 0x399   : > { %4136 = vpow2.f32 %v2268_v11 }
 0x39a   : > { %3772 = vmatmul.msk.f32.gmra.mxu1 %vm514_vm3, %v1065_v39  ;;  %1656 = vmatpush.msra.mxu2 %v5246_v41 }
 0x39f   : > { %3774 = vmatmul.msk.f32.gmra.mxu2 %vm514_vm3, %v1095_v50  ;;  %v5319_v41 = vpop.eup %4136 }
 0x3a0   : > { %3968 = vrot.lane.b32.xlu1 %v5308_v38, %s4290_s29  ;;  %v2278_v51 = vsel %vm514_vm3, %v5319_v41, 0.0 }
 0x3a2   : > { %3779 = vmatmul.msk.f32.vlgmr.msra.gmra.mxu1 %vm514_vm3, %v1560_v56 }
 0x3a7   : > { %3781 = vmatmul.msk.f32.vlgmr.msra.gmra.mxu2 %vm514_vm3, %v1590_v16  ;;  %v1539_v1 = vpop.xlane.xlu1 %1538 }
 0x3a8   : > { %4138 = vrcp.f32 %v1539_v1  ;;  %917 = vrot.lane.b32.xlu1 %v871_v13, %s4297_s26  ;;  %v1572_v55 = vand.u32 2147483648, %v1539_v1  ;;  %v1570_v23 = vand.u32 2147483647, %v1539_v1  ;;  %vm1566_vm9 = vweird.f32 %v1539_v1 }
 0x3a9   : > { %4140 = vrcp.f32 %v5139_v29  ;;  %v1784_v13 = vor.u32 1.1754944e-38, %v1783_v6 }
 0x3aa   : > { %4142 = vrcp.f32 %v5208_v31  ;;  %v1573_v20 = vor.u32 1.1754944e-38, %v1572_v55  ;;  %vm1571_vm11 = vcmp.eq.f32.partialorder %v1570_v23, 8.507059e+37 }
 0x3ab   : > { %3963 = vrot.lane.b32.xlu2 %v5145_v17, %s4298_s28  ;;  %4144 = vrcp.f32 %v5168_v59 }
 0x3ae   : > { %2279 = vadd.xlane.f32.xlu0 %v2278_v51  ;;  %v4139_v26 = vpop.eup %4138 }
 0x3af   : > { %v1562_v34 = vmul.f32 %v4139_v26, %v1539_v1  ;;  %vm1567_vm8 = vweird.f32 %v4139_v26  ;;  %v4141_v35 = vpop.eup %4140  ;;  %v5333_v47 = vpop.xlane.xlu1 %2019 }
 0x3b0   : > { %vm1568_vm10 = vmor %vm1566_vm9, %vm1567_vm8  ;;  %v4143_v9 = vpop.eup %4142  ;;  %v1322_v2 = vmul.f32 %v4141_v35, %v5139_v29  ;;  %vm1327_vm12 = vweird.f32 %v4141_v35  ;;  %vm1792_vm8 = vweird.f32 %v5168_v59 }
 0x3b1   : > { %v1563_v48 = vsub.f32 1.0, %v1562_v34  ;;  %v1773_v14 = vmul.f32 %v4143_v9, %v5208_v31  ;;  %v5339_v19 = vpop.eup %4144  ;;  %vm1778_vm13 = vweird.f32 %v4143_v9  ;;  %vm5355_vm15 = vmor %vm1326_vm14, %vm1327_vm12  ;;  %v1333_v31 = vor.u32 1.1754944e-38, %v1332_v32 }
 0x3b2   : > { %v1323_v10 = vsub.f32 1.0, %v1322_v2  ;;  %v1788_v39 = vmul.f32 %v5339_v19, %v5168_v59  ;;  %vm5364_vm4 = vmor %vm1777_vm2, %vm1778_vm13  ;;  %vm1793_vm7 = vweird.f32 %v5339_v19  ;;  %v1796_v2 = vand.u32 2147483647, %v5168_v59 }
 0x3b3   : > { %921 = vrot.lane.b32.xlu2 %v908_v52, %s4297_s26  ;;  %v1564_v33 = vmul.f32 %v4139_v26, %v1563_v48  ;;  %v1774_v25 = vsub.f32 1.0, %v1773_v14 }
 0x3b4   : > { %v1324_v63 = vmul.f32 %v4141_v35, %v1323_v10  ;;  %v1789_v5 = vsub.f32 1.0, %v1788_v39  ;;  %vm1797_vm13 = vcmp.eq.f32.partialorder %v1796_v2, 8.507059e+37  ;;  %v2041_v10 = vand.u32 2147483648, %v5333_v47 }
 0x3b5   : > { %v1565_v17 = vadd.f32 %v4139_v26, %v1564_v33  ;;  %v1775_v18 = vmul.f32 %v4143_v9, %v1774_v25 }
 0x3b6   : > { %v1325_v30 = vadd.f32 %v4141_v35, %v1324_v63  ;;  %v1790_v49 = vmul.f32 %v5339_v19, %v1789_v5 }
 0x3b7   : > { %v1569_v60 = vsel %vm1568_vm10, %v4139_v26, %v1565_v17  ;;  %v1776_v45 = vadd.f32 %v4143_v9, %v1775_v18  ;;  %v5350_v7 = vpop.xlane.xlu1 %1767  ;;  %vm5390_vm10 = vmor %vm1792_vm8, %vm1793_vm7 }
 0x3b8   : > { %v1574_v61 = vsel %vm1571_vm11, %v1573_v20, %v1569_v60  ;;  %v1329_v56 = vsel %vm5355_vm15, %v4141_v35, %v1325_v30  ;;  %v1791_v17 = vadd.f32 %v5339_v19, %v1790_v49  ;;  %v1798_v20 = vand.u32 2147483648, %v5168_v59 }
 0x3b9   : > { %v1575_v43 = vmul.f32 %v5087_v53, %v1574_v61  ;;  %v2270_v53 = vmul.f32 1.442695, %v2263_v40  ;;  %v1780_v29 = vsel %vm5364_vm4, %v4143_v9, %v1776_v45  ;;  %v1334_v34 = vsel %vm1331_vm5, %v1333_v31, %v1329_v56 }
 0x3ba   : > { %v1785_v52 = vsel %vm1782_vm6, %v1784_v13, %v1780_v29  ;;  %v1795_v59 = vsel %vm5390_vm10, %v5339_v19, %v1791_v17  ;;  %v1799_v39 = vor.u32 1.1754944e-38, %v1798_v20 }
 0x3bb   : > { %3780 = vmatmul.msk.f32.gmra.mxu1 %vm514_vm3, %v1575_v43  ;;  %v5337_v44 = vpop.xlane.xlu0 %2273  ;;  %v1786_v61 = vmul.f32 %v5070_v62, %v1785_v52  ;;  %v1335_v43 = vmul.f32 %v5003_v24, %v1334_v34 }
 0x3bc   : > { %v1800_v30 = vsel %vm1797_vm13, %v1799_v39, %v1795_v59  ;;  %vm2289_vm2 = vweird.f32 %v5337_v44  ;;  %v2039_v59 = vand.u32 2147483647, %v5333_v47 }
 0x3bd   : > { %v1801_v19 = vmul.f32 %v5057_v12, %v1800_v30  ;;  %v2295_v12 = vand.u32 2147483648, %v5337_v44  ;;  %v1813_v30 = vand.u32 2147483648, %v5350_v7 }
 0x3bf   : > { %v2296_v29 = vor.u32 1.1754944e-38, %v2295_v12 }
 0x3c2   : > { %3973 = vrot.lane.b32.xlu0 %v5308_v38, %s4298_s28 }
 0x3c3   : > { %v5362_v50 = vpop.xlane.xlu0 %2276 }
 0x3c4   : > { %vm2304_vm7 = vweird.f32 %v5362_v50 }
 0x3c5   : > { %v5345_v37 = vpop.xlane.xlu2 %1289 }
 0x3c6   : > { %4146 = vrcp.f32 %v5345_v37  ;;  %v1347_v14 = vand.u32 2147483648, %v5345_v37  ;;  %vm1341_vm11 = vweird.f32 %v5345_v37 }
 0x3c7   : > { %4148 = vpow2.f32 %v2270_v53  ;;  %v1345_v53 = vand.u32 2147483647, %v5345_v37 }
 0x3c8   : > { %4150 = vrcp.f32 %v5337_v44  ;;  %v1348_v57 = vor.u32 1.1754944e-38, %v1347_v14 }
 0x3c9   : > { %4152 = vpow2.f32 %v2016_v46  ;;  %vm1346_vm14 = vcmp.eq.f32.partialorder %v1345_v53, 8.507059e+37 }
 0x3ca   : > { %4154 = vrcp.f32 %v5362_v50 }
 0x3cb   : > { %v5396_v24 = vpop.xlane.xlu0 %1770  ;;  %4156 = vrcp.f32 %v5333_v47 }
 0x3cc   : > { %v4147_v27 = vpop.eup %4146  ;;  %4158 = vrcp.f32 %v5350_v7 }
 0x3cd   : > { %v5374_v16 = vpop.eup %4148  ;;  %v1337_v1 = vmul.f32 %v4147_v27, %v5345_v37  ;;  %v3949_v51 = vpop.permute.xlu2 %3948  ;;  %vm1342_vm9 = vweird.f32 %v4147_v27 }
 0x3ce   : > { %v3950_v26 = vunpack.i.l.bf16 %v3949_v51  ;;  %v3951_v33 = vunpack.i.h.bf16 %v3949_v51  ;;  %v2281_v23 = vsel %vm514_vm3, %v5374_v16, 0.0  ;;  %v4151_v35 = vpop.eup %4150  ;;  %vm1343_vm12 = vmor %vm1341_vm11, %vm1342_vm9  ;;  %v2310_v51 = vand.u32 2147483648, %v5362_v50 }
 0x3cf   : > { %v1338_v48 = vsub.f32 1.0, %v1337_v1  ;;  %v3954_v55 = vpop.permute.xlu1 %3953  ;;  %v2285_v62 = vmul.f32 %v4151_v35, %v5337_v44  ;;  %v5403_v63 = vpop.eup %4152  ;;  %vm2290_vm15 = vweird.f32 %v4151_v35  ;;  %vm927_vm9 = vcmask 523520  }
 0x3d0   : > { %1860 = vmatpush.msra.mxu3 %v3950_v26  ;;  %v3955_v9 = vunpack.i.l.bf16 %v3954_v55  ;;  %v3956_v40 = vunpack.i.h.bf16 %v3954_v55  ;;  %v4155_v45 = vpop.eup %4154  ;;  %v2027_v37 = vsel %vm514_vm3, %v5403_v63, 0.0  ;;  %vm2291_vm4 = vmor %vm2289_vm2, %vm2290_vm15  ;;  %vm1807_vm15 = vweird.f32 %v5350_v7 }
 0x3d1   : > { %v1339_v60 = vmul.f32 %v4147_v27, %v1338_v48  ;;  %v2286_v5 = vsub.f32 1.0, %v2285_v62  ;;  %v2300_v3 = vmul.f32 %v4155_v45, %v5362_v50  ;;  %vm2305_vm6 = vweird.f32 %v4155_v45 }
 0x3d2   : > { %1861 = vmatpush.msra.mxu3 %v3951_v33  ;;  %1412 = vmatpush.msra.mxu0 %v3955_v9  ;;  %vm2306_vm8 = vmor %vm2304_vm7, %vm2305_vm6  ;;  %v2311_v48 = vor.u32 1.1754944e-38, %v2310_v51  ;;  %vm2040_vm2 = vcmp.eq.f32.partialorder %v2039_v59, 8.507059e+37 }
 0x3d3   : > { %2282 = vadd.xlane.f32.xlu1 %v2281_v23  ;;  %v1340_v25 = vadd.f32 %v4147_v27, %v1339_v60  ;;  %3783 = vmatmul.msk.f32.vlgmr.msra.gmra.mxu3 %vm514_vm3, %v1786_v61  ;;  %v2287_v6 = vmul.f32 %v4151_v35, %v2286_v5  ;;  %v5413_v28 = vpop.xlane.xlu0 %2025  ;;  %v2301_v11 = vsub.f32 1.0, %v2300_v3  ;;  %v2042_v5 = vor.u32 1.1754944e-38, %v2041_v10 }
 0x3d4   : > { %1413 = vmatpush.msra.mxu0 %v3956_v40  ;;  %v1814_v3 = vor.u32 1.1754944e-38, %v1813_v30  ;;  %v2071_v30 = vand.u32 2147483648, %v5413_v28 }
 0x3d5   : > { %3777 = vmatmul.msk.f32.vlgmr.msra.gmra.mxu0 %vm514_vm3, %v1335_v43  ;;  %v1344_v18 = vsel %vm1343_vm12, %v4147_v27, %v1340_v25  ;;  %v2288_v46 = vadd.f32 %v4151_v35, %v2287_v6  ;;  %v2293_v27 = vand.u32 2147483647, %v5337_v44  ;;  %v2302_v49 = vmul.f32 %v4155_v45, %v2301_v11 }
 0x3d6   : > { %v1349_v32 = vsel %vm1346_vm14, %v1348_v57, %v1344_v18  ;;  %v2308_v44 = vand.u32 2147483647, %v5362_v50  ;;  %vm2035_vm12 = vweird.f32 %v5333_v47 }
 0x3d7   : > { %v1350_v21 = vmul.f32 %v5114_v58, %v1349_v32  ;;  %v2292_v56 = vsel %vm2291_vm4, %v4151_v35, %v2288_v46  ;;  %vm2294_vm5 = vcmp.eq.f32.partialorder %v2293_v27, 8.507059e+37  ;;  %v2303_v1 = vadd.f32 %v4155_v45, %v2302_v49 }
 0x3d8   : > { %v2297_v58 = vsel %vm2294_vm5, %v2296_v29, %v2292_v56  ;;  %vm2309_vm10 = vcmp.eq.f32.partialorder %v2308_v44, 8.507059e+37 }
 0x3d9   : > { %v2298_v34 = vmul.f32 %v5103_v15, %v2297_v58  ;;  %v2307_v52 = vsel %vm2306_vm8, %v4155_v45, %v2303_v1  ;;  %v4157_v15 = vpop.eup %4156  ;;  %v1811_v45 = vand.u32 2147483647, %v5350_v7 }
 0x3da   : > { %v2312_v55 = vsel %vm2309_vm10, %v2311_v48, %v2307_v52  ;;  %v4159_v17 = vpop.eup %4158  ;;  %v2031_v35 = vmul.f32 %v4157_v15, %v5333_v47  ;;  %vm2036_vm11 = vweird.f32 %v4157_v15 }
 0x3db   : > { %3784 = vmatmul.msk.f32.gmra.mxu3 %vm514_vm3, %v1801_v19  ;;  %v2313_v23 = vmul.f32 %v5110_v8, %v2312_v55  ;;  %v1803_v60 = vmul.f32 %v4159_v17, %v5350_v7  ;;  %vm2037_vm13 = vmor %vm2035_vm12, %vm2036_vm11  ;;  %vm1808_vm14 = vweird.f32 %v4159_v17  ;;  %vm1812_vm5 = vcmp.eq.f32.partialorder %v1811_v45, 8.507059e+37 }
 0x3dc   : > { %2028 = vadd.xlane.f32.xlu2 %v2027_v37  ;;  %v2032_v8 = vsub.f32 1.0, %v2031_v35  ;;  %vm1809_vm4 = vmor %vm1807_vm15, %vm1808_vm14  ;;  %v2072_v45 = vor.u32 1.1754944e-38, %v2071_v30 }
 0x3dd   : > { %3778 = vmatmul.msk.f32.gmra.mxu0 %vm514_vm3, %v1350_v21  ;;  %v1804_v9 = vsub.f32 1.0, %v1803_v60 }
 0x3df   : > { %v1805_v43 = vmul.f32 %v4159_v17, %v1804_v9  ;;  %v1826_v9 = vand.u32 2147483647, %v5396_v24 }
 0x3e1   : > { %v1806_v53 = vadd.f32 %v4159_v17, %v1805_v43 }
 0x3e3   : > { %v1810_v32 = vsel %vm1809_vm4, %v4159_v17, %v1806_v53 }
 0x3e4   : > { %v1815_v11 = vsel %vm1812_vm5, %v1814_v3, %v1810_v32  ;;  %vm1827_vm5 = vcmp.eq.f32.partialorder %v1826_v9, 8.507059e+37 }
 0x3e6   : > { %v3959_v31 = vpop.permute.xlu0 %3958 }
 0x3e7   : > { %v3960_v13 = vunpack.i.l.bf16 %v3959_v31  ;;  %v3961_v26 = vunpack.i.h.bf16 %v3959_v31 }
 0x3e9   : > { %2370 = vmatpush.msrb.mxu3 %v3960_v13 }
 0x3eb   : > { %2371 = vmatpush.msrb.mxu3 %v3961_v26 }
 0x3ec   : > { %3791 = vmatmul.msk.f32.vlgmr.msrb.gmra.mxu3 %vm514_vm3, %v2298_v34  ;;  %v1816_v34 = vmul.f32 %v5101_v0, %v1815_v11  ;;  %v1828_v0 = vand.u32 2147483648, %v5396_v24 }
 0x3ee   : > { %v920_v33 = vpop.permute.xlu0 %919  ;;  %v1829_v43 = vor.u32 1.1754944e-38, %v1828_v0 }
 0x3ef   : > { %930 = vst.msk [vmem:[#allocation2 + $0x20] sm:$0xff] %vm927_vm9, %v920_v33 }
 0x3f4   : > { %3978 = vrot.lane.b32.xlu2 %v5308_v38, %s4297_s26  ;;  %3792 = vmatmul.msk.f32.gmra.mxu3 %vm514_vm3, %v2313_v23  ;;  %v2033_v38 = vmul.f32 %v4157_v15, %v2032_v8 }
 0x3f6   : > { %v916_v50 = vpop.permute.xlu0 %915  ;;  %v2034_v40 = vadd.f32 %v4157_v15, %v2033_v38 }
 0x3f7   : > { %928 = vst.msk [vmem:[#allocation2] sm:$0xff] %vm927_vm9, %v916_v50 }
 0x3f8   : > { %v2038_v57 = vsel %vm2037_vm13, %v4157_v15, %v2034_v40 }
 0x3f9   : > { %v2043_v47 = vsel %vm2040_vm2, %v2042_v5, %v2038_v57  ;;  %vm1822_vm2 = vweird.f32 %v5396_v24 }
 0x3fa   : > { %v5433_v20 = vpop.xlane.xlu1 %2022  ;;  %v2044_v56 = vmul.f32 %v5093_v42, %v2043_v47 }
 0x3fb   : > { %4160 = vrcp.f32 %v5433_v20  ;;  %vm2050_vm7 = vweird.f32 %v5433_v20  ;;  %v2056_v31 = vand.u32 2147483648, %v5433_v20  ;;  %v2054_v42 = vand.u32 2147483647, %v5433_v20 }
 0x3fc   : > { %4162 = vrcp.f32 %v5396_v24 }
 0x3fd   : > { %v2057_v23 = vor.u32 1.1754944e-38, %v2056_v31  ;;  %vm2055_vm15 = vcmp.eq.f32.partialorder %v2054_v42, 8.507059e+37 }
 0x401   : > { %v5438_v61 = vpop.eup %4160 }
 0x402   : > { %v2046_v2 = vmul.f32 %v5438_v61, %v5433_v20  ;;  %v5442_v14 = vpop.eup %4162  ;;  %vm2051_vm6 = vweird.f32 %v5438_v61 }
 0x403   : > { %v1818_v39 = vmul.f32 %v5442_v14, %v5396_v24  ;;  %vm5471_vm11 = vmor %vm2050_vm7, %vm2051_vm6  ;;  %vm1823_vm13 = vweird.f32 %v5442_v14  ;;  %vm2065_vm7 = vweird.f32 %v5413_v28 }
 0x404   : > { %v2047_v18 = vsub.f32 1.0, %v2046_v2  ;;  %vm1824_vm4 = vmor %vm1822_vm2, %vm1823_vm13 }
 0x405   : > { %v1380_v25 = vpop.f32.mrf.mxu3  ;;  %v1819_v19 = vsub.f32 1.0, %v1818_v39 }
 0x406   : > { %v5445_v62 = vpop.xlane.xlu2 %1544  ;;  %1425 = vrot.lane.b32.xlu2 %v1380_v25, %s4290_s29  ;;  %v2048_v37 = vmul.f32 %v5438_v61, %v2047_v18 }
 0x407   : > { %4164 = vrcp.f32 %v5445_v62  ;;  %v1820_v7 = vmul.f32 %v5442_v14, %v1819_v19  ;;  %v1602_v58 = vand.u32 2147483648, %v5445_v62  ;;  %v1600_v51 = vand.u32 2147483647, %v5445_v62 }
 0x408   : > { %v2049_v29 = vadd.f32 %v5438_v61, %v2048_v37  ;;  %vm1596_vm10 = vweird.f32 %v5445_v62  ;;  %4166 = vrcp.f32 %v5413_v28 }
 0x409   : > { %v1603_v15 = vor.u32 1.1754944e-38, %v1602_v58  ;;  %v1821_v50 = vadd.f32 %v5442_v14, %v1820_v7  ;;  %vm1601_vm14 = vcmp.eq.f32.partialorder %v1600_v51, 8.507059e+37 }
 0x40a   : > { %v2053_v55 = vsel %vm5471_vm11, %v5438_v61, %v2049_v29 }
 0x40b   : > { %v2058_v8 = vsel %vm2055_vm15, %v2057_v23, %v2053_v55  ;;  %v1825_v61 = vsel %vm1824_vm4, %v5442_v14, %v1821_v50 }
 0x40c   : > { %v2059_v40 = vmul.f32 %v5197_v22, %v2058_v8 }
 0x40d   : > { %v4165_v6 = vpop.eup %4164 }
 0x40e   : > { %v1592_v21 = vmul.f32 %v4165_v6, %v5445_v62  ;;  %v3964_v46 = vpop.permute.xlu2 %3963  ;;  %vm1597_vm8 = vweird.f32 %v4165_v6  ;;  %v4167_v10 = vpop.eup %4166 }
 0x40f   : > { %v3965_v12 = vunpack.i.l.bf16 %v3964_v46  ;;  %v5458_v27 = vpop.f32.mrf.mxu1  ;;  %v3966_v13 = vunpack.i.h.bf16 %v3964_v46  ;;  %vm1598_vm12 = vmor %vm1596_vm10, %vm1597_vm8  ;;  %v2061_v14 = vmul.f32 %v4167_v10, %v5413_v28  ;;  %vm2066_vm6 = vweird.f32 %v4167_v10 }
 0x410   : > { %v1593_v49 = vsub.f32 1.0, %v1592_v21  ;;  %vm2067_vm8 = vmor %vm2065_vm7, %vm2066_vm6 }
 0x411   : > { %2116 = vmatpush.msrb.mxu1 %v3965_v12  ;;  %v2062_v22 = vsub.f32 1.0, %v2061_v14 }
 0x412   : > { %v1594_v1 = vmul.f32 %v4165_v6, %v1593_v49  ;;  %v3969_v26 = vpop.permute.xlu1 %3968  ;;  %v1383_v49 = vpop.f32.mrf.mxu3 }
 0x413   : > { %2117 = vmatpush.msrb.mxu1 %v3966_v13  ;;  %v3971_v52 = vunpack.i.h.bf16 %v3969_v26  ;;  %v3970_v48 = vunpack.i.l.bf16 %v3969_v26  ;;  %v2063_v53 = vmul.f32 %v4167_v10, %v2062_v22 }
 0x414   : > { %3787 = vmatmul.msk.f32.vlgmr.msrb.gmra.mxu1 %vm514_vm3, %v2044_v56  ;;  %v1595_v33 = vadd.f32 %v4165_v6, %v1594_v1 }
 0x415   : > { %1897 = vmatpush.msrb.mxu0 %v3970_v48  ;;  %v2064_v57 = vadd.f32 %v4167_v10, %v2063_v53 }
 0x416   : > { %v922_v17 = vpop.permute.xlu2 %921  ;;  %v1599_v35 = vsel %vm1598_vm12, %v4165_v6, %v1595_v33 }
 0x417   : > { %931 = vst.msk [vmem:[#allocation2 + $0x30] sm:$0xff] %vm927_vm9, %v922_v17  ;;  %v5485_v20 = vpop.f32.mrf.mxu1  ;;  %v1604_v60 = vsel %vm1601_vm14, %v1603_v15, %v1599_v35  ;;  %1898 = vmatpush.msrb.mxu0 %v3971_v52  ;;  %v2068_v5 = vsel %vm2067_vm8, %v4167_v10, %v2064_v57 }
 0x418   : > { %v1605_v38 = vmul.f32 %v5255_v4, %v1604_v60  ;;  %3785 = vmatmul.msk.f32.vlgmr.msrb.gmra.mxu0 %vm514_vm3, %v1816_v34  ;;  %v1830_v4 = vsel %vm1827_vm5, %v1829_v43, %v1825_v61 }
 0x419   : > { %v1831_v62 = vmul.f32 %v5121_v54, %v1830_v4  ;;  %v2069_v54 = vand.u32 2147483647, %v5413_v28 }
 0x41a   : > { %v5494_v2 = vpop.f32.mrf.mxu2  ;;  %3782 = vmatmul.msk.f32.gmra.mxu2 %vm514_vm3, %v1605_v38  ;;  %v918_v24 = vpop.permute.xlu1 %917 }
 0x41b   : > { %929 = vst.msk [vmem:[#allocation2 + $0x10] sm:$0xff] %vm927_vm9, %v918_v24  ;;  %vm2070_vm10 = vcmp.eq.f32.partialorder %v2069_v54, 8.507059e+37 }
 0x41c   : > { %3788 = vmatmul.msk.f32.gmra.mxu1 %vm514_vm3, %v2059_v40  ;;  %v2073_v32 = vsel %vm2070_vm10, %v2072_v45, %v2068_v5 }
 0x41d   : > { %v2074_v6 = vmul.f32 %v5129_v36, %v2073_v32 }
 0x41f   : > { %v1629_v25 = vpop.f32.mrf.mxu1 }
 0x420   : > { %1664 = vst.msk [vmem:[#allocation2 + $0x8] sm:$0xff] %vm332_vm0, %v1629_v25  ;;  %3786 = vmatmul.msk.f32.gmra.mxu0 %vm514_vm3, %v1831_v62 }
 0x421   : > { %v2280_v18 = vpop.xlane.xlu0 %2279 }
 0x422   : > { %v5504_v59 = vpop.f32.mrf.mxu2  ;;  %4168 = vrcp.f32 %v2280_v18  ;;  %v2325_v36 = vand.u32 2147483648, %v2280_v18  ;;  %vm2319_vm12 = vweird.f32 %v2280_v18  ;;  %v2323_v58 = vand.u32 2147483647, %v2280_v18 }
 0x424   : > { %v2326_v51 = vor.u32 1.1754944e-38, %v2325_v36  ;;  %vm2324_vm14 = vcmp.eq.f32.partialorder %v2323_v58, 8.507059e+37 }
 0x428   : > { %v4169_v21 = vpop.eup %4168 }
 0x429   : > { %v2315_v28 = vmul.f32 %v4169_v21, %v2280_v18  ;;  %vm2320_vm11 = vweird.f32 %v4169_v21 }
 0x42a   : > { %v1658_v39 = vpop.f32.mrf.mxu2  ;;  %vm2321_vm13 = vmor %vm2319_vm12, %vm2320_vm11  ;;  %vm1437_vm11 = vcmask 1048320  }
 0x42b   : > { %1666 = vst.msk [vmem:[#allocation2 + $0x28] sm:$0xff] %vm332_vm0, %v1658_v39  ;;  %v2316_v11 = vsub.f32 1.0, %v2315_v28  ;;  %v2442_v28 = vld [vmem:[%s6267_s3] sm:$0x3] }
 0x42d   : > { %v2317_v12 = vmul.f32 %v4169_v21, %v2316_v11 }
 0x42f   : > { %v2318_v29 = vadd.f32 %v4169_v21, %v2317_v12 }
 0x431   : > { %v2322_v1 = vsel %vm2321_vm13, %v4169_v21, %v2318_v29 }
 0x432   : > { %v2327_v34 = vsel %vm2324_vm14, %v2326_v51, %v2322_v1 }
 0x433   : > { %v2328_v23 = vmul.f32 %v5319_v41, %v2327_v34 }
 0x434   : > { %v3974_v47 = vpop.permute.xlu0 %3973 }
 0x435   : > { %v3976_v19 = vunpack.i.h.bf16 %v3974_v47  ;;  %v3975_v37 = vunpack.i.l.bf16 %v3974_v47 }
 0x437   : > { %2151 = vmatpush.msrb.mxu2 %v3975_v37 }
 0x438   : > { %v1632_v3 = vpop.f32.mrf.mxu1 }
 0x439   : > { %2152 = vmatpush.msrb.mxu2 %v3976_v19  ;;  %1665 = vst.msk [vmem:[#allocation2 + $0x18] sm:$0xff] %vm332_vm0, %v1632_v3 }
 0x43a   : > { %3789 = vmatmul.msk.f32.vlgmr.msrb.gmra.mxu2 %vm514_vm3, %v2074_v6 }
 0x446   : > { %v2283_v46 = vpop.xlane.xlu1 %2282 }
 0x447   : > { %4170 = vrcp.f32 %v2283_v46  ;;  %vm2334_vm2 = vweird.f32 %v2283_v46  ;;  %v2340_v50 = vand.u32 2147483648, %v2283_v46  ;;  %v2338_v8 = vand.u32 2147483647, %v2283_v46 }
 0x449   : > { %v2341_v61 = vor.u32 1.1754944e-38, %v2340_v50  ;;  %vm2339_vm10 = vcmp.eq.f32.partialorder %v2338_v8, 8.507059e+37 }
 0x44d   : > { %v4171_v56 = vpop.eup %4170 }
 0x44e   : > { %v2330_v7 = vmul.f32 %v4171_v56, %v2283_v46  ;;  %vm2335_vm15 = vweird.f32 %v4171_v56  ;;  %v5561_v46 = vperm.slane %v2442_v28, 0 }
 0x44f   : > { %v2029_v31 = vpop.xlane.xlu2 %2028  ;;  %vm5515_vm5 = vmor %vm2334_vm2, %vm2335_vm15 }
 0x450   : > { %4172 = vrcp.f32 %v2029_v31  ;;  %v2331_v13 = vsub.f32 1.0, %v2330_v7  ;;  %v2086_v0 = vand.u32 2147483648, %v2029_v31  ;;  %v2084_v60 = vand.u32 2147483647, %v2029_v31 }
 0x451   : > { %vm2080_vm6 = vweird.f32 %v2029_v31 }
 0x452   : > { %v2332_v42 = vmul.f32 %v4171_v56, %v2331_v13  ;;  %v2087_v43 = vor.u32 1.1754944e-38, %v2086_v0  ;;  %vm2085_vm8 = vcmp.eq.f32.partialorder %v2084_v60, 8.507059e+37 }
 0x454   : > { %v2333_v15 = vadd.f32 %v4171_v56, %v2332_v42 }
 0x456   : > { %v4173_v26 = vpop.eup %4172  ;;  %v1863_v52 = vpop.f32.mrf.mxu3  ;;  %v2337_v38 = vsel %vm5515_vm5, %v4171_v56, %v2333_v15 }
 0x457   : > { %v2076_v44 = vmul.f32 %v4173_v26, %v2029_v31  ;;  %v3979_v48 = vpop.permute.xlu2 %3978  ;;  %1910 = vrot.lane.b32.xlu0 %v1863_v52, %s4297_s26  ;;  %vm2081_vm4 = vweird.f32 %v4173_v26  ;;  %v2342_v10 = vsel %vm2339_vm10, %v2341_v61, %v2337_v38  ;;  %v5567_v31 = vperm.slane %v2442_v28, 1 }
 0x458   : > { %v3980_v33 = vunpack.i.l.bf16 %v3979_v48  ;;  %v3981_v17 = vunpack.i.h.bf16 %v3979_v48  ;;  %vm2082_vm7 = vmor %vm2080_vm6, %vm2081_vm4  ;;  %v2343_v62 = vmul.f32 %v5374_v16, %v2342_v10 }
 0x459   : > { %v2077_v55 = vsub.f32 1.0, %v2076_v44 }
 0x45a   : > { %2405 = vmatpush.msra.mxu0 %v3980_v33 }
 0x45b   : > { %v2078_v35 = vmul.f32 %v4173_v26, %v2077_v55 }
 0x45c   : > { %2406 = vmatpush.msra.mxu0 %v3981_v17 }
 0x45d   : > { %3793 = vmatmul.msk.f32.vlgmr.msra.gmra.mxu0 %vm514_vm3, %v2328_v23  ;;  %v2079_v41 = vadd.f32 %v4173_v26, %v2078_v35 }
 0x45e   : > { %v1866_v40 = vpop.f32.mrf.mxu3 }
 0x45f   : > { %v2083_v24 = vsel %vm2082_vm7, %v4173_v26, %v2079_v41  ;;  %1170 = vrot.lane.b32.xlu0 %v5458_v27, %s4298_s28  ;;  %1912 = vrot.lane.b32.xlu2 %v1866_v40, %s4297_s26  ;;  %v1415_v27 = vpop.f32.mrf.mxu0 }
 0x460   : > { %v2088_v4 = vsel %vm2085_vm8, %v2087_v43, %v2083_v24 }
 0x461   : > { %v2089_v25 = vmul.f32 %v5403_v63, %v2088_v4 }
 0x463   : > { %3790 = vmatmul.msk.f32.gmra.mxu2 %vm514_vm3, %v2089_v25 }
 0x465   : > { %3794 = vmatmul.msk.f32.gmra.mxu0 %vm514_vm3, %v2343_v62 }
 0x467   : > { %v1418_v63 = vpop.f32.mrf.mxu0 }
 0x46f   : > { %v2373_v14 = vpop.f32.mrf.mxu3 }
 0x470   : > { %2418 = vrot.lane.b32.xlu0 %v2373_v14, %s4290_s29 }
 0x477   : > { %v2376_v53 = vpop.f32.mrf.mxu3 }
 0x478   : > { %1172 = vrot.lane.b32.xlu0 %v5485_v20, %s4298_s28 }
 0x480   : > { %1427 = vrot.lane.b32.xlu0 %v1383_v49, %s4290_s29 }
 0x488   : > { %1174 = vrot.lane.b32.xlu0 %v5494_v2, %s4298_s28  ;;  %v1426_v2 = vpop.permute.xlu2 %1425 }
 0x491   : > { %v2119_v22 = vpop.f32.mrf.mxu1 }
 0x492   : > { %2164 = vrot.lane.b32.xlu1 %v2119_v22, %s4298_s28 }
 0x495   : > { %v1900_v20 = vpop.f32.mrf.mxu0 }
 0x499   : > { %v2122_v16 = vpop.f32.mrf.mxu1 }
 0x49a   : > { %2166 = vrot.lane.b32.xlu2 %v2122_v16, %s4298_s28  ;;  %2420 = vrot.lane.b32.xlu1 %v2376_v53, %s4290_s29 }
 0x49d   : > { %v1661_v39 = vpop.f32.mrf.mxu2  ;;  %v1903_v30 = vpop.f32.mrf.mxu0 }
 0x49e   : > { %1667 = vst.msk [vmem:[#allocation2 + $0x38] sm:$0xff] %vm332_vm0, %v1661_v39  ;;  %vm1182_vm0 = vcmask 785920  }
 0x4a2   : > { %1914 = vrot.lane.b32.xlu2 %v1900_v20, %s4297_s26 }
 0x4aa   : > { %1429 = vrot.lane.b32.xlu2 %v1415_v27, %s4290_s29 }
 0x4b2   : > { %1176 = vrot.lane.b32.xlu2 %v5504_v59, %s4298_s28 }
 0x4b9   : > { %v1913_v18 = vpop.permute.xlu2 %1912 }
 0x4ba   : > { %1923 = vst.msk [vmem:[#allocation2 + $0x18] sm:$0xff] %vm927_vm9, %v1913_v18 }
 0x4bd   : > { %v2154_v57 = vpop.f32.mrf.mxu2 }
 0x4be   : > { %2168 = vrot.lane.b32.xlu1 %v2154_v57, %s4298_s28 }
 0x4c6   : > { %1916 = vrot.lane.b32.xlu1 %v1903_v30, %s4297_s26 }
 0x4c9   : > { %v1911_v54 = vpop.permute.xlu0 %1910 }
 0x4ca   : > { %1922 = vst.msk [vmem:[#allocation2 + $0x8] sm:$0xff] %vm927_vm9, %v1911_v54 }
 0x4ce   : > { %1431 = vrot.lane.b32.xlu1 %v1418_v63, %s4290_s29 }
 0x4d1   : > { %v1171_v5 = vpop.permute.xlu0 %1170 }
 0x4d2   : > { %1183 = vst.msk [vmem:[#allocation2] sm:$0xff] %vm1182_vm0, %v1171_v5 }
 0x4d3   : > { %1438 = vst.msk [vmem:[#allocation2] sm:$0xff] %vm1437_vm11, %v1426_v2 }
 0x4da   : > { %v2408_v59 = vpop.f32.mrf.mxu0  ;;  %v2434_v11 = vld [vmem:[#allocation2] sm:$0xff] }
 0x4db   : > { %2422 = vrot.lane.b32.xlu0 %v2408_v59, %s4290_s29  ;;  %v2448_v7 = vadd.f32 %v5561_v46, %v2434_v11 }
 0x4dd   : > { %v2464_v49 = vmin.f32 %v2448_v7, 0.0  ;;  %vm2456_vm12 = vcmp.gt.f32.partialorder %v2448_v7, 0.0 }
 0x4df   : > { %v2472_v13 = vmul.f32 1.442695, %v2464_v49 }
 0x4e1   : > { %4174 = vpow2.f32 %v2472_v13 }
 0x4e2   : > { %v2411_v45 = vpop.f32.mrf.mxu0  ;;  %v2419_v47 = vpop.permute.xlu0 %2418 }
 0x4e3   : > { %2424 = vrot.lane.b32.xlu2 %v2411_v45, %s4290_s29 }
 0x4e6   : > { %v2157_v32 = vpop.f32.mrf.mxu2 }
 0x4e7   : > { %2170 = vrot.lane.b32.xlu0 %v2157_v32, %s4298_s28  ;;  %v4175_v33 = vpop.eup %4174  ;;  %s4309_s28 = smov 108  }
 0x4e8   : > { %v3795_v15 = vadd.f32 -1.0, %v4175_v33 }
 0x4ea   : > { %v1173_v19 = vpop.permute.xlu0 %1172  ;;  %v5574_v35 = vsel %vm2456_vm12, %v2448_v7, %v3795_v15 }
 0x4eb   : > { %1184 = vst.msk [vmem:[#allocation2 + $0x10] sm:$0xff] %vm1182_vm0, %v1173_v19 }
 0x4f2   : > { %v1428_v37 = vpop.permute.xlu0 %1427 }
 0x4f3   : > { %1439 = vst.msk [vmem:[#allocation2 + $0x10] sm:$0xff] %vm1437_vm11, %v1428_v37 }
 0x4f4   : > { %v2167_v6 = vpop.permute.xlu2 %2166 }
 0x4f5   : > { %2177 = vst.msk [vmem:[#allocation2 + $0x18] sm:$0xff] %vm1182_vm0, %v2167_v6 }
 0x4fa   : > { %v1175_v3 = vpop.permute.xlu0 %1174  ;;  %v2436_v29 = vld [vmem:[#allocation2 + $0x10] sm:$0xff] }
 0x4fb   : > { %1185 = vst.msk [vmem:[#allocation2 + $0x20] sm:$0xff] %vm1182_vm0, %v1175_v3  ;;  %v2450_v1 = vadd.f32 %v5561_v46, %v2436_v29 }
 0x4fc   : > { %v1915_v21 = vpop.permute.xlu2 %1914 }
 0x4fd   : > { %1924 = vst.msk [vmem:[#allocation2 + $0x28] sm:$0xff] %vm927_vm9, %v1915_v21  ;;  %v2466_v34 = vmin.f32 %v2450_v1, 0.0  ;;  %vm2458_vm14 = vcmp.gt.f32.partialorder %v2450_v1, 0.0 }
 0x4ff   : > { %v2476_v52 = vmul.f32 1.442695, %v2466_v34 }
 0x504   : > { %v2165_v12 = vpop.permute.xlu1 %2164  ;;  %v1430_v56 = vpop.permute.xlu2 %1429 }
 0x505   : > { %2176 = vst.msk [vmem:[#allocation2 + $0x8] sm:$0xff] %vm1182_vm0, %v2165_v12 }
 0x506   : > { %2430 = vst.msk [vmem:[#allocation2 + $0x8] sm:$0xff] %vm1437_vm11, %v2419_v47 }
 0x507   : > { %1440 = vst.msk [vmem:[#allocation2 + $0x20] sm:$0xff] %vm1437_vm11, %v1430_v56 }
 0x50c   : > { %v1177_v36 = vpop.permute.xlu2 %1176  ;;  %v2421_v58 = vpop.permute.xlu1 %2420 }
 0x50d   : > { %1186 = vst.msk [vmem:[#allocation2 + $0x30] sm:$0xff] %vm1182_vm0, %v1177_v36  ;;  %v2435_v51 = vld [vmem:[#allocation2 + $0x8] sm:$0xff] }
 0x50e   : > { %2431 = vst.msk [vmem:[#allocation2 + $0x18] sm:$0xff] %vm1437_vm11, %v2421_v58  ;;  %v2449_v42 = vadd.f32 %v5567_v31, %v2435_v51  ;;  %v2438_v62 = vld [vmem:[#allocation2 + $0x20] sm:$0xff] }
 0x50f   : > { %v2452_v14 = vadd.f32 %v5561_v46, %v2438_v62 }
 0x510   : > { %v2465_v26 = vmin.f32 %v2449_v42, 0.0  ;;  %vm2457_vm13 = vcmp.gt.f32.partialorder %v2449_v42, 0.0 }
 0x511   : > { %v2468_v22 = vmin.f32 %v2452_v14, 0.0 }
 0x512   : > { %v2474_v44 = vmul.f32 1.442695, %v2465_v26 }
 0x513   : > { %v2480_v63 = vmul.f32 1.442695, %v2468_v22 }
 0x514   : > { %4176 = vpow2.f32 %v2474_v44 }
 0x515   : > { %v2437_v48 = vld [vmem:[#allocation2 + $0x18] sm:$0xff]  ;;  %4178 = vpow2.f32 %v2476_v52 }
 0x516   : > { %v2451_v55 = vadd.f32 %v5567_v31, %v2437_v48 }
 0x518   : > { %v2467_v23 = vmin.f32 %v2451_v55, 0.0  ;;  %vm2459_vm15 = vcmp.gt.f32.partialorder %v2451_v55, 0.0 }
 0x51a   : > { %v4177_v50 = vpop.eup %4176  ;;  %v2478_v0 = vmul.f32 1.442695, %v2467_v23 }
 0x51b   : > { %v3796_v17 = vadd.f32 -1.0, %v4177_v50  ;;  %v4179_v8 = vpop.eup %4178 }
 0x51c   : > { %4180 = vpow2.f32 %v2478_v0  ;;  %v3797_v41 = vadd.f32 -1.0, %v4179_v8 }
 0x51d   : > { %v5576_v60 = vsel %vm2457_vm13, %v2449_v42, %v3796_v17  ;;  %4182 = vpow2.f32 %v2480_v63 }
 0x51e   : > { %v2504_v9 = vadd.f32 %v5576_v60, %v5574_v35  ;;  %v5580_v43 = vsel %vm2458_vm14, %v2450_v1, %v3797_v41  ;;  %v2670_v41 = vld [vmem:[%s6270_s6 + $0xf8] sm:$0xff] }
 0x51f   : > { %2700 = vmatpush.msra.mxu2 %v2670_v41 }
 0x520   : > { %2505 = vadd.xlane.f32.xlu0 %v2504_v9  ;;  %v2654_v9 = vld [vmem:[%s6270_s6 + $0x78] sm:$0xff] }
 0x521   : > { %2671 = vmatpush.msra.mxu1 %v2654_v9 }
 0x522   : > { %v4181_v38 = vpop.eup %4180 }
 0x523   : > { %v3798_v61 = vadd.f32 -1.0, %v4181_v38  ;;  %v4183_v5 = vpop.eup %4182  ;;  %v2653_v38 = vld [vmem:[%s6270_s6 + $0x70] sm:$0xff] }
 0x524   : > { %v3799_v59 = vadd.f32 -1.0, %v4183_v5  ;;  %2672 = vmatpush.msra.mxu1 %v2653_v38  ;;  %v2649_v5 = vld [vmem:[%s6270_s6 + $0x50] sm:$0xff]  ;;  %v2625_v38 = vld [vmem:[%s6269_s5] sm:$0x3] }
 0x525   : > { %v5582_v40 = vsel %vm2459_vm15, %v2451_v55, %v3798_v61  ;;  %v2669_v61 = vld [vmem:[%s6270_s6 + $0xf0] sm:$0xff] }
 0x526   : > { %v2507_v24 = vadd.f32 %v5582_v40, %v5580_v43  ;;  %2701 = vmatpush.msra.mxu2 %v2669_v61 }
 0x528   : > { %2508 = vadd.xlane.f32.xlu1 %v2507_v24 }
 0x530   : > { %v2169_v4 = vpop.permute.xlu1 %2168 }
 0x531   : > { %2178 = vst.msk [vmem:[#allocation2 + $0x28] sm:$0xff] %vm1182_vm0, %v2169_v4 }
 0x538   : > { %v1917_v10 = vpop.permute.xlu1 %1916 }
 0x539   : > { %1925 = vst.msk [vmem:[#allocation2 + $0x38] sm:$0xff] %vm927_vm9, %v1917_v10  ;;  %vm2460_vm9 = vcmp.gt.f32.partialorder %v2452_v14, 0.0 }
 0x53a   : > { %v2500_v6 = vsel %vm2460_vm9, %v2452_v14, %v3799_v59  ;;  %v2665_v59 = vld [vmem:[%s6270_s6 + $0xd0] sm:$0xff] }
 0x53d   : > { %v2425_v57 = vpop.permute.xlu2 %2424 }
 0x540   : > { %v1432_v25 = vpop.permute.xlu1 %1431 }
 0x541   : > { %1441 = vst.msk [vmem:[#allocation2 + $0x30] sm:$0xff] %vm1437_vm11, %v1432_v25 }
 0x548   : > { %v2440_v39 = vld [vmem:[#allocation2 + $0x30] sm:$0xff] }
 0x549   : > { %v2454_v18 = vadd.f32 %v5561_v46, %v2440_v39 }
 0x54b   : > { %v2470_v54 = vmin.f32 %v2454_v18, 0.0  ;;  %vm2462_vm4 = vcmp.gt.f32.partialorder %v2454_v18, 0.0 }
 0x54d   : > { %v2423_v27 = vpop.permute.xlu0 %2422  ;;  %v2484_v45 = vmul.f32 1.442695, %v2470_v54  ;;  %v2666_v54 = vld [vmem:[%s6270_s6 + $0xd8] sm:$0xff] }
 0x54e   : > { %2432 = vst.msk [vmem:[#allocation2 + $0x28] sm:$0xff] %vm1437_vm11, %v2423_v27 }
 0x555   : > { %v2439_v53 = vld [vmem:[#allocation2 + $0x28] sm:$0xff] }
 0x556   : > { %v2453_v16 = vadd.f32 %v5567_v31, %v2439_v53 }
 0x558   : > { %v2469_v20 = vmin.f32 %v2453_v16, 0.0  ;;  %vm2461_vm2 = vcmp.gt.f32.partialorder %v2453_v16, 0.0 }
 0x559   : > { %v2171_v2 = vpop.permute.xlu0 %2170 }
 0x55a   : > { %2179 = vst.msk [vmem:[#allocation2 + $0x38] sm:$0xff] %vm1182_vm0, %v2171_v2  ;;  %v2482_v30 = vmul.f32 1.442695, %v2469_v20  ;;  %v2652_v20 = vld [vmem:[%s6270_s6 + $0x68] sm:$0xff] }
 0x55b   : > { %2433 = vst.msk [vmem:[#allocation2 + $0x38] sm:$0xff] %vm1437_vm11, %v2425_v57  ;;  %v2668_v2 = vld [vmem:[%s6270_s6 + $0xe8] sm:$0xff]  ;;  %2673 = vmatpush.msra.mxu1 %v2652_v20  ;;  %v2667_v57 = vld [vmem:[%s6270_s6 + $0xe0] sm:$0xff] }
 0x55c   : > { %4184 = vpow2.f32 %v2482_v30  ;;  %2702 = vmatpush.msra.mxu2 %v2668_v2  ;;  %v2650_v30 = vld [vmem:[%s6270_s6 + $0x58] sm:$0xff] }
 0x55d   : > { %4186 = vpow2.f32 %v2484_v45  ;;  %v2648_v45 = vld [vmem:[%s6270_s6 + $0x48] sm:$0xff] }
 0x55e   : > { %2703 = vmatpush.msra.mxu2 %v2667_v57 }
 0x560   : > { %2704 = vmatpush.msra.mxu2 %v2666_v54 }
 0x562   : > { %v4185_v47 = vpop.eup %4184  ;;  %v2441_v32 = vld [vmem:[#allocation2 + $0x38] sm:$0xff]  ;;  %2705 = vmatpush.msra.mxu2 %v2665_v59 }
 0x563   : > { %v3800_v19 = vadd.f32 -1.0, %v4185_v47  ;;  %v2455_v37 = vadd.f32 %v5567_v31, %v2441_v32  ;;  %v4187_v11 = vpop.eup %4186  ;;  %v4299_v31 = vmov 256.0   ;;  %v2664_v47 = vld [vmem:[%s6270_s6 + $0xc8] sm:$0xff]  ;;  %v2647_v32 = vld [vmem:[%s6270_s6 + $0x40] sm:$0xff] }
 0x564   : > { %v3801_v12 = vadd.f32 -1.0, %v4187_v11  ;;  %2706 = vmatpush.msra.mxu2 %v2664_v47  ;;  %v2643_v11 = vld [vmem:[%s6270_s6 + $0x20] sm:$0xff] }
 0x565   : > { %v2501_v3 = vsel %vm2461_vm2, %v2453_v16, %v3800_v19  ;;  %v2471_v21 = vmin.f32 %v2455_v37, 0.0  ;;  %vm2463_vm5 = vcmp.gt.f32.partialorder %v2455_v37, 0.0  ;;  %v2663_v19 = vld [vmem:[%s6270_s6 + $0xc0] sm:$0xff] }
 0x566   : > { %v2510_v28 = vadd.f32 %v2501_v3, %v2500_v6  ;;  %v2502_v49 = vsel %vm2462_vm4, %v2454_v18, %v3801_v12  ;;  %v2651_v18 = vld [vmem:[%s6270_s6 + $0x60] sm:$0xff]  ;;  %2707 = vmatpush.msra.mxu2 %v2663_v19 }
 0x567   : > { %v2486_v46 = vmul.f32 1.442695, %v2471_v21  ;;  %2674 = vmatpush.msra.mxu1 %v2651_v18  ;;  %v2661_v21 = vld [vmem:[%s6270_s6 + $0xb0] sm:$0xff]  ;;  %v2659_v12 = vld [vmem:[%s6270_s6 + $0xa0] sm:$0xff] }
 0x568   : > { %2511 = vadd.xlane.f32.xlu2 %v2510_v28  ;;  %v2644_v28 = vld [vmem:[%s6270_s6 + $0x28] sm:$0xff] }
 0x569   : > { %4188 = vpow2.f32 %v2486_v46  ;;  %2675 = vmatpush.msra.mxu1 %v2650_v30  ;;  %v2660_v46 = vld [vmem:[%s6270_s6 + $0xa8] sm:$0xff] }
 0x56a   : > { %4190 = vrcp.f32 %v4299_v31  ;;  %v2656_v31 = vld [vmem:[%s6270_s6 + $0x88] sm:$0xff] }
 0x56b   : > { %2676 = vmatpush.msra.mxu1 %v2649_v5 }
 0x56d   : > { %2677 = vmatpush.msra.mxu1 %v2648_v45 }
 0x56f   : > { %v4189_v56 = vpop.eup %4188  ;;  %2678 = vmatpush.msra.mxu1 %v2647_v32 }
 0x570   : > { %v3802_v7 = vadd.f32 -1.0, %v4189_v56  ;;  %v4191_v58 = vpop.eup %4190  ;;  %v2642_v56 = vld [vmem:[%s6270_s6 + $0x18] sm:$0xff] }
 0x571   : > { %v2517_v13 = vmul.f32 256.0, %v4191_v58  ;;  %vm2521_vm6 = vweird.f32 %v4191_v58 }
 0x572   : > { %v2503_v29 = vsel %vm2463_vm5, %v2455_v37, %v3802_v7  ;;  %v2646_v37 = vld [vmem:[%s6270_s6 + $0x38] sm:$0xff] }
 0x573   : > { %v2513_v36 = vadd.f32 %v2503_v29, %v2502_v49  ;;  %v2518_v1 = vsub.f32 1.0, %v2517_v13  ;;  %2679 = vmatpush.msra.mxu1 %v2646_v37  ;;  %v2658_v7 = vld [vmem:[%s6270_s6 + $0x98] sm:$0xff]  ;;  %v2655_v13 = vld [vmem:[%s6270_s6 + $0x80] sm:$0xff] }
 0x575   : > { %2514 = vadd.xlane.f32.xlu0 %v2513_v36  ;;  %v2519_v51 = vmul.f32 %v4191_v58, %v2518_v1  ;;  %v2640_v36 = vld [vmem:[%s6270_s6 + $0x8] sm:$0xff] }
 0x577   : > { %v2520_v42 = vadd.f32 %v4191_v58, %v2519_v51 }
 0x579   : > { %v5596_v26 = vsel %vm2521_vm6, %v4191_v58, %v2520_v42  ;;  %v2639_v58 = vld [vmem:[%s6270_s6] sm:$0xff] }
 0x593   : > { %v2506_v34 = vpop.xlane.xlu0 %2505 }
 0x594   : > { %v2523_v44 = vmul.f32 %v5596_v26, %v2506_v34 }
 0x596   : > { %v5600_v52 = vsub.f32 %v5574_v35, %v2523_v44  ;;  %v5603_v48 = vsub.f32 %v5576_v60, %v2523_v44 }
 0x598   : > { %v2535_v33 = vmul.f32 %v5600_v52, %v5600_v52  ;;  %v2536_v55 = vmul.f32 %v5603_v48, %v5603_v48 }
 0x59a   : > { %v2543_v23 = vadd.f32 %v2536_v55, %v2535_v33 }
 0x59b   : > { %v2509_v15 = vpop.xlane.xlu1 %2508 }
 0x59c   : > { %v2524_v50 = vmul.f32 %v5596_v26, %v2509_v15  ;;  %2544 = vadd.xlane.f32.xlu1 %v2543_v23 }
 0x59e   : > { %v5611_v0 = vsub.f32 %v5580_v43, %v2524_v50  ;;  %v5614_v17 = vsub.f32 %v5582_v40, %v2524_v50 }
 0x5a0   : > { %v2537_v35 = vmul.f32 %v5611_v0, %v5611_v0  ;;  %v2538_v60 = vmul.f32 %v5614_v17, %v5614_v17 }
 0x5a2   : > { %v2546_v8 = vadd.f32 %v2538_v60, %v2537_v35  ;;  %v2611_v60 = vld [vmem:[%s6268_s4] sm:$0x3] }
 0x5a3   : > { %v5742_v61 = vperm.slane %v2611_v60, 0 }
 0x5a4   : > { %2547 = vadd.xlane.f32.xlu2 %v2546_v8 }
 0x5db   : > { %v2512_v43 = vpop.xlane.xlu2 %2511 }
 0x5dc   : > { %v2525_v40 = vmul.f32 %v5596_v26, %v2512_v43  ;;  %v5744_v43 = vperm.slane %v2611_v60, 1 }
 0x5de   : > { %v5633_v24 = vsub.f32 %v2500_v6, %v2525_v40  ;;  %v5635_v4 = vsub.f32 %v2501_v3, %v2525_v40  ;;  %v2662_v6 = vld [vmem:[%s6270_s6 + $0xb8] sm:$0xff]  ;;  %v2645_v3 = vld [vmem:[%s6270_s6 + $0x30] sm:$0xff] }
 0x5df   : > { %2708 = vmatpush.msra.mxu2 %v2662_v6  ;;  %2680 = vmatpush.msra.mxu1 %v2645_v3 }
 0x5e0   : > { %v2539_v10 = vmul.f32 %v5633_v24, %v5633_v24  ;;  %v2540_v25 = vmul.f32 %v5635_v4, %v5635_v4 }
 0x5e1   : > { %2709 = vmatpush.msra.mxu2 %v2661_v21  ;;  %2681 = vmatpush.msra.mxu1 %v2644_v28 }
 0x5e2   : > { %v2549_v62 = vadd.f32 %v2540_v25, %v2539_v10 }
 0x5e3   : > { %2710 = vmatpush.msra.mxu2 %v2660_v46  ;;  %2682 = vmatpush.msra.mxu1 %v2643_v11 }
 0x5e4   : > { %2550 = vadd.xlane.f32.xlu0 %v2549_v62 }
 0x5e5   : > { %2711 = vmatpush.msra.mxu2 %v2659_v12  ;;  %2683 = vmatpush.msra.mxu1 %v2642_v56 }
 0x5e7   : > { %2712 = vmatpush.msra.mxu2 %v2658_v7 }
 0x5e8   : > { %v2515_v14 = vpop.xlane.xlu0 %2514 }
 0x5e9   : > { %v2526_v27 = vmul.f32 %v5596_v26, %v2515_v14  ;;  %v5748_v14 = vperm.slane %v2625_v38, 0 }
 0x5eb   : > { %v5642_v22 = vsub.f32 %v2502_v49, %v2526_v27  ;;  %v5644_v63 = vsub.f32 %v2503_v29, %v2526_v27  ;;  %v2641_v49 = vld [vmem:[%s6270_s6 + $0x10] sm:$0xff]  ;;  %v5750_v27 = vperm.slane %v2625_v38, 1 }
 0x5ec   : > { %v2657_v29 = vld [vmem:[%s6270_s6 + $0x90] sm:$0xff]  ;;  %2684 = vmatpush.msra.mxu1 %v2641_v49 }
 0x5ed   : > { %v2541_v53 = vmul.f32 %v5642_v22, %v5642_v22  ;;  %v2542_v16 = vmul.f32 %v5644_v63, %v5644_v63  ;;  %2713 = vmatpush.msra.mxu2 %v2657_v29 }
 0x5ee   : > { %2685 = vmatpush.msra.mxu1 %v2640_v36 }
 0x5ef   : > { %v2552_v39 = vadd.f32 %v2542_v16, %v2541_v53  ;;  %2714 = vmatpush.msra.mxu2 %v2656_v31 }
 0x5f0   : > { %2686 = vmatpush.msra.mxu1 %v2639_v58 }
 0x5f1   : > { %2553 = vadd.xlane.f32.xlu1 %v2552_v39  ;;  %2715 = vmatpush.msra.mxu2 %v2655_v13 }
 0x60f   : > { %v2545_v1 = vpop.xlane.xlu1 %2544 }
 0x610   : > { %v2555_v51 = vmul.f32 %v2545_v1, %v5596_v26 }
 0x612   : > { %v2559_v42 = vadd.f32 1e-05, %v2555_v51 }
 0x614   : > { %4192 = vrsqrt.f32 %v2559_v42  ;;  %vm2569_vm8 = vweird.f32 %v2559_v42 }
 0x617   : > { %v2548_v34 = vpop.xlane.xlu2 %2547 }
 0x618   : > { %v2556_v44 = vmul.f32 %v2548_v34, %v5596_v26 }
 0x61a   : > { %v4193_v33 = vpop.eup %4192  ;;  %v2560_v55 = vadd.f32 1e-05, %v2556_v44 }
 0x61b   : > { %v2564_v23 = vmul.f32 %v4193_v33, %v2559_v42  ;;  %vm2570_vm7 = vweird.f32 %v4193_v33 }
 0x61c   : > { %4194 = vrsqrt.f32 %v2560_v55  ;;  %vm2571_vm10 = vmor %vm2569_vm8, %vm2570_vm7  ;;  %vm2579_vm11 = vweird.f32 %v2560_v55 }
 0x61d   : > { %v2565_v15 = vmul.f32 %v4193_v33, %v2564_v23 }
 0x61f   : > { %v2566_v50 = vmul.f32 0.5, %v2565_v15  ;;  %v4300_v15 = vmov 42  }
 0x620   : > { %3987 = vset.pattern.permute.xlu0 %v4300_v15 }
 0x621   : > { %v2567_v35 = vsub.f32 1.5, %v2566_v50  ;;  %v4301_v50 = vmov 45  }
 0x622   : > { %v4195_v8 = vpop.eup %4194  ;;  %3982 = vset.pattern.permute.xlu2 %v4301_v50 }
 0x623   : > { %v2568_v9 = vmul.f32 %v4193_v33, %v2567_v35  ;;  %v2574_v41 = vmul.f32 %v4195_v8, %v2560_v55  ;;  %vm2580_vm0 = vweird.f32 %v4195_v8  ;;  %v4302_v35 = vmov 41  }
 0x624   : > { %vm2581_vm12 = vmor %vm2579_vm11, %vm2580_vm0  ;;  %3983 = vset.pattern.permute.xlu1 %v4302_v35 }
 0x625   : > { %v2572_v40 = vsel %vm2571_vm10, %v4193_v33, %v2568_v9  ;;  %v2575_v10 = vmul.f32 %v4195_v8, %v2574_v41  ;;  %v4304_v9 = vmov 43   ;;  %v4305_v41 = vmov 47  }
 0x626   : > { %v2603_v25 = vmul.f32 %v2572_v40, %v5600_v52  ;;  %v2604_v62 = vmul.f32 %v2572_v40, %v5603_v48  ;;  %v4306_v40 = vmov 40  }
 0x627   : > { %v2576_v53 = vmul.f32 0.5, %v2575_v10  ;;  %v4307_v10 = vmov 46  }
 0x628   : > { %v2617_v16 = vmul.f32 %v5742_v61, %v2603_v25  ;;  %v2618_v39 = vmul.f32 %v5744_v43, %v2604_v62 }
 0x629   : > { %v2577_v20 = vsub.f32 1.5, %v2576_v53 }
 0x62a   : > { %v2631_v2 = vadd.f32 %v5748_v14, %v2617_v16  ;;  %v2632_v18 = vadd.f32 %v5750_v27, %v2618_v39 }
 0x62b   : > { %v2578_v57 = vmul.f32 %v4195_v8, %v2577_v20 }
 0x62c   : > { %2687 = vmatmul.f32.vlgmr.msra.gmra.mxu1 %v2631_v2  ;;  %2716 = vmatmul.f32.vlgmr.msra.gmra.mxu2 %v2632_v18 }
 0x62d   : > { %v2582_v52 = vsel %vm2581_vm12, %v4195_v8, %v2578_v57  ;;  %v4303_v8 = vmov 44  }
 0x62e   : > { %v2605_v48 = vmul.f32 %v2582_v52, %v5611_v0  ;;  %v2606_v30 = vmul.f32 %v2582_v52, %v5614_v17 }
 0x630   : > { %v2619_v54 = vmul.f32 %v5742_v61, %v2605_v48  ;;  %v2620_v5 = vmul.f32 %v5744_v43, %v2606_v30 }
 0x632   : > { %v2633_v59 = vadd.f32 %v5748_v14, %v2619_v54  ;;  %v2634_v45 = vadd.f32 %v5750_v27, %v2620_v5  ;;  %v6305_v5 = vld [vmem:[#allocation3_spill] sm:$0xff] }
 0x634   : > { %2690 = vmatmul.f32.gmra.mxu1 %v2633_v59  ;;  %2719 = vmatmul.f32.gmra.mxu2 %v2634_v45 }
 0x657   : > { %v2551_v47 = vpop.xlane.xlu0 %2550 }
 0x658   : > { %v2557_v32 = vmul.f32 %v2551_v47, %v5596_v26  ;;  %v6306_v47 = vld [vmem:[#allocation4_spill] sm:$0xff] }
 0x65a   : > { %v2561_v19 = vadd.f32 1e-05, %v2557_v32 }
 0x65c   : > { %4196 = vrsqrt.f32 %v2561_v19  ;;  %vm2589_vm14 = vweird.f32 %v2561_v19 }
 0x662   : > { %v4197_v37 = vpop.eup %4196 }
 0x663   : > { %v2584_v6 = vmul.f32 %v4197_v37, %v2561_v19  ;;  %vm2590_vm13 = vweird.f32 %v4197_v37 }
 0x664   : > { %v2554_v0 = vpop.xlane.xlu1 %2553  ;;  %vm2591_vm15 = vmor %vm2589_vm14, %vm2590_vm13 }
 0x665   : > { %v2585_v3 = vmul.f32 %v4197_v37, %v2584_v6  ;;  %v2558_v17 = vmul.f32 %v2554_v0, %v5596_v26 }
 0x667   : > { %v2586_v21 = vmul.f32 0.5, %v2585_v3  ;;  %v2562_v28 = vadd.f32 1e-05, %v2558_v17  ;;  %v5851_v17 = vld [vmem:[%s6265_s1 + $0x8] sm:$0xff] }
 0x669   : > { %v2587_v46 = vsub.f32 1.5, %v2586_v21  ;;  %4198 = vrsqrt.f32 %v2562_v28  ;;  %vm2599_vm2 = vweird.f32 %v2562_v28 }
 0x66b   : > { %v2588_v11 = vmul.f32 %v4197_v37, %v2587_v46 }
 0x66d   : > { %v2592_v12 = vsel %vm2591_vm15, %v4197_v37, %v2588_v11 }
 0x66e   : > { %v2607_v56 = vmul.f32 %v2592_v12, %v5633_v24  ;;  %v2608_v7 = vmul.f32 %v2592_v12, %v5635_v4 }
 0x66f   : > { %v4199_v49 = vpop.eup %4198 }
 0x670   : > { %v2594_v29 = vmul.f32 %v4199_v49, %v2562_v28  ;;  %v2621_v36 = vmul.f32 %v5742_v61, %v2607_v56  ;;  %v2622_v31 = vmul.f32 %v5744_v43, %v2608_v7  ;;  %vm2600_vm9 = vweird.f32 %v4199_v49 }
 0x671   : > { %vm2601_vm4 = vmor %vm2599_vm2, %vm2600_vm9 }
 0x672   : > { %v2595_v26 = vmul.f32 %v4199_v49, %v2594_v29  ;;  %v2635_v58 = vadd.f32 %v5748_v14, %v2621_v36  ;;  %v2636_v13 = vadd.f32 %v5750_v27, %v2622_v31 }
 0x674   : > { %v2596_v1 = vmul.f32 0.5, %v2595_v26  ;;  %2693 = vmatmul.f32.gmra.mxu1 %v2635_v58  ;;  %2722 = vmatmul.f32.gmra.mxu2 %v2636_v13 }
 0x676   : > { %v2597_v51 = vsub.f32 1.5, %v2596_v1 }
 0x678   : > { %v2598_v42 = vmul.f32 %v4199_v49, %v2597_v51  ;;  %v5866_v51 = vld [vmem:[%s6265_s1] sm:$0xff] }
 0x67a   : > { %v2602_v24 = vsel %vm2601_vm4, %v4199_v49, %v2598_v42 }
 0x67b   : > { %v2609_v4 = vmul.f32 %v2602_v24, %v5642_v22  ;;  %v2610_v34 = vmul.f32 %v2602_v24, %v5644_v63 }
 0x67d   : > { %v2623_v44 = vmul.f32 %v5742_v61, %v2609_v4  ;;  %v2624_v33 = vmul.f32 %v5744_v43, %v2610_v34 }
 0x67f   : > { %v2637_v55 = vadd.f32 %v5748_v14, %v2623_v44  ;;  %v2638_v23 = vadd.f32 %v5750_v27, %v2624_v33 }
 0x681   : > { %2696 = vmatmul.f32.gmra.mxu1 %v2637_v55  ;;  %2725 = vmatmul.f32.gmra.mxu2 %v2638_v23 }
 0x6a9   : > { %v2688_v22 = vpop.f32.mrf.mxu1 }
 0x6af   : > { %v2717_v63 = vpop.f32.mrf.mxu2 }
 0x6b0   : > { %v5779_v60 = vadd.f32 %v2717_v63, %v2688_v22 }
 0x6b1   : > { %v2691_v61 = vpop.f32.mrf.mxu1 }
 0x6b2   : > { %2914 = vperm.xlu2 %3982, %v5779_v60   ;;  %3190 = vperm.xlu0 %3987, %v5779_v60  }
 0x6b3   : > { %2898 = vperm.xlu1 %3983, %v5779_v60  }
 0x6b7   : > { %v2720_v38 = vpop.f32.mrf.mxu2 }
 0x6b8   : > { %v5789_v43 = vadd.f32 %v2720_v38, %v2691_v61 }
 0x6ba   : > { %3984 = vset.pattern.permute.xlu2 %v4303_v8  ;;  %3989 = vset.pattern.permute.xlu0 %v4304_v9  ;;  %v5806_v25 = vpack.i.bf16 %v5779_v60, %v5789_v43 }
 0x6bb   : > { %3988 = vset.pattern.permute.xlu1 %v4305_v41  ;;  %2750 = vperm.xlu2 %3984, %v5779_v60  }
 0x6bc   : > { %3428 = vperm.xlu0 %3989, %v5779_v60   ;;  %3444 = vperm.xlu1 %3988, %v5779_v60  }
 0x6c3   : > { %3985 = vset.pattern.permute.xlu2 %v4306_v40 }
 0x6c4   : > { %3990 = vset.pattern.permute.xlu0 %v4301_v50  ;;  %3991 = vset.pattern.permute.xlu1 %v4302_v35 }
 0x6c5   : > { %2731 = vperm.xlu2 %3985, %v5779_v60   ;;  %2917 = vperm.xlu0 %3990, %v5789_v43  }
 0x6c6   : > { %2902 = vperm.xlu1 %3991, %v5789_v43  }
 0x6cd   : > { %3986 = vset.pattern.permute.xlu2 %v4307_v10  ;;  %3992 = vset.pattern.permute.xlu0 %v4303_v8 }
 0x6ce   : > { %3993 = vset.pattern.permute.xlu1 %v4306_v40  ;;  %3206 = vperm.xlu2 %3986, %v5779_v60  }
 0x6cf   : > { %2753 = vperm.xlu0 %3992, %v5789_v43   ;;  %2736 = vperm.xlu1 %3993, %v5789_v43  }
 0x6d6   : > { %3995 = vset.pattern.permute.xlu2 %v4305_v41 }
 0x6d7   : > { %3997 = vset.pattern.permute.xlu0 %v4304_v9  ;;  %3994 = vset.pattern.permute.xlu1 %v4307_v10 }
 0x6d8   : > { %3447 = vperm.xlu2 %3995, %v5789_v43   ;;  %3432 = vperm.xlu0 %3997, %v5789_v43  }
 0x6d9   : > { %3209 = vperm.xlu1 %3994, %v5789_v43  }
 0x6e0   : > { %3996 = vset.pattern.permute.xlu2 %v4300_v15  ;;  %4006 = vset.pattern.permute.xlu0 %v4306_v40 }
 0x6e1   : > { %3999 = vrot.lane.b32.xlu1 %v5806_v25, %s4308_s21  ;;  %3194 = vperm.xlu2 %3996, %v5789_v43  }
 0x6e2   : > { %4005 = vset.pattern.permute.xlu1 %v4303_v8 }
 0x6e9   : > { %4003 = vset.pattern.permute.xlu2 %v4301_v50 }
 0x6f1   : > { %v2694_v62 = vpop.f32.mrf.mxu1 }
 0x6f7   : > { %v2723_v14 = vpop.f32.mrf.mxu2 }
 0x6f8   : > { %v5813_v27 = vadd.f32 %v2723_v14, %v2694_v62 }
 0x6fa   : > { %2741 = vperm.xlu0 %4006, %v5813_v27   ;;  %2756 = vperm.xlu1 %4005, %v5813_v27  }
 0x6fb   : > { %2920 = vperm.xlu2 %4003, %v5813_v27  }
 0x6fe   : > { %v2697_v53 = vpop.f32.mrf.mxu1 }
 0x702   : > { %4007 = vset.pattern.permute.xlu1 %v4305_v41  ;;  %4016 = vset.pattern.permute.xlu0 %v4307_v10 }
 0x703   : > { %4004 = vset.pattern.permute.xlu2 %v4302_v35  ;;  %3450 = vperm.xlu1 %4007, %v5813_v27  }
 0x704   : > { %2906 = vperm.xlu2 %4004, %v5813_v27   ;;  %v2726_v16 = vpop.f32.mrf.mxu2 }
 0x705   : > { %v5822_v39 = vadd.f32 %v2726_v16, %v2697_v53 }
 0x707   : > { %3215 = vperm.xlu0 %4016, %v5822_v39  }
 0x70b   : > { %4008 = vset.pattern.permute.xlu1 %v4304_v9 }
 0x70c   : > { %4009 = vset.pattern.permute.xlu2 %v4307_v10  ;;  %3436 = vperm.xlu1 %4008, %v5813_v27   ;;  %v2915_v20 = vpop.permute.xlu2 %2914 }
 0x70d   : > { %3212 = vperm.xlu2 %4009, %v5813_v27   ;;  %v2925_v59 = vperm.slane %v2915_v20, %v6305_v5 }
 0x70f   : > { %4044 = vset.pattern.permute.xlu0 %v4305_v41 }
 0x714   : > { %4010 = vset.pattern.permute.xlu1 %v4300_v15 }
 0x715   : > { %4013 = vset.pattern.permute.xlu2 %v4303_v8  ;;  %3198 = vperm.xlu1 %4010, %v5813_v27   ;;  %v2751_v18 = vpop.permute.xlu2 %2750  ;;  %v5882_v8 = vpack.i.bf16 %v5813_v27, %v5822_v39 }
 0x716   : > { %2759 = vperm.xlu2 %4013, %v5822_v39   ;;  %v2761_v49 = vperm.slane %v2751_v18, %v6305_v5 }
 0x71d   : > { %4011 = vset.pattern.permute.xlu1 %v4301_v50 }
 0x71e   : > { %4014 = vset.pattern.permute.xlu2 %v4306_v40  ;;  %2923 = vperm.xlu1 %4011, %v5822_v39  }
 0x71f   : > { %2746 = vperm.xlu2 %4014, %v5822_v39   ;;  %v2732_v30 = vpop.permute.xlu2 %2731 }
 0x724   : > { %v3191_v2 = vpop.permute.xlu0 %3190 }
 0x725   : > { %v2899_v57 = vpop.permute.xlu1 %2898 }
 0x726   : > { %4012 = vset.pattern.permute.xlu1 %v4302_v35 }
 0x727   : > { %4015 = vset.pattern.permute.xlu2 %v4305_v41  ;;  %2910 = vperm.xlu1 %4012, %v5822_v39  }
 0x728   : > { %3453 = vperm.xlu2 %4015, %v5822_v39   ;;  %v3207_v19 = vpop.permute.xlu2 %3206 }
 0x729   : > { %v3217_v13 = vperm.slane %v3207_v19, %v6305_v5 }
 0x72e   : > { %v3445_v52 = vpop.permute.xlu1 %3444  ;;  %v5839_v48 = vpop.permute.xlu0 %3428 }
 0x72f   : > { %4017 = vset.pattern.permute.xlu1 %v4304_v9  ;;  %v3455_v41 = vperm.slane %v3445_v52, %v6305_v5 }
 0x730   : > { %3440 = vperm.xlu1 %4017, %v5822_v39  }
 0x732   : > { %v3448_v7 = vpop.permute.xlu2 %3447 }
 0x733   : > { %v3456_v50 = vperm.slane %v3448_v7, %v6306_v47 }
 0x735   : > { %v3457_v40 = vsel %vm469_vm1, %v3456_v50, %v3455_v41 }
 0x736   : > { %v3475_v53 = vadd.f32 %v3457_v40, %v5839_v48 }
 0x737   : > { %v2918_v54 = vpop.permute.xlu0 %2917 }
 0x738   : > { %v2903_v45 = vpop.permute.xlu1 %2902  ;;  %v2926_v32 = vperm.slane %v2918_v54, %v6306_v47  ;;  %4018 = vset.pattern.permute.xlu1 %v4300_v15  ;;  %v3483_v52 = vmul.f32 0.2, %v3475_v53  ;;  %vm3479_vm11 = vcmp.gt.f32.partialorder %v3475_v53, 0.0 }
 0x739   : > { %3202 = vperm.xlu1 %4018, %v5822_v39  }
 0x73a   : > { %v2927_v37 = vsel %vm469_vm1, %v2926_v32, %v2925_v59  ;;  %v3487_v59 = vsel %vm3479_vm11, %v3475_v53, %v3483_v52 }
 0x73b   : > { %v2946_v6 = vadd.f32 %v2927_v37, %v2903_v45  ;;  %v2945_v28 = vadd.f32 %v2927_v37, %v2899_v57  ;;  %v3195_v24 = vpop.permute.xlu2 %3194  ;;  %v5909_v32 = vmul.f32 %v5866_v51, %v3487_v59 }
 0x73d   : > { %vm2950_vm5 = vcmp.gt.f32.partialorder %v2946_v6, 0.0  ;;  %v2954_v0 = vmul.f32 0.2, %v2946_v6  ;;  %v2953_v29 = vmul.f32 0.2, %v2945_v28  ;;  %vm2949_vm6 = vcmp.gt.f32.partialorder %v2945_v28, 0.0 }
 0x73f   : > { %v2958_v3 = vsel %vm2950_vm5, %v2946_v6, %v2954_v0  ;;  %v2957_v26 = vsel %vm2949_vm6, %v2945_v28, %v2953_v29  ;;  %v3495_v0 = vsel %vm514_vm3, %v5909_v32, -inf }
 0x740   : > { %v5854_v21 = vmul.f32 %v5851_v17, %v2958_v3  ;;  %v5869_v42 = vmul.f32 %v5866_v51, %v2957_v26 }
 0x741   : > { %v2737_v46 = vpop.permute.xlu1 %2736  ;;  %v2754_v11 = vpop.permute.xlu0 %2753 }
 0x742   : > { %v2762_v12 = vperm.slane %v2754_v11, %v6306_v47  ;;  %v2968_v56 = vsel %vm514_vm3, %v5854_v21, -inf  ;;  %v2965_v44 = vsel %vm514_vm3, %v5869_v42, -inf }
 0x743   : > { %2969 = vmax.xlane.f32.xlu0 %v2968_v56 }
 0x744   : > { %v2763_v36 = vsel %vm469_vm1, %v2762_v12, %v2761_v49 }
 0x745   : > { %v2781_v31 = vadd.f32 %v2763_v36, %v2732_v30  ;;  %v2782_v23 = vadd.f32 %v2763_v36, %v2737_v46 }
 0x747   : > { %v2789_v4 = vmul.f32 0.2, %v2781_v31  ;;  %vm2785_vm7 = vcmp.gt.f32.partialorder %v2781_v31, 0.0  ;;  %v2790_v61 = vmul.f32 0.2, %v2782_v23  ;;  %vm2786_vm10 = vcmp.gt.f32.partialorder %v2782_v23, 0.0 }
 0x749   : > { %v2793_v55 = vsel %vm2785_vm7, %v2781_v31, %v2789_v4  ;;  %v2794_v16 = vsel %vm2786_vm10, %v2782_v23, %v2790_v61 }
 0x74a   : > { %v5876_v22 = vmul.f32 %v5866_v51, %v2793_v55  ;;  %v5899_v57 = vmul.f32 %v5851_v17, %v2794_v16  ;;  %v3433_v30 = vpop.permute.xlu0 %3432 }
 0x74b   : > { %v3210_v58 = vpop.permute.xlu1 %3209  ;;  %v3476_v54 = vadd.f32 %v3457_v40, %v3433_v30 }
 0x74c   : > { %v3218_v1 = vperm.slane %v3210_v58, %v6306_v47  ;;  %v2801_v10 = vsel %vm514_vm3, %v5876_v22, -inf }
 0x74d   : > { %v3484_v19 = vmul.f32 0.2, %v3476_v54  ;;  %vm3480_vm12 = vcmp.gt.f32.partialorder %v3476_v54, 0.0 }
 0x74e   : > { %v3219_v34 = vsel %vm469_vm1, %v3218_v1, %v3217_v13 }
 0x74f   : > { %v3237_v33 = vadd.f32 %v3219_v34, %v3191_v2  ;;  %v3238_v62 = vadd.f32 %v3219_v34, %v3195_v24  ;;  %v3488_v3 = vsel %vm3480_vm12, %v3476_v54, %v3484_v19 }
 0x750   : > { %v5916_v46 = vmul.f32 %v5851_v17, %v3488_v3 }
 0x751   : > { %2966 = vmax.xlane.f32.xlu2 %v2965_v44  ;;  %v3245_v9 = vmul.f32 0.2, %v3237_v33  ;;  %vm3241_vm8 = vcmp.gt.f32.partialorder %v3237_v33, 0.0  ;;  %v3246_v2 = vmul.f32 0.2, %v3238_v62  ;;  %vm3242_vm0 = vcmp.gt.f32.partialorder %v3238_v62, 0.0 }
 0x752   : > { %v3498_v12 = vsel %vm514_vm3, %v5916_v46, -inf }
 0x753   : > { %v4000_v15 = vpop.permute.xlu1 %3999  ;;  %v3249_v14 = vsel %vm3241_vm8, %v3237_v33, %v3245_v9  ;;  %v3250_v48 = vsel %vm3242_vm0, %v3238_v62, %v3246_v2 }
 0x754   : > { %v4001_v35 = vunpack.i.l.bf16 %v4000_v15  ;;  %v4002_v38 = vunpack.i.h.bf16 %v4000_v15  ;;  %v5894_v20 = vmul.f32 %v5866_v51, %v3249_v14  ;;  %v5906_v45 = vmul.f32 %v5851_v17, %v3250_v48 }
 0x755   : > { %v5878_v63 = vpop.permute.xlu2 %2920 }
 0x756   : > { %3087 = vmatpush.msra.mxu3 %v4001_v35  ;;  %v3260_v6 = vsel %vm514_vm3, %v5906_v45, -inf  ;;  %v2928_v62 = vperm.slane %v5878_v63, %v6305_v5 }
 0x757   : > { %4020 = vrot.lane.b32.xlu0 %v5882_v8, %s4308_s21 }
 0x758   : > { %3088 = vmatpush.msra.mxu3 %v4002_v38 }
 0x759   : > { %2802 = vmax.xlane.f32.xlu2 %v2801_v10 }
 0x75a   : > { %3151 = vmatpush.msrb.mxu3 %v5789_v43  ;;  %v3257_v43 = vsel %vm514_vm3, %v5894_v20, -inf }
 0x75c   : > { %3152 = vmatpush.msrb.mxu3 %v5779_v60  ;;  %v2804_v60 = vsel %vm514_vm3, %v5899_v57, -inf }
 0x75e   : > { %v5896_v18 = vpop.permute.xlu2 %2906 }
 0x761   : > { %3258 = vmax.xlane.f32.xlu2 %v3257_v43 }
 0x763   : > { %2805 = vmax.xlane.f32.xlu1 %v2804_v60 }
 0x767   : > { %v3213_v37 = vpop.permute.xlu2 %3212 }
 0x768   : > { %v3220_v33 = vperm.slane %v3213_v37, %v6305_v5 }
 0x769   : > { %3261 = vmax.xlane.f32.xlu2 %v3260_v6 }
 0x76b   : > { %3496 = vmax.xlane.f32.xlu1 %v3495_v0 }
 0x76c   : > { %v2757_v28 = vpop.permute.xlu1 %2756  ;;  %v2742_v29 = vpop.permute.xlu0 %2741 }
 0x76d   : > { %v2764_v49 = vperm.slane %v2757_v28, %v6305_v5 }
 0x770   : > { %v2760_v11 = vpop.permute.xlu2 %2759 }
 0x771   : > { %v2765_v56 = vperm.slane %v2760_v11, %v6306_v47 }
 0x773   : > { %3499 = vmax.xlane.f32.xlu1 %v3498_v12  ;;  %v2766_v36 = vsel %vm469_vm1, %v2765_v56, %v2764_v49 }
 0x774   : > { %v2783_v59 = vadd.f32 %v2766_v36, %v2742_v29 }
 0x775   : > { %v3451_v7 = vpop.permute.xlu1 %3450 }
 0x776   : > { %v3458_v61 = vperm.slane %v3451_v7, %v6305_v5 }
 0x779   : > { %v2747_v31 = vpop.permute.xlu2 %2746  ;;  %v3216_v4 = vpop.permute.xlu0 %3215 }
 0x77a   : > { %v2784_v26 = vadd.f32 %v2766_v36, %v2747_v31  ;;  %v3221_v44 = vperm.slane %v3216_v4, %v6306_v47 }
 0x77c   : > { %vm2788_vm13 = vcmp.gt.f32.partialorder %v2784_v26, 0.0  ;;  %v2792_v58 = vmul.f32 0.2, %v2784_v26  ;;  %v3222_v23 = vsel %vm469_vm1, %v3221_v44, %v3220_v33 }
 0x77e   : > { %v3437_v13 = vpop.permute.xlu1 %3436  ;;  %v2796_v1 = vsel %vm2788_vm13, %v2784_v26, %v2792_v58 }
 0x77f   : > { %v5924_v24 = vmul.f32 %v5851_v17, %v2796_v1 }
 0x781   : > { %v2810_v34 = vsel %vm514_vm3, %v5924_v24, -inf }
 0x782   : > { %2811 = vmax.xlane.f32.xlu0 %v2810_v34  ;;  %v3454_v50 = vpop.permute.xlu2 %3453 }
 0x783   : > { %v3459_v41 = vperm.slane %v3454_v50, %v6306_v47 }
 0x785   : > { %v3460_v53 = vsel %vm469_vm1, %v3459_v41, %v3458_v61 }
 0x786   : > { %v3477_v52 = vadd.f32 %v3460_v53, %v3437_v13 }
 0x787   : > { %v3199_v55 = vpop.permute.xlu1 %3198 }
 0x788   : > { %v3239_v15 = vadd.f32 %v3222_v23, %v3199_v55  ;;  %v3485_v48 = vmul.f32 0.2, %v3477_v52  ;;  %vm3481_vm9 = vcmp.gt.f32.partialorder %v3477_v52, 0.0 }
 0x78a   : > { %vm3243_vm14 = vcmp.gt.f32.partialorder %v3239_v15, 0.0  ;;  %v3247_v35 = vmul.f32 0.2, %v3239_v15  ;;  %v3489_v19 = vsel %vm3481_vm9, %v3477_v52, %v3485_v48 }
 0x78b   : > { %v5953_v0 = vmul.f32 %v5866_v51, %v3489_v19 }
 0x78c   : > { %v3251_v9 = vsel %vm3243_vm14, %v3239_v15, %v3247_v35 }
 0x78d   : > { %v5933_v38 = vmul.f32 %v5866_v51, %v3251_v9  ;;  %v3501_v56 = vsel %vm514_vm3, %v5953_v0, -inf }
 0x78f   : > { %v3263_v40 = vsel %vm514_vm3, %v5933_v38, -inf }
 0x790   : > { %v2924_v10 = vpop.permute.xlu1 %2923  ;;  %3264 = vmax.xlane.f32.xlu0 %v3263_v40 }
 0x791   : > { %v2929_v14 = vperm.slane %v2924_v10, %v6306_v47 }
 0x793   : > { %v2930_v16 = vsel %vm469_vm1, %v2929_v14, %v2928_v62  ;;  %vm2787_vm1 = vcmp.gt.f32.partialorder %v2783_v59, 0.0 }
 0x794   : > { %v2947_v2 = vadd.f32 %v2930_v16, %v5896_v18  ;;  %v2791_v18 = vmul.f32 0.2, %v2783_v59 }
 0x796   : > { %v2955_v30 = vmul.f32 0.2, %v2947_v2  ;;  %vm2951_vm15 = vcmp.gt.f32.partialorder %v2947_v2, 0.0  ;;  %v2795_v11 = vsel %vm2787_vm1, %v2783_v59, %v2791_v18 }
 0x797   : > { %v5960_v49 = vmul.f32 %v5866_v51, %v2795_v11 }
 0x798   : > { %v2959_v43 = vsel %vm2951_vm15, %v2947_v2, %v2955_v30 }
 0x799   : > { %v2911_v60 = vpop.permute.xlu1 %2910  ;;  %v5945_v54 = vmul.f32 %v5866_v51, %v2959_v43  ;;  %v2807_v31 = vsel %vm514_vm3, %v5960_v49, -inf }
 0x79a   : > { %v2948_v5 = vadd.f32 %v2930_v16, %v2911_v60 }
 0x79b   : > { %v2971_v47 = vsel %vm514_vm3, %v5945_v54, -inf }
 0x79c   : > { %vm2952_vm2 = vcmp.gt.f32.partialorder %v2948_v5, 0.0  ;;  %v2956_v63 = vmul.f32 0.2, %v2948_v5  ;;  %2972 = vmax.xlane.f32.xlu1 %v2971_v47 }
 0x79e   : > { %v2960_v37 = vsel %vm2952_vm2, %v2948_v5, %v2956_v63 }
 0x79f   : > { %v5950_v6 = vmul.f32 %v5851_v17, %v2960_v37 }
 0x7a1   : > { %v2974_v3 = vsel %vm514_vm3, %v5950_v6, -inf }
 0x7a2   : > { %v3441_v28 = vpop.permute.xlu1 %3440  ;;  %2975 = vmax.xlane.f32.xlu2 %v2974_v3 }
 0x7a3   : > { %v3478_v12 = vadd.f32 %v3460_v53, %v3441_v28 }
 0x7a4   : > { %3502 = vmax.xlane.f32.xlu1 %v3501_v56 }
 0x7a5   : > { %vm3482_vm4 = vcmp.gt.f32.partialorder %v3478_v12, 0.0  ;;  %v3486_v7 = vmul.f32 0.2, %v3478_v12 }
 0x7a7   : > { %v3490_v29 = vsel %vm3482_vm4, %v3478_v12, %v3486_v7 }
 0x7a8   : > { %v5963_v36 = vmul.f32 %v5851_v17, %v3490_v29 }
 0x7aa   : > { %2808 = vmax.xlane.f32.xlu2 %v2807_v31  ;;  %v3504_v26 = vsel %vm514_vm3, %v5963_v36, -inf }
 0x7ab   : > { %v3203_v58 = vpop.permute.xlu1 %3202  ;;  %3505 = vmax.xlane.f32.xlu0 %v3504_v26 }
 0x7ac   : > { %v3240_v13 = vadd.f32 %v3222_v23, %v3203_v58 }
 0x7ae   : > { %vm3244_vm5 = vcmp.gt.f32.partialorder %v3240_v13, 0.0  ;;  %v3248_v1 = vmul.f32 0.2, %v3240_v13 }
 0x7b0   : > { %v3252_v4 = vsel %vm3244_vm5, %v3240_v13, %v3248_v1 }
 0x7b1   : > { %v5970_v51 = vmul.f32 %v5851_v17, %v3252_v4 }
 0x7b3   : > { %v3266_v34 = vsel %vm514_vm3, %v5970_v51, -inf }
 0x7b4   : > { %3267 = vmax.xlane.f32.xlu2 %v3266_v34 }
 0x7b6   : > { %v2970_v44 = vpop.xlane.xlu0 %2969 }
 0x7b7   : > { %v2978_v10 = vsub.f32 %v5854_v21, %v2970_v44 }
 0x7b9   : > { %v2983_v16 = vmul.f32 1.442695, %v2978_v10 }
 0x7bd   : > { %4025 = vrot.lane.b32.xlu1 %v5806_v25, %s4309_s28 }
 0x7c4   : > { %v2967_v33 = vpop.xlane.xlu2 %2966 }
 0x7c5   : > { %v2977_v55 = vsub.f32 %v5869_v42, %v2967_v33 }
 0x7c7   : > { %v2981_v15 = vmul.f32 1.442695, %v2977_v55 }
 0x7c9   : > { %4200 = vpow2.f32 %v2981_v15  ;;  %v4021_v23 = vpop.permute.xlu0 %4020 }
 0x7ca   : > { %v4022_v50 = vunpack.i.l.bf16 %v4021_v23  ;;  %v4023_v35 = vunpack.i.h.bf16 %v4021_v23 }
 0x7cc   : > { %v2803_v9 = vpop.xlane.xlu2 %2802  ;;  %3122 = vmatpush.msrb.mxu0 %v4022_v50 }
 0x7cd   : > { %v2813_v17 = vsub.f32 %v5876_v22, %v2803_v9 }
 0x7ce   : > { %3123 = vmatpush.msrb.mxu0 %v4023_v35 }
 0x7cf   : > { %v5978_v41 = vpop.eup %4200  ;;  %v2817_v61 = vmul.f32 1.442695, %v2813_v17 }
 0x7d0   : > { %3180 = vmatpush.msra.mxu0 %v5822_v39  ;;  %v2989_v40 = vsel %vm514_vm3, %v5978_v41, 0.0 }
 0x7d1   : > { %4202 = vpow2.f32 %v2817_v61  ;;  %2990 = vadd.xlane.f32.xlu0 %v2989_v40 }
 0x7d2   : > { %3181 = vmatpush.msra.mxu0 %v5813_v27 }
 0x7d4   : > { %v3259_v42 = vpop.xlane.xlu2 %3258 }
 0x7d5   : > { %v3269_v53 = vsub.f32 %v5894_v20, %v3259_v42 }
 0x7d6   : > { %v2806_v62 = vpop.xlane.xlu1 %2805 }
 0x7d7   : > { %v5985_v14 = vpop.eup %4202  ;;  %v2814_v22 = vsub.f32 %v5899_v57, %v2806_v62  ;;  %v3273_v52 = vmul.f32 1.442695, %v3269_v53 }
 0x7d8   : > { %v2825_v39 = vsel %vm514_vm3, %v5985_v14, 0.0 }
 0x7d9   : > { %v2819_v2 = vmul.f32 1.442695, %v2814_v22  ;;  %2826 = vadd.xlane.f32.xlu2 %v2825_v39 }
 0x7db   : > { %4204 = vpow2.f32 %v2819_v2 }
 0x7dc   : > { %v3262_v30 = vpop.xlane.xlu2 %3261  ;;  %4206 = vpow2.f32 %v2983_v16 }
 0x7dd   : > { %v3270_v27 = vsub.f32 %v5906_v45, %v3262_v30  ;;  %4208 = vpow2.f32 %v3273_v52 }
 0x7de   : > { %v3497_v21 = vpop.xlane.xlu1 %3496 }
 0x7df   : > { %v3275_v43 = vmul.f32 1.442695, %v3270_v27  ;;  %v3507_v20 = vsub.f32 %v5909_v32, %v3497_v21 }
 0x7e1   : > { %v5992_v48 = vpop.eup %4204  ;;  %4210 = vpow2.f32 %v3275_v43  ;;  %v3511_v59 = vmul.f32 1.442695, %v3507_v20 }
 0x7e2   : > { %v2828_v57 = vsel %vm514_vm3, %v5992_v48, 0.0  ;;  %v5997_v60 = vpop.eup %4206 }
 0x7e3   : > { %2829 = vadd.xlane.f32.xlu2 %v2828_v57  ;;  %v5999_v5 = vpop.eup %4208  ;;  %v2992_v45 = vsel %vm514_vm3, %v5997_v60, 0.0  ;;  %4212 = vpow2.f32 %v3511_v59 }
 0x7e4   : > { %v3281_v18 = vsel %vm514_vm3, %v5999_v5, 0.0 }
 0x7e6   : > { %v3500_v47 = vpop.xlane.xlu1 %3499 }
 0x7e7   : > { %v6003_v63 = vpop.eup %4210  ;;  %2993 = vadd.xlane.f32.xlu1 %v2992_v45  ;;  %v3508_v32 = vsub.f32 %v5916_v46, %v3500_v47 }
 0x7e8   : > { %v3284_v19 = vsel %vm514_vm3, %v6003_v63, 0.0 }
 0x7e9   : > { %3285 = vadd.xlane.f32.xlu0 %v3284_v19  ;;  %v3513_v37 = vmul.f32 1.442695, %v3508_v32  ;;  %v6010_v3 = vpop.eup %4212 }
 0x7ea   : > { %v3519_v28 = vsel %vm514_vm3, %v6010_v3, 0.0 }
 0x7eb   : > { %3282 = vadd.xlane.f32.xlu2 %v3281_v18  ;;  %4214 = vpow2.f32 %v3513_v37 }
 0x7f1   : > { %v6014_v11 = vpop.eup %4214 }
 0x7f2   : > { %v3522_v12 = vsel %vm514_vm3, %v6014_v11, 0.0 }
 0x7f3   : > { %3520 = vadd.xlane.f32.xlu2 %v3519_v28 }
 0x7f5   : > { %v2812_v46 = vpop.xlane.xlu0 %2811 }
 0x7f6   : > { %v2816_v29 = vsub.f32 %v5924_v24, %v2812_v46 }
 0x7f8   : > { %v2823_v26 = vmul.f32 1.442695, %v2816_v29 }
 0x7fb   : > { %3523 = vadd.xlane.f32.xlu2 %v3522_v12 }
 0x803   : > { %v3265_v13 = vpop.xlane.xlu0 %3264 }
 0x804   : > { %v3271_v33 = vsub.f32 %v5933_v38, %v3265_v13 }
 0x806   : > { %v3277_v15 = vmul.f32 1.442695, %v3271_v33 }
 0x80f   : > { %v2973_v56 = vpop.xlane.xlu1 %2972 }
 0x810   : > { %v2979_v7 = vsub.f32 %v5945_v54, %v2973_v56 }
 0x812   : > { %v2985_v31 = vmul.f32 1.442695, %v2979_v7 }
 0x814   : > { %4216 = vpow2.f32 %v2985_v31 }
 0x815   : > { %v2976_v58 = vpop.xlane.xlu2 %2975  ;;  %4218 = vpow2.f32 %v2823_v26 }
 0x816   : > { %v2980_v1 = vsub.f32 %v5950_v6, %v2976_v58 }
 0x817   : > { %v3503_v4 = vpop.xlane.xlu1 %3502 }
 0x818   : > { %v2987_v34 = vmul.f32 1.442695, %v2980_v1  ;;  %v3509_v44 = vsub.f32 %v5953_v0, %v3503_v4 }
 0x81a   : > { %v6023_v55 = vpop.eup %4216  ;;  %4220 = vpow2.f32 %v2987_v34  ;;  %v3515_v54 = vmul.f32 1.442695, %v3509_v44 }
 0x81b   : > { %v2995_v24 = vsel %vm514_vm3, %v6023_v55, 0.0  ;;  %v6028_v50 = vpop.eup %4218 }
 0x81c   : > { %4222 = vpow2.f32 %v3515_v54  ;;  %2996 = vadd.xlane.f32.xlu2 %v2995_v24 }
 0x81d   : > { %v2809_v23 = vpop.xlane.xlu2 %2808  ;;  %4224 = vpow2.f32 %v3277_v15 }
 0x81e   : > { %v2815_v6 = vsub.f32 %v5960_v49, %v2809_v23  ;;  %v3506_v35 = vpop.xlane.xlu0 %3505  ;;  %v2834_v49 = vsel %vm514_vm3, %v6028_v50, 0.0 }
 0x81f   : > { %v3510_v61 = vsub.f32 %v5963_v36, %v3506_v35 }
 0x820   : > { %v6030_v0 = vpop.eup %4220  ;;  %v2821_v9 = vmul.f32 1.442695, %v2815_v6 }
 0x821   : > { %v2998_v38 = vsel %vm514_vm3, %v6030_v0, 0.0  ;;  %v3517_v42 = vmul.f32 1.442695, %v3510_v61 }
 0x822   : > { %v6034_v17 = vpop.eup %4222  ;;  %4226 = vpow2.f32 %v2821_v9  ;;  %2999 = vadd.xlane.f32.xlu0 %v2998_v38 }
 0x823   : > { %v3525_v40 = vsel %vm514_vm3, %v6034_v17, 0.0  ;;  %v6041_v10 = vpop.eup %4224  ;;  %4228 = vpow2.f32 %v3517_v42 }
 0x824   : > { %3526 = vadd.xlane.f32.xlu1 %v3525_v40  ;;  %2835 = vadd.xlane.f32.xlu2 %v2834_v49  ;;  %v3287_v39 = vsel %vm514_vm3, %v6041_v10, 0.0 }
 0x827   : > { %v3268_v62 = vpop.xlane.xlu2 %3267 }
 0x828   : > { %v6043_v22 = vpop.eup %4226  ;;  %v3272_v36 = vsub.f32 %v5970_v51, %v3268_v62 }
 0x829   : > { %v2831_v53 = vsel %vm514_vm3, %v6043_v22, 0.0  ;;  %v6050_v2 = vpop.eup %4228 }
 0x82a   : > { %2832 = vadd.xlane.f32.xlu0 %v2831_v53  ;;  %v3279_v16 = vmul.f32 1.442695, %v3272_v36  ;;  %v3528_v52 = vsel %vm514_vm3, %v6050_v2, 0.0 }
 0x82c   : > { %3288 = vadd.xlane.f32.xlu2 %v3287_v39  ;;  %4230 = vpow2.f32 %v3279_v16 }
 0x82f   : > { %v4026_v19 = vpop.permute.xlu1 %4025 }
 0x830   : > { %v4027_v12 = vunpack.i.l.bf16 %v4026_v19  ;;  %v4028_v56 = vunpack.i.h.bf16 %v4026_v19 }
 0x832   : > { %v6054_v30 = vpop.eup %4230 }
 0x833   : > { %v3290_v27 = vsel %vm514_vm3, %v6054_v30, 0.0 }
 0x834   : > { %3529 = vadd.xlane.f32.xlu2 %v3528_v52 }
 0x83c   : > { %3291 = vadd.xlane.f32.xlu2 %v3290_v27 }
 0x83d   : > { %4040 = vrot.lane.b32.xlu1 %v5806_v25, %s4310_s30 }
 0x83e   : > { %4035 = vrot.lane.b32.xlu0 %v5882_v8, %s4309_s28 }
 0x844   : > { %v2991_v51 = vpop.xlane.xlu0 %2990 }
 0x845   : > { %4232 = vrcp.f32 %v2991_v51  ;;  %v3012_v57 = vand.u32 2147483648, %v2991_v51  ;;  %v3010_v47 = vand.u32 2147483647, %v2991_v51  ;;  %vm3006_vm7 = vweird.f32 %v2991_v51 }
 0x847   : > { %v3013_v18 = vor.u32 1.1754944e-38, %v3012_v57  ;;  %vm3011_vm10 = vcmp.eq.f32.partialorder %v3010_v47, 8.507059e+37 }
 0x84b   : > { %v4233_v21 = vpop.eup %4232 }
 0x84c   : > { %v3002_v43 = vmul.f32 %v4233_v21, %v2991_v51  ;;  %vm3007_vm6 = vweird.f32 %v4233_v21  ;;  %v2827_v45 = vpop.xlane.xlu2 %2826 }
 0x84d   : > { %vm3008_vm8 = vmor %vm3006_vm7, %vm3007_vm6  ;;  %4234 = vrcp.f32 %v2827_v45  ;;  %v2848_v61 = vand.u32 2147483648, %v2827_v45  ;;  %vm2842_vm15 = vweird.f32 %v2827_v45  ;;  %v2846_v49 = vand.u32 2147483647, %v2827_v45 }
 0x84e   : > { %v3003_v20 = vsub.f32 1.0, %v3002_v43 }
 0x84f   : > { %v2849_v39 = vor.u32 1.1754944e-38, %v2848_v61  ;;  %vm2847_vm2 = vcmp.eq.f32.partialorder %v2846_v49, 8.507059e+37 }
 0x850   : > { %v3004_v59 = vmul.f32 %v4233_v21, %v3003_v20 }
 0x852   : > { %v3005_v32 = vadd.f32 %v4233_v21, %v3004_v59 }
 0x853   : > { %v4235_v7 = vpop.eup %4234 }
 0x854   : > { %v3009_v37 = vsel %vm3008_vm8, %v4233_v21, %v3005_v32  ;;  %4030 = vrot.lane.b32.xlu2 %v5882_v8, %s4310_s30  ;;  %v2838_v31 = vmul.f32 %v4235_v7, %v2827_v45  ;;  %vm2843_vm12 = vweird.f32 %v4235_v7 }
 0x855   : > { %v3014_v25 = vsel %vm3011_vm10, %v3013_v18, %v3009_v37  ;;  %vm2844_vm9 = vmor %vm2842_vm15, %vm2843_vm12 }
 0x856   : > { %v3015_v28 = vmul.f32 %v5978_v41, %v3014_v25  ;;  %v2830_v46 = vpop.xlane.xlu2 %2829  ;;  %v2839_v58 = vsub.f32 1.0, %v2838_v31 }
 0x857   : > { %v2863_v21 = vand.u32 2147483648, %v2830_v46  ;;  %vm2857_vm4 = vweird.f32 %v2830_v46 }
 0x858   : > { %3803 = vmatmul.msk.f32.vlgmr.msra.gmra.mxu3 %vm514_vm3, %v3015_v28  ;;  %v2840_v41 = vmul.f32 %v4235_v7, %v2839_v58 }
 0x859   : > { %3379 = vmatpush.msra.mxu3 %v4027_v12  ;;  %v2864_v47 = vor.u32 1.1754944e-38, %v2863_v21 }
 0x85a   : > { %v2994_v29 = vpop.xlane.xlu1 %2993  ;;  %v2841_v23 = vadd.f32 %v4235_v7, %v2840_v41 }
 0x85b   : > { %3380 = vmatpush.msra.mxu3 %v4028_v56  ;;  %4236 = vrcp.f32 %v2994_v29  ;;  %v3027_v34 = vand.u32 2147483648, %v2994_v29  ;;  %v3025_v54 = vand.u32 2147483647, %v2994_v29  ;;  %vm3021_vm11 = vweird.f32 %v2994_v29 }
 0x85c   : > { %4238 = vrcp.f32 %v2830_v46  ;;  %v3286_v35 = vpop.xlane.xlu0 %3285  ;;  %v2845_v62 = vsel %vm2844_vm9, %v4235_v7, %v2841_v23 }
 0x85d   : > { %v3028_v15 = vor.u32 1.1754944e-38, %v3027_v34  ;;  %vm3026_vm14 = vcmp.eq.f32.partialorder %v3025_v54, 8.507059e+37  ;;  %v2850_v16 = vsel %vm2847_vm2, %v2849_v39, %v2845_v62  ;;  %vm3313_vm12 = vweird.f32 %v3286_v35 }
 0x85e   : > { %v6064_v1 = vpop.xlane.xlu2 %3282  ;;  %v2851_v43 = vmul.f32 %v5985_v14, %v2850_v16 }
 0x85f   : > { %4240 = vrcp.f32 %v6064_v1  ;;  %v3304_v18 = vand.u32 2147483648, %v6064_v1  ;;  %vm3298_vm8 = vweird.f32 %v6064_v1  ;;  %v3302_v37 = vand.u32 2147483647, %v6064_v1 }
 0x860   : > { %4242 = vrcp.f32 %v3286_v35 }
 0x861   : > { %v4237_v26 = vpop.eup %4236 }
 0x862   : > { %v3017_v13 = vmul.f32 %v4237_v26, %v2994_v29  ;;  %v4239_v8 = vpop.eup %4238  ;;  %vm3022_vm0 = vweird.f32 %v4237_v26  ;;  %v3319_v29 = vand.u32 2147483648, %v3286_v35 }
 0x863   : > { %v2853_v44 = vmul.f32 %v4239_v8, %v2830_v46  ;;  %vm3023_vm13 = vmor %vm3021_vm11, %vm3022_vm0  ;;  %vm2858_vm1 = vweird.f32 %v4239_v8  ;;  %vm3303_vm0 = vcmp.eq.f32.partialorder %v3302_v37, 8.507059e+37 }
 0x864   : > { %v3018_v4 = vsub.f32 1.0, %v3017_v13  ;;  %vm2859_vm5 = vmor %vm2857_vm4, %vm2858_vm1  ;;  %v3320_v58 = vor.u32 1.1754944e-38, %v3319_v29 }
 0x865   : > { %v2854_v6 = vsub.f32 1.0, %v2853_v44  ;;  %v4241_v38 = vpop.eup %4240 }
 0x866   : > { %v3019_v33 = vmul.f32 %v4237_v26, %v3018_v4  ;;  %v3294_v36 = vmul.f32 %v4241_v38, %v6064_v1  ;;  %v4243_v51 = vpop.eup %4242  ;;  %vm3299_vm7 = vweird.f32 %v4241_v38  ;;  %v6076_v25 = vpop.xlane.xlu2 %3520 }
 0x867   : > { %v2855_v53 = vmul.f32 %v4239_v8, %v2854_v6  ;;  %v3309_v20 = vmul.f32 %v4243_v51, %v3286_v35  ;;  %vm3300_vm10 = vmor %vm3298_vm8, %vm3299_vm7  ;;  %vm3314_vm11 = vweird.f32 %v4243_v51  ;;  %v3542_v37 = vand.u32 2147483648, %v6076_v25 }
 0x868   : > { %v3020_v24 = vadd.f32 %v4237_v26, %v3019_v33  ;;  %v3295_v52 = vsub.f32 1.0, %v3294_v36 }
 0x869   : > { %v2856_v27 = vadd.f32 %v4239_v8, %v2855_v53  ;;  %v3310_v19 = vsub.f32 1.0, %v3309_v20 }
 0x86a   : > { %v3024_v9 = vsel %vm3023_vm13, %v4237_v26, %v3020_v24  ;;  %v3296_v57 = vmul.f32 %v4241_v38, %v3295_v52  ;;  %v3317_v26 = vand.u32 2147483647, %v3286_v35  ;;  %vm3315_vm13 = vmor %vm3313_vm12, %vm3314_vm11 }
 0x86b   : > { %v3029_v40 = vsel %vm3026_vm14, %v3028_v15, %v3024_v9  ;;  %v2860_v59 = vsel %vm2859_vm5, %v4239_v8, %v2856_v27  ;;  %v3311_v28 = vmul.f32 %v4243_v51, %v3310_v19 }
 0x86c   : > { %v3030_v42 = vmul.f32 %v5997_v60, %v3029_v40  ;;  %v2861_v60 = vand.u32 2147483647, %v2830_v46  ;;  %v3297_v32 = vadd.f32 %v4241_v38, %v3296_v57  ;;  %v3305_v46 = vor.u32 1.1754944e-38, %v3304_v18 }
 0x86d   : > { %v3312_v7 = vadd.f32 %v4243_v51, %v3311_v28  ;;  %vm3318_vm14 = vcmp.eq.f32.partialorder %v3317_v26, 8.507059e+37 }
 0x86e   : > { %3804 = vmatmul.msk.f32.gmra.mxu3 %vm514_vm3, %v3030_v42  ;;  %vm2862_vm6 = vcmp.eq.f32.partialorder %v2861_v60, 8.507059e+37  ;;  %v3301_v12 = vsel %vm3300_vm10, %v4241_v38, %v3297_v32  ;;  %v6081_v13 = vpop.xlane.xlu2 %3523  ;;  %vm3536_vm10 = vweird.f32 %v6076_v25 }
 0x86f   : > { %v2865_v45 = vsel %vm2862_vm6, %v2864_v47, %v2860_v59  ;;  %v3306_v56 = vsel %vm3303_vm0, %v3305_v46, %v3301_v12  ;;  %v3540_v47 = vand.u32 2147483647, %v6076_v25 }
 0x870   : > { %v2866_v14 = vmul.f32 %v5992_v48, %v2865_v45  ;;  %v3307_v31 = vmul.f32 %v5999_v5, %v3306_v56  ;;  %v3316_v48 = vsel %vm3315_vm13, %v4243_v51, %v3312_v7  ;;  %vm3551_vm13 = vweird.f32 %v6081_v13 }
 0x871   : > { %v3321_v1 = vsel %vm3318_vm14, %v3320_v58, %v3316_v48  ;;  %vm6126_vm0 = vcmp.eq.f32.partialorder %v3540_v47, 8.507059e+37 }
 0x872   : > { %v3322_v8 = vmul.f32 %v6003_v63, %v3321_v1 }
 0x876   : > { %3807 = vmatmul.msk.f32.vlgmr.msrb.gmra.mxu3 %vm514_vm3, %v2851_v43 }
 0x87e   : > { %3808 = vmatmul.msk.f32.gmra.mxu3 %vm514_vm3, %v2866_v14 }
 0x886   : > { %3811 = vmatmul.msk.f32.vlgmr.msra.gmra.mxu3 %vm514_vm3, %v3307_v31 }
 0x88e   : > { %3812 = vmatmul.msk.f32.gmra.mxu3 %vm514_vm3, %v3322_v8  ;;  %v3543_v8 = vor.u32 1.1754944e-38, %v3542_v37 }
 0x88f   : > { %v2997_v4 = vpop.xlane.xlu2 %2996 }
 0x890   : > { %4244 = vrcp.f32 %v2997_v4  ;;  %v3042_v15 = vand.u32 2147483648, %v2997_v4  ;;  %v3040_v6 = vand.u32 2147483647, %v2997_v4  ;;  %vm3036_vm9 = vweird.f32 %v2997_v4 }
 0x891   : > { %4246 = vrcp.f32 %v6076_v25 }
 0x892   : > { %v3043_v40 = vor.u32 1.1754944e-38, %v3042_v15  ;;  %vm3041_vm1 = vcmp.eq.f32.partialorder %v3040_v6, 8.507059e+37 }
 0x895   : > { %v3000_v41 = vpop.xlane.xlu0 %2999 }
 0x896   : > { %v4245_v5 = vpop.eup %4244  ;;  %4248 = vrcp.f32 %v3000_v41  ;;  %v3057_v27 = vand.u32 2147483648, %v3000_v41  ;;  %v3055_v60 = vand.u32 2147483647, %v3000_v41  ;;  %vm3051_vm5 = vweird.f32 %v3000_v41 }
 0x897   : > { %v6086_v34 = vpop.eup %4246  ;;  %v3032_v44 = vmul.f32 %v4245_v5, %v2997_v4  ;;  %v6088_v33 = vpop.xlane.xlu2 %2835  ;;  %4250 = vrcp.f32 %v6081_v13  ;;  %vm3037_vm15 = vweird.f32 %v4245_v5 }
 0x898   : > { %v6091_v24 = vpop.xlane.xlu1 %3526  ;;  %v3532_v63 = vmul.f32 %v6086_v34, %v6076_v25  ;;  %4252 = vrcp.f32 %v6088_v33  ;;  %vm3038_vm2 = vmor %vm3036_vm9, %vm3037_vm15  ;;  %v3058_v19 = vor.u32 1.1754944e-38, %v3057_v27  ;;  %vm3056_vm7 = vcmp.eq.f32.partialorder %v3055_v60, 8.507059e+37 }
 0x899   : > { %v3033_v54 = vsub.f32 1.0, %v3032_v44  ;;  %4254 = vrcp.f32 %v6091_v24  ;;  %vm3537_vm8 = vweird.f32 %v6086_v34  ;;  %v2893_v60 = vand.u32 2147483648, %v6088_v33 }
 0x89a   : > { %v3533_v42 = vsub.f32 1.0, %v3532_v63  ;;  %vm6134_vm12 = vmor %vm3536_vm10, %vm3537_vm8 }
 0x89b   : > { %v3034_v23 = vmul.f32 %v4245_v5, %v3033_v54  ;;  %v3557_v54 = vand.u32 2147483648, %v6081_v13 }
 0x89c   : > { %v4249_v35 = vpop.eup %4248  ;;  %v3534_v20 = vmul.f32 %v6086_v34, %v3533_v42 }
 0x89d   : > { %v3035_v9 = vadd.f32 %v4245_v5, %v3034_v23  ;;  %v3047_v38 = vmul.f32 %v4249_v35, %v3000_v41  ;;  %v6097_v61 = vpop.xlane.xlu0 %2832  ;;  %v6100_v49 = vpop.eup %4250  ;;  %vm3052_vm4 = vweird.f32 %v4249_v35 }
 0x89e   : > { %4256 = vrcp.f32 %v6097_v61  ;;  %v6104_v16 = vpop.eup %4252  ;;  %v3547_v21 = vmul.f32 %v6100_v49, %v6081_v13  ;;  %vm3053_vm6 = vmor %vm3051_vm5, %vm3052_vm4  ;;  %v3535_v28 = vadd.f32 %v6086_v34, %v3534_v20  ;;  %v2878_v58 = vand.u32 2147483648, %v6097_v61 }
 0x89f   : > { %v3039_v62 = vsel %vm3038_vm2, %v4245_v5, %v3035_v9  ;;  %v3048_v53 = vsub.f32 1.0, %v3047_v38  ;;  %v6102_v36 = vpop.xlane.xlu2 %3288  ;;  %v6106_v51 = vpop.eup %4254  ;;  %v2883_v45 = vmul.f32 %v6104_v16, %v6088_v33  ;;  %v2876_v4 = vand.u32 2147483647, %v6097_v61 }
 0x8a0   : > { %v3044_v39 = vsel %vm3041_vm1, %v3043_v40, %v3039_v62  ;;  %4258 = vrcp.f32 %v6102_v36  ;;  %v3548_v14 = vsub.f32 1.0, %v3547_v21  ;;  %v3539_v5 = vsel %vm6134_vm12, %v6086_v34, %v3535_v28 }
 0x8a1   : > { %v3049_v52 = vmul.f32 %v4249_v35, %v3048_v53  ;;  %v3045_v43 = vmul.f32 %v6023_v55, %v3044_v39  ;;  %v3562_v55 = vmul.f32 %v6106_v51, %v6091_v24  ;;  %v2884_v29 = vsub.f32 1.0, %v2883_v45 }
 0x8a2   : > { %v3549_v25 = vmul.f32 %v6100_v49, %v3548_v14  ;;  %vm2872_vm14 = vweird.f32 %v6097_v61  ;;  %v2879_v6 = vor.u32 1.1754944e-38, %v2878_v58  ;;  %vm3552_vm9 = vweird.f32 %v6100_v49 }
 0x8a3   : > { %v3050_v57 = vadd.f32 %v4249_v35, %v3049_v52  ;;  %3805 = vmatmul.msk.f32.vlgmr.msrb.gmra.mxu0 %vm514_vm3, %v3045_v43  ;;  %v3563_v26 = vsub.f32 1.0, %v3562_v55  ;;  %v2885_v63 = vmul.f32 %v6104_v16, %v2884_v29  ;;  %v3544_v9 = vsel %vm6126_vm0, %v3543_v8, %v3539_v5 }
 0x8a4   : > { %v4257_v59 = vpop.eup %4256  ;;  %v3572_v38 = vand.u32 2147483648, %v6091_v24  ;;  %vm2877_vm2 = vcmp.eq.f32.partialorder %v2876_v4, 8.507059e+37  ;;  %vm2887_vm1 = vweird.f32 %v6088_v33  ;;  %vm2888_vm4 = vweird.f32 %v6104_v16 }
 0x8a5   : > { %v2868_v32 = vmul.f32 %v4257_v59, %v6097_v61  ;;  %v3054_v18 = vsel %vm3053_vm6, %v4249_v35, %v3050_v57  ;;  %vm2873_vm11 = vweird.f32 %v4257_v59  ;;  %v3564_v23 = vmul.f32 %v6106_v51, %v3563_v26  ;;  %vm6177_vm6 = vmor %vm3551_vm13, %vm3552_vm9 }
 0x8a6   : > { %v3059_v56 = vsel %vm3056_vm7, %v3058_v19, %v3054_v18  ;;  %v6131_v31 = vpop.eup %4258  ;;  %vm2874_vm15 = vmor %vm2872_vm14, %vm2873_vm11  ;;  %v3550_v61 = vadd.f32 %v6100_v49, %v3549_v25  ;;  %v2886_v21 = vadd.f32 %v6104_v16, %v2885_v63  ;;  %vm3567_vm5 = vweird.f32 %v6106_v51 }
 0x8a7   : > { %v2869_v12 = vsub.f32 1.0, %v2868_v32  ;;  %v6123_v46 = vpop.xlane.xlu2 %3529  ;;  %v3060_v41 = vmul.f32 %v6030_v0, %v3059_v56  ;;  %v3324_v15 = vmul.f32 %v6131_v31, %v6102_v36  ;;  %v3555_v0 = vand.u32 2147483647, %v6081_v13  ;;  %vm6188_vm8 = vmor %vm2887_vm1, %vm2888_vm4 }
 0x8a8   : > { %4260 = vrcp.f32 %v6123_v46  ;;  %v3565_v43 = vadd.f32 %v6106_v51, %v3564_v23  ;;  %v2891_v45 = vand.u32 2147483647, %v6088_v33  ;;  %vm3566_vm7 = vweird.f32 %v6091_v24 }
 0x8a9   : > { %v2870_v48 = vmul.f32 %v4257_v59, %v2869_v12  ;;  %v3325_v39 = vsub.f32 1.0, %v3324_v15  ;;  %v3570_v55 = vand.u32 2147483647, %v6091_v24  ;;  %v3545_v32 = vmul.f32 %v6010_v3, %v3544_v9  ;;  %vm6197_vm10 = vmor %vm3566_vm7, %vm3567_vm5 }
 0x8aa   : > { %v3554_v13 = vsel %vm6177_vm6, %v6100_v49, %v3550_v61  ;;  %v3558_v18 = vor.u32 1.1754944e-38, %v3557_v54  ;;  %v2890_v33 = vsel %vm6188_vm8, %v6104_v16, %v2886_v21  ;;  %vm3556_vm0 = vcmp.eq.f32.partialorder %v3555_v0, 8.507059e+37 }
 0x8ab   : > { %v2871_v44 = vadd.f32 %v4257_v59, %v2870_v48  ;;  %3806 = vmatmul.msk.f32.gmra.mxu0 %vm514_vm3, %v3060_v41  ;;  %v3326_v3 = vmul.f32 %v6131_v31, %v3325_v39  ;;  %v3569_v24 = vsel %vm6197_vm10, %v6106_v51, %v3565_v43  ;;  %v2894_v49 = vor.u32 1.1754944e-38, %v2893_v60 }
 0x8ac   : > { %v3573_v56 = vor.u32 1.1754944e-38, %v3572_v38  ;;  %vm2892_vm11 = vcmp.eq.f32.partialorder %v2891_v45, 8.507059e+37  ;;  %v3559_v7 = vsel %vm3556_vm0, %v3558_v18, %v3554_v13  ;;  %vm3571_vm12 = vcmp.eq.f32.partialorder %v3570_v55, 8.507059e+37 }
 0x8ad   : > { %v2875_v34 = vsel %vm2874_vm15, %v4257_v59, %v2871_v44  ;;  %vm3328_vm13 = vweird.f32 %v6102_v36  ;;  %v2895_v26 = vsel %vm2892_vm11, %v2894_v49, %v2890_v33  ;;  %v3327_v48 = vadd.f32 %v6131_v31, %v3326_v3 }
 0x8ae   : > { %v6154_v35 = vpop.eup %4260  ;;  %v2880_v40 = vsel %vm2877_vm2, %v2879_v6, %v2875_v34  ;;  %v3574_v51 = vsel %vm3571_vm12, %v3573_v56, %v3569_v24  ;;  %vm3329_vm14 = vweird.f32 %v6131_v31  ;;  %v3334_v1 = vand.u32 2147483648, %v6102_v36 }
 0x8af   : > { %v3577_v42 = vmul.f32 %v6154_v35, %v6123_v46  ;;  %v4041_v62 = vpop.permute.xlu1 %4040  ;;  %v6163_v53 = vpop.xlane.xlu2 %3291  ;;  %v2881_v47 = vmul.f32 %v6043_v22, %v2880_v40  ;;  %vm3582_vm15 = vweird.f32 %v6154_v35  ;;  %v3332_v4 = vand.u32 2147483647, %v6102_v36  ;;  %vm6223_vm9 = vmor %vm3328_vm13, %vm3329_vm14 }
 0x8b0   : > { %v4042_v52 = vunpack.i.l.bf16 %v4041_v62  ;;  %4262 = vrcp.f32 %v6163_v53  ;;  %v4036_v27 = vpop.permute.xlu0 %4035  ;;  %v4043_v57 = vunpack.i.h.bf16 %v4041_v62  ;;  %v3587_v41 = vand.u32 2147483648, %v6123_v46 }
 0x8b1   : > { %v3578_v20 = vsub.f32 1.0, %v3577_v42  ;;  %v4037_v59 = vunpack.i.l.bf16 %v4036_v27  ;;  %v4038_v28 = vunpack.i.h.bf16 %v4036_v27  ;;  %v2896_v44 = vmul.f32 %v6028_v50, %v2895_v26 }
 0x8b2   : > { %3617 = vmatpush.msrb.mxu1 %v4042_v52  ;;  %vm3581_vm2 = vweird.f32 %v6123_v46  ;;  %v3560_v63 = vmul.f32 %v6014_v11, %v3559_v7  ;;  %v3575_v15 = vmul.f32 %v6034_v17, %v3574_v51  ;;  %v3585_v0 = vand.u32 2147483647, %v6123_v46 }
 0x8b3   : > { %3809 = vmatmul.msk.f32.vlgmr.msra.gmra.mxu0 %vm514_vm3, %v2881_v47  ;;  %v3579_v14 = vmul.f32 %v6154_v35, %v3578_v20  ;;  %v3331_v23 = vsel %vm6223_vm9, %v6131_v31, %v3327_v48  ;;  %vm3583_vm1 = vmor %vm3581_vm2, %vm3582_vm15  ;;  %v3335_v50 = vor.u32 1.1754944e-38, %v3334_v1  ;;  %vm3333_vm4 = vcmp.eq.f32.partialorder %v3332_v4, 8.507059e+37  ;;  %v4045_v47 = vld [vmem:[%s6271_s7] ss:$0 sm:$0xff] }
 0x8b4   : > { %3618 = vmatpush.msrb.mxu1 %v4043_v57  ;;  %3414 = vmatpush.msrb.mxu0 %v4037_v59  ;;  %v3588_v17 = vor.u32 1.1754944e-38, %v3587_v41  ;;  %vm3586_vm5 = vcmp.eq.f32.partialorder %v3585_v0, 8.507059e+37  ;;  %v3349_v6 = vand.u32 2147483648, %v6163_v53  ;;  %vm3343_vm7 = vweird.f32 %v6163_v53 }
 0x8b5   : > { %3815 = vmatmul.msk.f32.vlgmr.msrb.gmra.mxu1 %vm514_vm3, %v3545_v32  ;;  %v3580_v25 = vadd.f32 %v6154_v35, %v3579_v14  ;;  %v3336_v36 = vsel %vm3333_vm4, %v3335_v50, %v3331_v23  ;;  %v3347_v38 = vand.u32 2147483647, %v6163_v53 }
 0x8b6   : > { %v4263_v12 = vpop.eup %4262  ;;  %3415 = vmatpush.msrb.mxu0 %v4038_v28  ;;  %v3337_v9 = vmul.f32 %v6041_v10, %v3336_v36  ;;  %v3350_v40 = vor.u32 1.1754944e-38, %v3349_v6 }
 0x8b7   : > { %v3339_v16 = vmul.f32 %v4263_v12, %v6163_v53  ;;  %v4031_v29 = vpop.permute.xlu2 %4030  ;;  %v3584_v11 = vsel %vm3583_vm1, %v6154_v35, %v3580_v25  ;;  %vm3344_vm6 = vweird.f32 %v4263_v12  ;;  %vm3348_vm10 = vcmp.eq.f32.partialorder %v3347_v38, 8.507059e+37 }
 0x8b8   : > { %v4032_v58 = vunpack.i.l.bf16 %v4031_v29  ;;  %v4033_v5 = vunpack.i.h.bf16 %v4031_v29  ;;  %v3589_v46 = vsel %vm3586_vm5, %v3588_v17, %v3584_v11  ;;  %vm3345_vm8 = vmor %vm3343_vm7, %vm3344_vm6 }
 0x8b9   : > { %v3340_v8 = vsub.f32 1.0, %v3339_v16  ;;  %v3590_v61 = vmul.f32 %v6050_v2, %v3589_v46 }
 0x8ba   : > { %3652 = vmatpush.msrb.mxu2 %v4032_v58 }
 0x8bb   : > { %v3341_v34 = vmul.f32 %v4263_v12, %v3340_v8  ;;  %3810 = vmatmul.msk.f32.gmra.mxu0 %vm514_vm3, %v2896_v44 }
 0x8bc   : > { %3653 = vmatpush.msrb.mxu2 %v4033_v5 }
 0x8bd   : > { %3816 = vmatmul.msk.f32.gmra.mxu1 %vm514_vm3, %v3560_v63  ;;  %3817 = vmatmul.msk.f32.vlgmr.msrb.gmra.mxu2 %vm514_vm3, %v3575_v15  ;;  %v3342_v31 = vadd.f32 %v4263_v12, %v3341_v34 }
 0x8bf   : > { %v3346_v35 = vsel %vm3345_vm8, %v4263_v12, %v3342_v31 }
 0x8c0   : > { %v3351_v42 = vsel %vm3348_vm10, %v3350_v40, %v3346_v35 }
 0x8c1   : > { %v3352_v62 = vmul.f32 %v6054_v30, %v3351_v42 }
 0x8c3   : > { %3813 = vmatmul.msk.f32.vlgmr.msrb.gmra.mxu0 %vm514_vm3, %v3337_v9 }
 0x8c5   : > { %3818 = vmatmul.msk.f32.gmra.mxu2 %vm514_vm3, %v3590_v61 }
 0x8cb   : > { %3814 = vmatmul.msk.f32.gmra.mxu0 %vm514_vm3, %v3352_v62  ;;  %vm3677_vm3 = vcmask 80896  }
 0x8db   : > { %v3090_v39 = vpop.f32.mrf.mxu3 }
 0x8f1   : > { %v3093_v10 = vpop.f32.mrf.mxu3 }
 0x8f9   : > { %v3154_v52 = vpop.f32.mrf.mxu3 }
 0x8fa   : > { %v3155_v43 = vadd.f32 %v3154_v52, %v3090_v39 }
 0x901   : > { %v3157_v27 = vpop.f32.mrf.mxu3 }
 0x902   : > { %v3158_v19 = vadd.f32 %v3157_v27, %v3093_v10 }
 0x909   : > { %v3382_v21 = vpop.f32.mrf.mxu3 }
 0x90a   : > { %v3423_v60 = vadd.f32 %v3382_v21, %v3155_v43 }
 0x911   : > { %v3385_v45 = vpop.f32.mrf.mxu3 }
 0x912   : > { %v3424_v32 = vadd.f32 %v3385_v45, %v3158_v19 }
 0x920   : > { %v3125_v53 = vpop.f32.mrf.mxu0 }
 0x928   : > { %v3128_v2 = vpop.f32.mrf.mxu0 }
 0x930   : > { %v3183_v20 = vpop.f32.mrf.mxu0 }
 0x931   : > { %v3184_v33 = vadd.f32 %v3183_v20, %v3125_v53 }
 0x932   : > { %v3620_v57 = vpop.f32.mrf.mxu1 }
 0x933   : > { %v3661_v59 = vadd.f32 %v3620_v57, %v3423_v60 }
 0x935   : > { %v3665_v30 = vmul.f32 0.25, %v3661_v59 }
 0x937   : > { %v3673_v55 = vadd.f32 %v4045_v47, %v3665_v30 }
 0x938   : > { %v3186_v22 = vpop.f32.mrf.mxu0 }
 0x939   : > { %3678 = vst.msk [vmem:[%s312_s13] sm:$0xff] %vm3677_vm3, %v3673_v55  ;;  %v3187_v56 = vadd.f32 %v3186_v22, %v3128_v2 }
 0x93a   : > { %v3623_v13 = vpop.f32.mrf.mxu1 }
 0x93b   : > { %v3662_v18 = vadd.f32 %v3623_v13, %v3424_v32 }
 0x93d   : > { %v3666_v37 = vmul.f32 0.25, %v3662_v18 }
 0x93f   : > { %v3674_v3 = vadd.f32 %v4045_v47, %v3666_v37 }
 0x940   : > { %v3417_v24 = vpop.f32.mrf.mxu0  ;;  %v3655_v49 = vpop.f32.mrf.mxu2 }
 0x941   : > { %3679 = vst.msk [vmem:[%s312_s13 + $0x8] sm:$0xff] %vm3677_vm3, %v3674_v3  ;;  %v3425_v14 = vadd.f32 %v3417_v24, %v3184_v33 }
 0x943   : > { %v3663_v28 = vadd.f32 %v3655_v49, %v3425_v14 }
 0x945   : > { %v3667_v12 = vmul.f32 0.25, %v3663_v28 }
 0x947   : > { %v3675_v7 = vadd.f32 %v4045_v47, %v3667_v12 }
 0x948   : > { %v3420_v16 = vpop.f32.mrf.mxu0  ;;  %v3658_v26 = vpop.f32.mrf.mxu2 }
 0x949   : > { %3680 = vst.msk [vmem:[%s312_s13 + $0x10] sm:$0xff] %vm3677_vm3, %v3675_v7  ;;  %v3426_v29 = vadd.f32 %v3420_v16, %v3187_v56 }
 0x94b   : > { %v3664_v51 = vadd.f32 %v3658_v26, %v3426_v29 }
 0x94d   : > { %v3668_v48 = vmul.f32 0.25, %v3664_v51 }
 0x94f   : > { %v3676_v58 = vadd.f32 %v4045_v47, %v3668_v48 }
 0x951   : > { %3681 = vst.msk [vmem:[%s312_s13 + $0x18] sm:$0xff] %vm3677_vm3, %v3676_v58 }
 0x952 PF: > { %s18_s27 = sadd.s32 1, %s4278_s27  }
 0x953   : > { %p15_p4 = scmp.ge.s32.totalorder %s18_s27, 4  }
 0x955   :  { %17 = sbr.rel (!%p15_p4) target bundleno = 1 (0x1), region = 82 }

</bundles_post_ra>
